<compile_context>
chip_gen: v6e
topology: v6e:2x2x1
jax: 0.10.0
libtpu: 0.0.40
codegen_flags: <defaults>
</compile_context>

<pallas_src>
import jax
import jax.numpy as jnp
from jax.experimental import pallas as pl
from jax.experimental.pallas import tpu as pltpu


def _make_convlstm_kernel(H, W, Cin, Ch, rows_per_tile, n_tiles, mm_dtype):
    Cz = Ch + Cin            # fused channel order [h ; x]
    K = 9 * Cz + 1           # 9 taps * Cz channels + 1 bias ones-column
    ROWS = rows_per_tile

    def kernel(x_ref, w_ref, h_ref, z_ref, zim_ref, c_ref):
        # x_ref  : (H, W, Cin)      current frame (batch & time squeezed)
        # w_ref  : (K, 4*Ch)        fused im2col weight, last row = bias
        # h_ref  : (H*W, Ch)        output block; doubles as the h(t) state
        # z_ref  : (H+2, W+2, Cz)   zero-padded fused [h ; x] image
        # zim_ref: (H*W, K)         im2col slab (+ ones bias column)
        # c_ref  : (H*W, Ch)        cell state, persistent across timesteps
        t = pl.program_id(1)

        @pl.when(t == 0)
        def _init():
            # fresh batch element: zero padding borders + h channels (state
            # None) + cell state; fill zim with ones so the bias column
            # (never overwritten by the tap writes) stays 1.
            z_ref[...] = jnp.zeros_like(z_ref)
            c_ref[...] = jnp.zeros_like(c_ref)
            zim_ref[...] = jnp.ones((H * W, K), mm_dtype)

        # 1) place this step's input frame into the x channels of [h ; x].
        z_ref[1:H + 1, 1:W + 1, Ch:Ch + Cin] = x_ref[...]

        # 2) im2col: pack the 9 shifted taps along K, once per timestep
        #    (columns 0 .. 9*Cz-1; column 9*Cz stays the bias ones column).
        for dy in range(3):
            for dx in range(3):
                k0 = (dy * 3 + dx) * Cz
                tap = z_ref[dy:dy + H, dx:dx + W, :].astype(mm_dtype)
                zim_ref[:, k0:k0 + Cz] = tap.reshape(H * W, Cz)

        # 3) row tiles: ONE fused matmul per tile (bias folded in), then the
        #    LSTM gate math straight off the (ROWS, 4*Ch) f32 accumulator.
        def tile_body(i, carry):
            r0 = pl.multiple_of(i * ROWS, ROWS)
            slab = zim_ref[pl.ds(r0, ROWS), :]
            acc = jnp.dot(slab, w_ref[...], preferred_element_type=jnp.float32)
            sig = jax.nn.sigmoid(acc[:, 0:3 * Ch])      # i | f | o gates
            g_g = jnp.tanh(acc[:, 3 * Ch:4 * Ch])       # cell candidate
            i_g = sig[:, 0:Ch]
            f_g = sig[:, Ch:2 * Ch]
            o_g = sig[:, 2 * Ch:3 * Ch]
            c_new = f_g * c_ref[pl.ds(r0, ROWS), :] + i_g * g_g
            h_new = o_g * jnp.tanh(c_new)
            c_ref[pl.ds(r0, ROWS), :] = c_new
            h_ref[pl.ds(r0, ROWS), :] = h_new            # output ref = h state
            return carry

        jax.lax.fori_loop(0, n_tiles, tile_body, 0)

        # 4) stage h(t) back into the fused buffer for the next step's conv
        #    (h sits at lane offset 0 -> unshifted store).
        z_ref[1:H + 1, 1:W + 1, 0:Ch] = h_ref[...].reshape(H, W, Ch)

    return kernel


def convlstm_aggregation(x_nchw, w_oihw, bias, input_img_num, hidden,
                         matmul_dtype=jnp.bfloat16):
    """x_nchw: (B, input_img_num*3, H, W) -> (B, hidden, H, W), like PyTorch.

    matmul_dtype=jnp.bfloat16 (default) runs the conv on the MXU in bf16 with
    f32 accumulation / f32 state math; pass jnp.float32 for bit-closer output.
    """
    B, Ctot, H, W = x_nchw.shape
    T = input_img_num
    Cin = Ctot // T
    Ch = hidden
    Cg = 4 * Ch
    Cz = Ch + Cin
    K = 9 * Cz + 1

    # Fused weight: reorder conv input channels [x;h] -> [h;x], lay the 9 taps
    # out along the contraction dim and append the bias as the last row.
    w = jnp.asarray(w_oihw, jnp.float32)                          # (Cg, Cin+Ch, 3, 3)
    w_r = jnp.concatenate([w[:, Cin:Cin + Ch], w[:, :Cin]], 1)    # (Cg, Cz, 3, 3)
    w_hwio = jnp.transpose(w_r, (2, 3, 1, 0))                     # (3, 3, Cz, Cg)
    w_fused = jnp.concatenate(
        [w_hwio.reshape(9 * Cz, Cg),
         jnp.asarray(bias, jnp.float32).reshape(1, Cg)], 0)       # (K, Cg)
    w_fused = w_fused.astype(matmul_dtype)

    # Time-major, channels-last frame sequence (single reshape + transpose).
    x_seq = jnp.transpose(
        x_nchw.reshape(B, T, Cin, H, W), (1, 0, 3, 4, 2)).astype(jnp.float32)

    # Row tiling of the flattened (H*W) positions: largest divisor <= 128
    # (prefer sublane-aligned multiples of 8) -> accumulator <= (128, Cg).
    n_rows = H * W
    divs = [d for d in range(1, min(128, n_rows) + 1) if n_rows % d == 0]
    divs8 = [d for d in divs if d % 8 == 0]
    ROWS = max(divs8) if divs8 else max(divs)
    n_tiles = n_rows // ROWS

    kernel = _make_convlstm_kernel(H, W, Cin, Ch, ROWS, n_tiles, matmul_dtype)

    # Explicit VMEM budget (scratch + resident weight/output + frame blocks).
    mm_bytes = jnp.dtype(matmul_dtype).itemsize
    scratch_bytes = ((H + 2) * (W + 2) * Cz * 4      # padded [h ; x]
                     + n_rows * K * mm_bytes         # im2col slab
                     + n_rows * Ch * 4)              # cell state
    io_bytes = (2 * H * W * Cin * 4                  # double-buffered frame
                + 2 * K * Cg * mm_bytes              # resident weight
                + n_rows * Ch * 4)                   # resident output block
    vmem_limit = int(min(96 * 2 ** 20,
                         max(32 * 2 ** 20, 2 * (scratch_bytes + io_bytes))))

    h_flat = pl.pallas_call(
        kernel,
        out_shape=jax.ShapeDtypeStruct((B * n_rows, Ch), jnp.float32),
        grid_spec=pltpu.PrefetchScalarGridSpec(
            num_scalar_prefetch=0,
            grid=(B, T),                 # batch: parallel, time: recurrence
            in_specs=[
                pl.BlockSpec((None, None, H, W, Cin),
                             lambda b, t: (t, b, 0, 0, 0)),
                pl.BlockSpec((K, Cg), lambda b, t: (0, 0)),
            ],
            out_specs=pl.BlockSpec((n_rows, Ch), lambda b, t: (b, 0)),
            scratch_shapes=[
                pltpu.VMEM((H + 2, W + 2, Cz), jnp.float32),   # padded [h ; x]
                pltpu.VMEM((n_rows, K), matmul_dtype),          # im2col (+ bias col)
                pltpu.VMEM((n_rows, Ch), jnp.float32),          # cell state c
            ],
        ),
        compiler_params=pltpu.CompilerParams(
            dimension_semantics=("parallel", "arbitrary"),
            vmem_limit_bytes=vmem_limit),
    )(x_seq, w_fused)

    h = h_flat.reshape(B, H, W, Ch)
    return jnp.transpose(h, (0, 3, 1, 2))            # back to NCHW like PyTorch


def ref_convlstm_aggregation(x_nchw, w_oihw, b, input_img_num, hidden):
    """Plain-JAX f32 reference of the same math (correctness check)."""
    B, Ctot, H, W = x_nchw.shape
    T = input_img_num
    Cin = Ctot // T
    Ch = hidden
    w = jnp.transpose(w_oihw, (2, 3, 1, 0)).astype(jnp.float32)
    x = jnp.transpose(x_nchw, (0, 2, 3, 1)).astype(jnp.float32)
    h = jnp.zeros((B, H, W, Ch), jnp.float32)
    c = jnp.zeros((B, H, W, Ch), jnp.float32)
    for t in range(T):
        xt = x[..., t * Cin:(t + 1) * Cin]
        z = jnp.concatenate([xt, h], axis=-1)
        zp = jnp.pad(z, ((0, 0), (1, 1), (1, 1), (0, 0)))
        gates = jnp.zeros((B, H, W, 4 * Ch), jnp.float32)
        for dy in range(3):
            for dx in range(3):
                gates = gates + jnp.einsum(
                    'bhwc,co->bhwo', zp[:, dy:dy + H, dx:dx + W, :], w[dy, dx],
                    precision=jax.lax.Precision.HIGHEST)
        gates = gates + b.reshape(1, 1, 1, 4 * Ch)
        i_g = jax.nn.sigmoid(gates[..., 0:Ch])
        f_g = jax.nn.sigmoid(gates[..., Ch:2 * Ch])
        o_g = jax.nn.sigmoid(gates[..., 2 * Ch:3 * Ch])
        g_g = jnp.tanh(gates[..., 3 * Ch:])
        c = f_g * c + i_g * g_g
        h = o_g * jnp.tanh(c)
    return jnp.transpose(h, (0, 3, 1, 2))


if __name__ == "__main__":
    B, H, W = 2, 16, 16
    input_img_num = 4        # sequence length (x has input_img_num * 3 channels)
    output_channels = 16     # hidden size of the ConvLSTM
    Cin = 3

    key = jax.random.PRNGKey(0)
    k1, k2, k3 = jax.random.split(key, 3)
    x = jax.random.normal(k1, (B, input_img_num * Cin, H, W), jnp.float32)
    # Conv2d(Cin + hidden, 4*hidden, kernel_size=3, padding=1) parameters.
    w = 0.1 * jax.random.normal(
        k2, (4 * output_channels, Cin + output_channels, 3, 3), jnp.float32)
    b = 0.1 * jax.random.normal(k3, (4 * output_channels,), jnp.float32)

    ref = jax.block_until_ready(
        ref_convlstm_aggregation(x, w, b, input_img_num, output_channels))

    # Default (bf16 MXU) path.
    out = jax.block_until_ready(
        convlstm_aggregation(x, w, b, input_img_num, output_channels))
    assert out.shape == (B, output_channels, H, W), out.shape
    err_bf16 = float(jnp.max(jnp.abs(out - ref)))
    assert err_bf16 < 3e-2, f"bf16 path max abs err {err_bf16}"

    # f32 matmul path (tight check of the kernel math itself).
    out_f32 = jax.block_until_ready(
        convlstm_aggregation(x, w, b, input_img_num, output_channels,
                             matmul_dtype=jnp.float32))
    err_f32 = float(jnp.max(jnp.abs(out_f32 - ref)))
    assert err_f32 < 5e-3, f"f32 path max abs err {err_f32}"

    print("KERNEL_OK")
</pallas_src>

<mosaic_0001>
module attributes {stable_mosaic.version = 11 : i64} {
  func.func @kernel(%arg0: i32, %arg1: i32, %arg2: memref<1x1x16x16x3xf32, #tpu.memory_space<vmem>>, %arg3: memref<172x64xbf16, #tpu.memory_space<vmem>>, %arg4: memref<256x16xf32, #tpu.memory_space<vmem>>, %arg5: memref<18x18x19xf32, #tpu.memory_space<vmem>>, %arg6: memref<256x172xbf16, #tpu.memory_space<vmem>>, %arg7: memref<256x16xf32, #tpu.memory_space<vmem>>) attributes {dimension_semantics = [#tpu.dimension_semantics<parallel>, #tpu.dimension_semantics<arbitrary>], iteration_bounds = array<i64: 2, 4>, scalar_prefetch = 0 : i64, scratch_operands = 3 : i64, tpu.core_type = #tpu.core_type<tc>, window_params = [{transform_indices = @transform_0, window_bounds = array<i64: 1, 1, 16, 16, 3>}, {pipeline_mode = #tpu.pipeline_mode<synchronous>, transform_indices = @transform_1, window_bounds = array<i64: 172, 64>}, {transform_indices = @transform_2, window_bounds = array<i64: 256, 16>}]} {
    %c0_i32 = arith.constant 0 : i32
    %0 = arith.cmpi eq, %arg1, %c0_i32 : i32
    %1 = arith.extui %0 : i1 to i32
    %c0_i32_0 = arith.constant 0 : i32
    %2 = arith.cmpi ne, %1, %c0_i32_0 : i32
    scf.if %2 {
      %cst = arith.constant 0.000000e+00 : f32
      %46 = vector.broadcast %cst : f32 to vector<18x18x19xf32>
      %c0_49 = arith.constant 0 : index
      %c0_50 = arith.constant 0 : index
      %c0_51 = arith.constant 0 : index
      %47 = vector.load %arg5[%c0_49, %c0_50, %c0_51] : memref<18x18x19xf32, #tpu.memory_space<vmem>>, vector<18x18x19xf32>
      tpu.vector_store %arg5[%c0_49, %c0_50, %c0_51], %46 {strides = array<i32>} : memref<18x18x19xf32, #tpu.memory_space<vmem>>, vector<18x18x19xf32>,
      %cst_52 = arith.constant 0.000000e+00 : f32
      %48 = vector.broadcast %cst_52 : f32 to vector<256x16xf32>
      %c0_53 = arith.constant 0 : index
      %c0_54 = arith.constant 0 : index
      %49 = vector.load %arg7[%c0_53, %c0_54] : memref<256x16xf32, #tpu.memory_space<vmem>>, vector<256x16xf32>
      tpu.vector_store %arg7[%c0_53, %c0_54], %48 {strides = array<i32>} : memref<256x16xf32, #tpu.memory_space<vmem>>, vector<256x16xf32>,
      %cst_55 = arith.constant 1.000000e+00 : bf16
      %50 = vector.broadcast %cst_55 : bf16 to vector<256x172xbf16>
      %c0_56 = arith.constant 0 : index
      %c0_57 = arith.constant 0 : index
      %51 = vector.load %arg6[%c0_56, %c0_57] : memref<256x172xbf16, #tpu.memory_space<vmem>>, vector<256x172xbf16>
      tpu.vector_store %arg6[%c0_56, %c0_57], %50 {strides = array<i32>} : memref<256x172xbf16, #tpu.memory_space<vmem>>, vector<256x172xbf16>,
    } else {
    }
    %c0 = arith.constant 0 : index
    %c0_1 = arith.constant 0 : index
    %c0_2 = arith.constant 0 : index
    %c0_3 = arith.constant 0 : index
    %c0_4 = arith.constant 0 : index
    %3 = vector.load %arg2[%c0, %c0_1, %c0_2, %c0_3, %c0_4] : memref<1x1x16x16x3xf32, #tpu.memory_space<vmem>>, vector<1x1x16x16x3xf32>
    %4 = vector.shape_cast %3 : vector<1x1x16x16x3xf32> to vector<16x16x3xf32>
    %c1 = arith.constant 1 : index
    %c1_5 = arith.constant 1 : index
    %c16 = arith.constant 16 : index
    %5 = vector.load %arg5[%c1, %c1_5, %c16] : memref<18x18x19xf32, #tpu.memory_space<vmem>>, vector<16x16x3xf32>
    tpu.vector_store %arg5[%c1, %c1_5, %c16], %4 {strides = array<i32>} : memref<18x18x19xf32, #tpu.memory_space<vmem>>, vector<16x16x3xf32>,
    %c0_6 = arith.constant 0 : index
    %c0_7 = arith.constant 0 : index
    %c0_8 = arith.constant 0 : index
    %6 = vector.load %arg5[%c0_6, %c0_7, %c0_8] : memref<18x18x19xf32, #tpu.memory_space<vmem>>, vector<16x16x19xf32>
    %7 = arith.truncf %6 : vector<16x16x19xf32> to vector<16x16x19xbf16>
    %8 = vector.shape_cast %7 : vector<16x16x19xbf16> to vector<256x19xbf16>
    %c0_9 = arith.constant 0 : index
    %c0_10 = arith.constant 0 : index
    %9 = vector.load %arg6[%c0_9, %c0_10] : memref<256x172xbf16, #tpu.memory_space<vmem>>, vector<256x19xbf16>
    tpu.vector_store %arg6[%c0_9, %c0_10], %8 {strides = array<i32>} : memref<256x172xbf16, #tpu.memory_space<vmem>>, vector<256x19xbf16>,
    %c0_11 = arith.constant 0 : index
    %c1_12 = arith.constant 1 : index
    %c0_13 = arith.constant 0 : index
    %10 = vector.load %arg5[%c0_11, %c1_12, %c0_13] : memref<18x18x19xf32, #tpu.memory_space<vmem>>, vector<16x16x19xf32>
    %11 = arith.truncf %10 : vector<16x16x19xf32> to vector<16x16x19xbf16>
    %12 = vector.shape_cast %11 : vector<16x16x19xbf16> to vector<256x19xbf16>
    %c0_14 = arith.constant 0 : index
    %c19 = arith.constant 19 : index
    %13 = vector.load %arg6[%c0_14, %c19] : memref<256x172xbf16, #tpu.memory_space<vmem>>, vector<256x19xbf16>
    tpu.vector_store %arg6[%c0_14, %c19], %12 {strides = array<i32>} : memref<256x172xbf16, #tpu.memory_space<vmem>>, vector<256x19xbf16>,
    %c0_15 = arith.constant 0 : index
    %c2 = arith.constant 2 : index
    %c0_16 = arith.constant 0 : index
    %14 = vector.load %arg5[%c0_15, %c2, %c0_16] : memref<18x18x19xf32, #tpu.memory_space<vmem>>, vector<16x16x19xf32>
    %15 = arith.truncf %14 : vector<16x16x19xf32> to vector<16x16x19xbf16>
    %16 = vector.shape_cast %15 : vector<16x16x19xbf16> to vector<256x19xbf16>
    %c0_17 = arith.constant 0 : index
    %c38 = arith.constant 38 : index
    %17 = vector.load %arg6[%c0_17, %c38] : memref<256x172xbf16, #tpu.memory_space<vmem>>, vector<256x19xbf16>
    tpu.vector_store %arg6[%c0_17, %c38], %16 {strides = array<i32>} : memref<256x172xbf16, #tpu.memory_space<vmem>>, vector<256x19xbf16>,
    %c1_18 = arith.constant 1 : index
    %c0_19 = arith.constant 0 : index
    %c0_20 = arith.constant 0 : index
    %18 = vector.load %arg5[%c1_18, %c0_19, %c0_20] : memref<18x18x19xf32, #tpu.memory_space<vmem>>, vector<16x16x19xf32>
    %19 = arith.truncf %18 : vector<16x16x19xf32> to vector<16x16x19xbf16>
    %20 = vector.shape_cast %19 : vector<16x16x19xbf16> to vector<256x19xbf16>
    %c0_21 = arith.constant 0 : index
    %c57 = arith.constant 57 : index
    %21 = vector.load %arg6[%c0_21, %c57] : memref<256x172xbf16, #tpu.memory_space<vmem>>, vector<256x19xbf16>
    tpu.vector_store %arg6[%c0_21, %c57], %20 {strides = array<i32>} : memref<256x172xbf16, #tpu.memory_space<vmem>>, vector<256x19xbf16>,
    %c1_22 = arith.constant 1 : index
    %c1_23 = arith.constant 1 : index
    %c0_24 = arith.constant 0 : index
    %22 = vector.load %arg5[%c1_22, %c1_23, %c0_24] : memref<18x18x19xf32, #tpu.memory_space<vmem>>, vector<16x16x19xf32>
    %23 = arith.truncf %22 : vector<16x16x19xf32> to vector<16x16x19xbf16>
    %24 = vector.shape_cast %23 : vector<16x16x19xbf16> to vector<256x19xbf16>
    %c0_25 = arith.constant 0 : index
    %c76 = arith.constant 76 : index
    %25 = vector.load %arg6[%c0_25, %c76] : memref<256x172xbf16, #tpu.memory_space<vmem>>, vector<256x19xbf16>
    tpu.vector_store %arg6[%c0_25, %c76], %24 {strides = array<i32>} : memref<256x172xbf16, #tpu.memory_space<vmem>>, vector<256x19xbf16>,
    %c1_26 = arith.constant 1 : index
    %c2_27 = arith.constant 2 : index
    %c0_28 = arith.constant 0 : index
    %26 = vector.load %arg5[%c1_26, %c2_27, %c0_28] : memref<18x18x19xf32, #tpu.memory_space<vmem>>, vector<16x16x19xf32>
    %27 = arith.truncf %26 : vector<16x16x19xf32> to vector<16x16x19xbf16>
    %28 = vector.shape_cast %27 : vector<16x16x19xbf16> to vector<256x19xbf16>
    %c0_29 = arith.constant 0 : index
    %c95 = arith.constant 95 : index
    %29 = vector.load %arg6[%c0_29, %c95] : memref<256x172xbf16, #tpu.memory_space<vmem>>, vector<256x19xbf16>
    tpu.vector_store %arg6[%c0_29, %c95], %28 {strides = array<i32>} : memref<256x172xbf16, #tpu.memory_space<vmem>>, vector<256x19xbf16>,
    %c2_30 = arith.constant 2 : index
    %c0_31 = arith.constant 0 : index
    %c0_32 = arith.constant 0 : index
    %30 = vector.load %arg5[%c2_30, %c0_31, %c0_32] : memref<18x18x19xf32, #tpu.memory_space<vmem>>, vector<16x16x19xf32>
    %31 = arith.truncf %30 : vector<16x16x19xf32> to vector<16x16x19xbf16>
    %32 = vector.shape_cast %31 : vector<16x16x19xbf16> to vector<256x19xbf16>
    %c0_33 = arith.constant 0 : index
    %c114 = arith.constant 114 : index
    %33 = vector.load %arg6[%c0_33, %c114] : memref<256x172xbf16, #tpu.memory_space<vmem>>, vector<256x19xbf16>
    tpu.vector_store %arg6[%c0_33, %c114], %32 {strides = array<i32>} : memref<256x172xbf16, #tpu.memory_space<vmem>>, vector<256x19xbf16>,
    %c2_34 = arith.constant 2 : index
    %c1_35 = arith.constant 1 : index
    %c0_36 = arith.constant 0 : index
    %34 = vector.load %arg5[%c2_34, %c1_35, %c0_36] : memref<18x18x19xf32, #tpu.memory_space<vmem>>, vector<16x16x19xf32>
    %35 = arith.truncf %34 : vector<16x16x19xf32> to vector<16x16x19xbf16>
    %36 = vector.shape_cast %35 : vector<16x16x19xbf16> to vector<256x19xbf16>
    %c0_37 = arith.constant 0 : index
    %c133 = arith.constant 133 : index
    %37 = vector.load %arg6[%c0_37, %c133] : memref<256x172xbf16, #tpu.memory_space<vmem>>, vector<256x19xbf16>
    tpu.vector_store %arg6[%c0_37, %c133], %36 {strides = array<i32>} : memref<256x172xbf16, #tpu.memory_space<vmem>>, vector<256x19xbf16>,
    %c2_38 = arith.constant 2 : index
    %c2_39 = arith.constant 2 : index
    %c0_40 = arith.constant 0 : index
    %38 = vector.load %arg5[%c2_38, %c2_39, %c0_40] : memref<18x18x19xf32, #tpu.memory_space<vmem>>, vector<16x16x19xf32>
    %39 = arith.truncf %38 : vector<16x16x19xf32> to vector<16x16x19xbf16>
    %40 = vector.shape_cast %39 : vector<16x16x19xbf16> to vector<256x19xbf16>
    %c0_41 = arith.constant 0 : index
    %c152 = arith.constant 152 : index
    %41 = vector.load %arg6[%c0_41, %c152] : memref<256x172xbf16, #tpu.memory_space<vmem>>, vector<256x19xbf16>
    tpu.vector_store %arg6[%c0_41, %c152], %40 {strides = array<i32>} : memref<256x172xbf16, #tpu.memory_space<vmem>>, vector<256x19xbf16>,
    %c0_i32_42 = arith.constant 0 : i32
    %c2_i32 = arith.constant 2 : i32
    %42 = arith.addi %c0_i32_42, %c2_i32 : i32
    %c1_i32 = arith.constant 1 : i32
    scf.for %arg8 = %c0_i32_42 to %42 step %c1_i32  : i32 {
      %c128_i32 = arith.constant 128 : i32
      %46 = arith.muli %arg8, %c128_i32 : i32
      %47 = tpu.assume_multiple %46, 128 : i32
      %48 = arith.index_cast %47 : i32 to index
      %c0_49 = arith.constant 0 : index
      %49 = vector.load %arg6[%48, %c0_49] : memref<256x172xbf16, #tpu.memory_space<vmem>>, vector<128x172xbf16>
      %c0_50 = arith.constant 0 : index
      %c0_51 = arith.constant 0 : index
      %50 = vector.load %arg3[%c0_50, %c0_51] : memref<172x64xbf16, #tpu.memory_space<vmem>>, vector<172x64xbf16>
      %cst = arith.constant dense<0.000000e+00> : vector<128x64xf32>
      %51 = tpu.matmul %49, %50, %cst {dimension_numbers = #tpu.dot_dimension_numbers<[1], [0], [0], [1], [0, 0, 1, 1], [], []>} : vector<128x172xbf16>, vector<172x64xbf16>, vector<128x64xf32> -> vector<128x64xf32>
      %52 = vector.extract_strided_slice %51 {offsets = [0, 0], sizes = [128, 48], strides = [1, 1]} : vector<128x64xf32> to vector<128x48xf32>
      %53 = arith.negf %52 : vector<128x48xf32>
      %54 = math.exp %53 : vector<128x48xf32>
      %cst_52 = arith.constant 1.000000e+00 : f32
      %55 = vector.broadcast %cst_52 : f32 to vector<128x48xf32>
      %56 = arith.addf %55, %54 : vector<128x48xf32>
      %57 = arith.divf %55, %56 : vector<128x48xf32>
      %58 = vector.extract_strided_slice %51 {offsets = [0, 48], sizes = [128, 16], strides = [1, 1]} : vector<128x64xf32> to vector<128x16xf32>
      %59 = math.tanh %58 : vector<128x16xf32>
      %60 = vector.extract_strided_slice %57 {offsets = [0, 0], sizes = [128, 16], strides = [1, 1]} : vector<128x48xf32> to vector<128x16xf32>
      %61 = vector.extract_strided_slice %57 {offsets = [0, 16], sizes = [128, 16], strides = [1, 1]} : vector<128x48xf32> to vector<128x16xf32>
      %62 = vector.extract_strided_slice %57 {offsets = [0, 32], sizes = [128, 16], strides = [1, 1]} : vector<128x48xf32> to vector<128x16xf32>
      %63 = arith.index_cast %47 : i32 to index
      %c0_53 = arith.constant 0 : index
      %64 = vector.load %arg7[%63, %c0_53] : memref<256x16xf32, #tpu.memory_space<vmem>>, vector<128x16xf32>
      %65 = arith.mulf %61, %64 : vector<128x16xf32>
      %66 = arith.mulf %60, %59 : vector<128x16xf32>
      %67 = arith.addf %65, %66 : vector<128x16xf32>
      %68 = math.tanh %67 : vector<128x16xf32>
      %69 = arith.mulf %62, %68 : vector<128x16xf32>
      %70 = arith.index_cast %47 : i32 to index
      %c0_54 = arith.constant 0 : index
      %71 = vector.load %arg7[%70, %c0_54] : memref<256x16xf32, #tpu.memory_space<vmem>>, vector<128x16xf32>
      tpu.vector_store %arg7[%70, %c0_54], %67 {strides = array<i32>} : memref<256x16xf32, #tpu.memory_space<vmem>>, vector<128x16xf32>,
      %72 = arith.index_cast %47 : i32 to index
      %c0_55 = arith.constant 0 : index
      %73 = vector.load %arg4[%72, %c0_55] : memref<256x16xf32, #tpu.memory_space<vmem>>, vector<128x16xf32>
      tpu.vector_store %arg4[%72, %c0_55], %69 {strides = array<i32>} : memref<256x16xf32, #tpu.memory_space<vmem>>, vector<128x16xf32>,
    }
    %c2_i32_43 = arith.constant 2 : i32
    %c0_44 = arith.constant 0 : index
    %c0_45 = arith.constant 0 : index
    %43 = vector.load %arg4[%c0_44, %c0_45] : memref<256x16xf32, #tpu.memory_space<vmem>>, vector<256x16xf32>
    %44 = vector.shape_cast %43 : vector<256x16xf32> to vector<16x16x16xf32>
    %c1_46 = arith.constant 1 : index
    %c1_47 = arith.constant 1 : index
    %c0_48 = arith.constant 0 : index
    %45 = vector.load %arg5[%c1_46, %c1_47, %c0_48] : memref<18x18x19xf32, #tpu.memory_space<vmem>>, vector<16x16x16xf32>
    tpu.vector_store %arg5[%c1_46, %c1_47, %c0_48], %44 {strides = array<i32>} : memref<18x18x19xf32, #tpu.memory_space<vmem>>, vector<16x16x16xf32>,
    return
  }
  func.func @transform_0(%arg0: i32, %arg1: i32) -> (i32, i32, i32, i32, i32) {
    %c0_i32 = arith.constant 0 : i32
    %c0_i32_0 = arith.constant 0 : i32
    %c0_i32_1 = arith.constant 0 : i32
    %c0_i32_2 = arith.constant 0 : i32
    return %arg1, %arg0, %c0_i32, %c0_i32_0, %c0_i32_1 : i32, i32, i32, i32, i32
  }
  func.func @transform_1(%arg0: i32, %arg1: i32) -> (i32, i32) {
    %c0_i32 = arith.constant 0 : i32
    %c0_i32_0 = arith.constant 0 : i32
    %c0_i32_1 = arith.constant 0 : i32
    return %c0_i32, %c0_i32_0 : i32, i32
  }
  func.func @transform_2(%arg0: i32, %arg1: i32) -> (i32, i32) {
    %c0_i32 = arith.constant 0 : i32
    %c0_i32_0 = arith.constant 0 : i32
    return %arg0, %c0_i32 : i32, i32
  }
}

</mosaic_0001>

<bundles_post_ra>
// kernel: tpu_custom_call.1
= control target key start
LH: loop header
LB: loop body
LE: loop exit
PB: predicated region body
PF: predicated region fallthrough
CT: control target
= control target key end

     0   :  { %s4877_s9 = smov 0   ;;  %s4879_s10 = smov 0   ;;  %s6770_s0 = inlined_call_operand.vmem [shape: f32[4,2,16,16,3], index: 0, kind: input, shape index: {}]   ;;  %s6771_s1 = inlined_call_operand.vmem [shape: bf16[172,64], index: 1, kind: input, shape index: {}]   ;;  %s6772_s2 = inlined_call_operand.vmem [shape: f32[512,16], index: 2, kind: output, shape index: {}]  }
   0x1   :  { %s4881_s11 = smov 0   ;;  %s4883_s12 = smov 0  }
   0x2   :  { %s4885_s13 = smov 0  }
   0x3 LB: > { %s21_s14 = sadd.s32 1, %s4832_s11  ;;  %s24_s15 = sadd.s32 1, %s4836_s12  ;;  %s4840_s13 = sphi %s4885_s13, %s12_s13   ;;  %s4836_s12 = sphi %s4883_s12, %s6807_s12   ;;  %s4832_s11 = sphi %s4881_s11, %s6806_s11   ;;  %s4828_s10 = sphi %s4879_s10, %s6805_s10   ;;  %s4824_s9 = sphi %s4877_s9, %s6804_s9  }
   0x4   : > { %p22_p0 = scmp.ge.s32.totalorder %s21_s14, 4  ;;  %p3909_p1 = scmp.ge.s32.totalorder %s4840_s13, 1 }
   0x5   : > { %p130_p2 = scmp.lt.s32.totalorder %s4840_s13, 9 }
   0x6   : > { %s6809_s14 = smov (%p22_p0, %s21_s14), 0  ;;  %s6811_s15 = smov (!%p22_p0, %s24_s15), %s4836_s12 }
   0x7   : > { %p131_p3 = pnand %p3909_p1, %p130_p2  ;;  %p26_p4 = scmp.ge.s32.totalorder %s6811_s15, 2 }
   0x9   : > { %s6813_s15 = smov (%p26_p4, %s6811_s15), 0  ;;  %134 = sbr.rel (%p131_p3) target bundleno = 1630 (0x65e), region = 28 }
   0xe   : > { %p156_p5 = scmp.lt.s32.totalorder %s4824_s9, 3  ;;  %p158_p6 = scmp.lt.s32.totalorder %s4828_s10, 1 }
   0xf   : > { %s3913_s16 = sshll.u32 %s4828_s10, 5  ;;  %p3915_p8 = scmp.ne.s32.totalorder %s4824_s9, 0 }
  0x10   : > { %s157_s17 = scalar_select %p156_p5, %s4824_s9, 3 }
  0x11   : > { %s6815_s10 = smov (!%p158_p6, %s4828_s10), 1  ;;  %p166_p7 = scmp.lt.s32.totalorder %s3913_s16, 63 }
  0x12   : > { %s3911_s18 = sshll.u32 %s157_s17, 6  ;;  %s3910_s19 = sshll.u32 %s6815_s10, 5 }
  0x13   : > { %s162_s20 = sadd.s32 %s3911_s18, %s3910_s19  ;;  %s6817_s16 = smov (!%p166_p7, %s3913_s16), 63 }
  0x14   : > { %s3912_s21 = sshll.u32 %s162_s20, 3  ;;  %s3914_s25 = sshll.u32 %s6817_s16, 3 }
  0x15   : > { %s4914_s24 = scalar_lea.vmem %s6770_s0, %s3912_s21  ;;  %s4919_s28 = scalar_lea.vmem %s6772_s2, %s3914_s25 }
  0x16   : > { %176 = sbr.rel (%p3915_p8) target bundleno = 88 (0x58), region = 32 }
  0x1b   : > { %vm177_vm0 = vcmask 154624   ;;  %vm180_vm1 = vcmask 148480   ;;  %vm233_vm2 = vcmask 130048   ;;  %v4846_v0 = vmov 0.0  }
  0x1c   : > { %178 = vst.msk [vmem:[#allocation2] sm:$0xff] %vm177_vm0, %v4846_v0  ;;  %179 = vst.msk [vmem:[#allocation2 + $0x8] sm:$0xff] %vm177_vm0, %v4846_v0  ;;  %vm266_vm3 = vcmask 1043456   ;;  %vm267_vm4 = vcmask 359428   ;;  %v4847_v2 = vmov 1065369472  }
  0x1d   : > { %182 = vst.msk [vmem:[#allocation2 + $0x18] sm:$0xff] %vm177_vm0, %v4846_v0  ;;  %183 = vst.msk [vmem:[#allocation2 + $0x20] sm:$0xff] %vm177_vm0, %v4846_v0 }
  0x1e   : > { %185 = vst.msk [vmem:[#allocation2 + $0x30] sm:$0xff] %vm177_vm0, %v4846_v0  ;;  %186 = vst.msk [vmem:[#allocation2 + $0x38] sm:$0xff] %vm177_vm0, %v4846_v0 }
  0x1f   : > { %188 = vst.msk [vmem:[#allocation2 + $0x48] sm:$0xff] %vm177_vm0, %v4846_v0  ;;  %189 = vst.msk [vmem:[#allocation2 + $0x50] sm:$0xff] %vm177_vm0, %v4846_v0 }
  0x20   : > { %191 = vst.msk [vmem:[#allocation2 + $0x60] sm:$0xff] %vm177_vm0, %v4846_v0  ;;  %192 = vst.msk [vmem:[#allocation2 + $0x68] sm:$0xff] %vm177_vm0, %v4846_v0 }
  0x21   : > { %194 = vst.msk [vmem:[#allocation2 + $0x78] sm:$0xff] %vm177_vm0, %v4846_v0  ;;  %195 = vst.msk [vmem:[#allocation2 + $0x80] sm:$0xff] %vm177_vm0, %v4846_v0 }
  0x22   : > { %197 = vst.msk [vmem:[#allocation2 + $0x90] sm:$0xff] %vm177_vm0, %v4846_v0  ;;  %198 = vst.msk [vmem:[#allocation2 + $0x98] sm:$0xff] %vm177_vm0, %v4846_v0 }
  0x23   : > { %200 = vst.msk [vmem:[#allocation2 + $0xa8] sm:$0xff] %vm177_vm0, %v4846_v0  ;;  %201 = vst.msk [vmem:[#allocation2 + $0xb0] sm:$0xff] %vm177_vm0, %v4846_v0 }
  0x24   : > { %203 = vst.msk [vmem:[#allocation2 + $0xc0] sm:$0xff] %vm177_vm0, %v4846_v0  ;;  %204 = vst.msk [vmem:[#allocation2 + $0xc8] sm:$0xff] %vm177_vm0, %v4846_v0 }
  0x25   : > { %206 = vst.msk [vmem:[#allocation2 + $0xd8] sm:$0xff] %vm177_vm0, %v4846_v0  ;;  %207 = vst.msk [vmem:[#allocation2 + $0xe0] sm:$0xff] %vm177_vm0, %v4846_v0 }
  0x26   : > { %209 = vst.msk [vmem:[#allocation2 + $0xf0] sm:$0xff] %vm177_vm0, %v4846_v0  ;;  %210 = vst.msk [vmem:[#allocation2 + $0xf8] sm:$0xff] %vm177_vm0, %v4846_v0 }
  0x27   : > { %212 = vst.msk [vmem:[#allocation2 + $0x108] sm:$0xff] %vm177_vm0, %v4846_v0  ;;  %213 = vst.msk [vmem:[#allocation2 + $0x110] sm:$0xff] %vm177_vm0, %v4846_v0 }
  0x28   : > { %215 = vst.msk [vmem:[#allocation2 + $0x120] sm:$0xff] %vm177_vm0, %v4846_v0  ;;  %216 = vst.msk [vmem:[#allocation2 + $0x128] sm:$0xff] %vm177_vm0, %v4846_v0 }
  0x29   : > { %218 = vst.msk [vmem:[#allocation2 + $0x138] sm:$0xff] %vm177_vm0, %v4846_v0  ;;  %219 = vst.msk [vmem:[#allocation2 + $0x140] sm:$0xff] %vm177_vm0, %v4846_v0 }
  0x2a   : > { %221 = vst.msk [vmem:[#allocation2 + $0x150] sm:$0xff] %vm177_vm0, %v4846_v0  ;;  %222 = vst.msk [vmem:[#allocation2 + $0x158] sm:$0xff] %vm177_vm0, %v4846_v0 }
  0x2b   : > { %224 = vst.msk [vmem:[#allocation2 + $0x168] sm:$0xff] %vm177_vm0, %v4846_v0  ;;  %225 = vst.msk [vmem:[#allocation2 + $0x170] sm:$0xff] %vm177_vm0, %v4846_v0 }
  0x2c   : > { %227 = vst.msk [vmem:[#allocation2 + $0x180] sm:$0xff] %vm177_vm0, %v4846_v0  ;;  %228 = vst.msk [vmem:[#allocation2 + $0x188] sm:$0xff] %vm177_vm0, %v4846_v0 }
  0x2d   : > { %230 = vst.msk [vmem:[#allocation2 + $0x198] sm:$0xff] %vm177_vm0, %v4846_v0  ;;  %231 = vst.msk [vmem:[#allocation2 + $0x1a0] sm:$0xff] %vm177_vm0, %v4846_v0 }
  0x2e   : > { %181 = vst.msk [vmem:[#allocation2 + $0x10] sm:$0x3] %vm180_vm1, %v4846_v0  ;;  %184 = vst.msk [vmem:[#allocation2 + $0x28] sm:$0x3] %vm180_vm1, %v4846_v0 }
  0x2f   : > { %187 = vst.msk [vmem:[#allocation2 + $0x40] sm:$0x3] %vm180_vm1, %v4846_v0  ;;  %190 = vst.msk [vmem:[#allocation2 + $0x58] sm:$0x3] %vm180_vm1, %v4846_v0 }
  0x30   : > { %193 = vst.msk [vmem:[#allocation2 + $0x70] sm:$0x3] %vm180_vm1, %v4846_v0  ;;  %196 = vst.msk [vmem:[#allocation2 + $0x88] sm:$0x3] %vm180_vm1, %v4846_v0 }
  0x31   : > { %199 = vst.msk [vmem:[#allocation2 + $0xa0] sm:$0x3] %vm180_vm1, %v4846_v0  ;;  %202 = vst.msk [vmem:[#allocation2 + $0xb8] sm:$0x3] %vm180_vm1, %v4846_v0 }
  0x32   : > { %205 = vst.msk [vmem:[#allocation2 + $0xd0] sm:$0x3] %vm180_vm1, %v4846_v0  ;;  %208 = vst.msk [vmem:[#allocation2 + $0xe8] sm:$0x3] %vm180_vm1, %v4846_v0 }
  0x33   : > { %211 = vst.msk [vmem:[#allocation2 + $0x100] sm:$0x3] %vm180_vm1, %v4846_v0  ;;  %214 = vst.msk [vmem:[#allocation2 + $0x118] sm:$0x3] %vm180_vm1, %v4846_v0 }
  0x34   : > { %217 = vst.msk [vmem:[#allocation2 + $0x130] sm:$0x3] %vm180_vm1, %v4846_v0  ;;  %220 = vst.msk [vmem:[#allocation2 + $0x148] sm:$0x3] %vm180_vm1, %v4846_v0 }
  0x35   : > { %223 = vst.msk [vmem:[#allocation2 + $0x160] sm:$0x3] %vm180_vm1, %v4846_v0  ;;  %226 = vst.msk [vmem:[#allocation2 + $0x178] sm:$0x3] %vm180_vm1, %v4846_v0 }
  0x36   : > { %229 = vst.msk [vmem:[#allocation2 + $0x190] sm:$0x3] %vm180_vm1, %v4846_v0  ;;  %232 = vst.msk [vmem:[#allocation2 + $0x1a8] sm:$0x3] %vm180_vm1, %v4846_v0 }
  0x37   : > { %234 = vst.msk [vmem:[#allocation4] sm:$0xff] %vm233_vm2, %v4846_v0  ;;  %235 = vst.msk [vmem:[#allocation4 + $0x8] sm:$0xff] %vm233_vm2, %v4846_v0 }
  0x38   : > { %236 = vst.msk [vmem:[#allocation4 + $0x10] sm:$0xff] %vm233_vm2, %v4846_v0  ;;  %237 = vst.msk [vmem:[#allocation4 + $0x18] sm:$0xff] %vm233_vm2, %v4846_v0 }
  0x39   : > { %238 = vst.msk [vmem:[#allocation4 + $0x20] sm:$0xff] %vm233_vm2, %v4846_v0  ;;  %239 = vst.msk [vmem:[#allocation4 + $0x28] sm:$0xff] %vm233_vm2, %v4846_v0 }
  0x3a   : > { %240 = vst.msk [vmem:[#allocation4 + $0x30] sm:$0xff] %vm233_vm2, %v4846_v0  ;;  %241 = vst.msk [vmem:[#allocation4 + $0x38] sm:$0xff] %vm233_vm2, %v4846_v0 }
  0x3b   : > { %242 = vst.msk [vmem:[#allocation4 + $0x40] sm:$0xff] %vm233_vm2, %v4846_v0  ;;  %243 = vst.msk [vmem:[#allocation4 + $0x48] sm:$0xff] %vm233_vm2, %v4846_v0 }
  0x3c   : > { %244 = vst.msk [vmem:[#allocation4 + $0x50] sm:$0xff] %vm233_vm2, %v4846_v0  ;;  %245 = vst.msk [vmem:[#allocation4 + $0x58] sm:$0xff] %vm233_vm2, %v4846_v0 }
  0x3d   : > { %246 = vst.msk [vmem:[#allocation4 + $0x60] sm:$0xff] %vm233_vm2, %v4846_v0  ;;  %247 = vst.msk [vmem:[#allocation4 + $0x68] sm:$0xff] %vm233_vm2, %v4846_v0 }
  0x3e   : > { %248 = vst.msk [vmem:[#allocation4 + $0x70] sm:$0xff] %vm233_vm2, %v4846_v0  ;;  %249 = vst.msk [vmem:[#allocation4 + $0x78] sm:$0xff] %vm233_vm2, %v4846_v0 }
  0x3f   : > { %250 = vst.msk [vmem:[#allocation4 + $0x80] sm:$0xff] %vm233_vm2, %v4846_v0  ;;  %251 = vst.msk [vmem:[#allocation4 + $0x88] sm:$0xff] %vm233_vm2, %v4846_v0 }
  0x40   : > { %252 = vst.msk [vmem:[#allocation4 + $0x90] sm:$0xff] %vm233_vm2, %v4846_v0  ;;  %253 = vst.msk [vmem:[#allocation4 + $0x98] sm:$0xff] %vm233_vm2, %v4846_v0 }
  0x41   : > { %254 = vst.msk [vmem:[#allocation4 + $0xa0] sm:$0xff] %vm233_vm2, %v4846_v0  ;;  %255 = vst.msk [vmem:[#allocation4 + $0xa8] sm:$0xff] %vm233_vm2, %v4846_v0 }
  0x42   : > { %256 = vst.msk [vmem:[#allocation4 + $0xb0] sm:$0xff] %vm233_vm2, %v4846_v0  ;;  %257 = vst.msk [vmem:[#allocation4 + $0xb8] sm:$0xff] %vm233_vm2, %v4846_v0 }
  0x43   : > { %258 = vst.msk [vmem:[#allocation4 + $0xc0] sm:$0xff] %vm233_vm2, %v4846_v0  ;;  %259 = vst.msk [vmem:[#allocation4 + $0xc8] sm:$0xff] %vm233_vm2, %v4846_v0 }
  0x44   : > { %260 = vst.msk [vmem:[#allocation4 + $0xd0] sm:$0xff] %vm233_vm2, %v4846_v0  ;;  %261 = vst.msk [vmem:[#allocation4 + $0xd8] sm:$0xff] %vm233_vm2, %v4846_v0 }
  0x45   : > { %262 = vst.msk [vmem:[#allocation4 + $0xe0] sm:$0xff] %vm233_vm2, %v4846_v0  ;;  %263 = vst.msk [vmem:[#allocation4 + $0xe8] sm:$0xff] %vm233_vm2, %v4846_v0 }
  0x46   : > { %264 = vst.msk [vmem:[#allocation4 + $0xf0] sm:$0xff] %vm233_vm2, %v4846_v0  ;;  %265 = vst.msk [vmem:[#allocation4 + $0xf8] sm:$0xff] %vm233_vm2, %v4846_v0 }
  0x47   : > { %vm5094_vm5 = vmor %vm267_vm4, %vm266_vm3 }
  0x48   : > { %269 = vst.msk [vmem:[#allocation3] sm:$0xff] %vm5094_vm5, %v4847_v2  ;;  %270 = vst.msk [vmem:[#allocation3 + $0x8] sm:$0xff] %vm5094_vm5, %v4847_v2 }
  0x49   : > { %271 = vst.msk [vmem:[#allocation3 + $0x10] sm:$0xff] %vm5094_vm5, %v4847_v2  ;;  %272 = vst.msk [vmem:[#allocation3 + $0x18] sm:$0xff] %vm5094_vm5, %v4847_v2 }
  0x4a   : > { %273 = vst.msk [vmem:[#allocation3 + $0x20] sm:$0xff] %vm5094_vm5, %v4847_v2  ;;  %274 = vst.msk [vmem:[#allocation3 + $0x28] sm:$0xff] %vm5094_vm5, %v4847_v2 }
  0x4b   : > { %275 = vst.msk [vmem:[#allocation3 + $0x30] sm:$0xff] %vm5094_vm5, %v4847_v2  ;;  %276 = vst.msk [vmem:[#allocation3 + $0x38] sm:$0xff] %vm5094_vm5, %v4847_v2 }
  0x4c   : > { %277 = vst.msk [vmem:[#allocation3 + $0x40] sm:$0xff] %vm5094_vm5, %v4847_v2  ;;  %278 = vst.msk [vmem:[#allocation3 + $0x48] sm:$0xff] %vm5094_vm5, %v4847_v2 }
  0x4d   : > { %279 = vst.msk [vmem:[#allocation3 + $0x50] sm:$0xff] %vm5094_vm5, %v4847_v2  ;;  %280 = vst.msk [vmem:[#allocation3 + $0x58] sm:$0xff] %vm5094_vm5, %v4847_v2 }
  0x4e   : > { %281 = vst.msk [vmem:[#allocation3 + $0x60] sm:$0xff] %vm5094_vm5, %v4847_v2  ;;  %282 = vst.msk [vmem:[#allocation3 + $0x68] sm:$0xff] %vm5094_vm5, %v4847_v2 }
  0x4f   : > { %283 = vst.msk [vmem:[#allocation3 + $0x70] sm:$0xff] %vm5094_vm5, %v4847_v2  ;;  %284 = vst.msk [vmem:[#allocation3 + $0x78] sm:$0xff] %vm5094_vm5, %v4847_v2 }
  0x50   : > { %285 = vst.msk [vmem:[#allocation3 + $0x80] sm:$0xff] %vm5094_vm5, %v4847_v2  ;;  %286 = vst.msk [vmem:[#allocation3 + $0x88] sm:$0xff] %vm5094_vm5, %v4847_v2 }
  0x51   : > { %287 = vst.msk [vmem:[#allocation3 + $0x90] sm:$0xff] %vm5094_vm5, %v4847_v2  ;;  %288 = vst.msk [vmem:[#allocation3 + $0x98] sm:$0xff] %vm5094_vm5, %v4847_v2 }
  0x52   : > { %289 = vst.msk [vmem:[#allocation3 + $0xa0] sm:$0xff] %vm5094_vm5, %v4847_v2  ;;  %290 = vst.msk [vmem:[#allocation3 + $0xa8] sm:$0xff] %vm5094_vm5, %v4847_v2 }
  0x53   : > { %291 = vst.msk [vmem:[#allocation3 + $0xb0] sm:$0xff] %vm5094_vm5, %v4847_v2  ;;  %292 = vst.msk [vmem:[#allocation3 + $0xb8] sm:$0xff] %vm5094_vm5, %v4847_v2 }
  0x54   : > { %293 = vst.msk [vmem:[#allocation3 + $0xc0] sm:$0xff] %vm5094_vm5, %v4847_v2  ;;  %294 = vst.msk [vmem:[#allocation3 + $0xc8] sm:$0xff] %vm5094_vm5, %v4847_v2 }
  0x55   : > { %295 = vst.msk [vmem:[#allocation3 + $0xd0] sm:$0xff] %vm5094_vm5, %v4847_v2  ;;  %296 = vst.msk [vmem:[#allocation3 + $0xd8] sm:$0xff] %vm5094_vm5, %v4847_v2 }
  0x56   : > { %297 = vst.msk [vmem:[#allocation3 + $0xe0] sm:$0xff] %vm5094_vm5, %v4847_v2  ;;  %298 = vst.msk [vmem:[#allocation3 + $0xe8] sm:$0xff] %vm5094_vm5, %v4847_v2 }
  0x57   : > { %299 = vst.msk [vmem:[#allocation3 + $0xf0] sm:$0xff] %vm5094_vm5, %v4847_v2  ;;  %300 = vst.msk [vmem:[#allocation3 + $0xf8] sm:$0xff] %vm5094_vm5, %v4847_v2 }
  0x58 PF: > { %v303_v3 = vld [vmem:[%s4914_s24 + $0x10] sm:$0xff]  ;;  %v301_v4 = vld [vmem:[%s4914_s24] sm:$0xff]  ;;  %s4848_s29 = smov 16   ;;  %v304_v5 = vld [vmem:[%s4914_s24 + $0x18] sm:$0xff]  ;;  %s4849_s30 = smov 19   ;;  %vm655_vm6 = vcmask 150528  }
  0x59   : > { %369 = vrot.lane.b32.xlu1 %v303_v3, %s4848_s29  ;;  %365 = vrot.lane.b32.xlu0 %v301_v4, %s4848_s29  ;;  %v302_v6 = vld [vmem:[%s4914_s24 + $0x8] sm:$0xff]  ;;  %v305_v7 = vld [vmem:[%s4914_s24 + $0x20] sm:$0xff]  ;;  %vm462_vm7 = vcmask 154752   ;;  %vm912_vm8 = vcmask 306328   ;;  %s4850_s3 = smov 38   ;;  %s4851_s4 = smov 57  }
  0x5a   : > { %v306_v8 = vld [vmem:[%s4914_s24 + $0x28] sm:$0xff]  ;;  %v307_v9 = vld [vmem:[%s4914_s24 + $0x30] sm:$0xff]  ;;  %v308_v10 = vld [vmem:[%s4914_s24 + $0x38] sm:$0xff]  ;;  %vm1169_vm9 = vcmask 462128   ;;  %s4852_s5 = smov 76   ;;  %vm1426_vm10 = vcmask 617928  }
  0x5b   : > { %v309_v11 = vld [vmem:[%s4914_s24 + $0x40] sm:$0xff]  ;;  %v310_v12 = vld [vmem:[%s4914_s24 + $0x48] sm:$0xff]  ;;  %v311_v13 = vld [vmem:[%s4914_s24 + $0x50] sm:$0xff]  ;;  %s4853_s6 = smov 95   ;;  %vm1683_vm11 = vcmask 773728   ;;  %s4854_s7 = smov 114  }
  0x5c   : > { %v312_v14 = vld [vmem:[%s4914_s24 + $0x58] sm:$0xff]  ;;  %v313_v15 = vld [vmem:[%s4914_s24 + $0x60] sm:$0xff]  ;;  %v314_v16 = vld [vmem:[%s4914_s24 + $0x68] sm:$0xff]  ;;  %vm1940_vm12 = vcmask 929528   ;;  %s4855_s8 = smov 5   ;;  %vm2263_vm13 = vcmask 1044368  }
  0x5d   : > { %371 = vrot.lane.b32.xlu1 %v304_v5, %s4848_s29  ;;  %367 = vrot.lane.b32.xlu0 %v302_v6, %s4848_s29  ;;  %v315_v17 = vld [vmem:[%s4914_s24 + $0x70] sm:$0xff]  ;;  %v316_v18 = vld [vmem:[%s4914_s24 + $0x78] sm:$0xff]  ;;  %v688_v33 = vld [vmem:[#allocation2 + $0x1] sm:$0xff]  ;;  %vm2264_vm14 = vcmask 39940   ;;  %vm2198_vm15 = vcmask 932864   ;;  %s4856_s9 = smov 24  }
  0x5e   : > { %v317_v19 = vld [vmem:[%s4914_s24 + $0x80] sm:$0xff]  ;;  %v318_v20 = vld [vmem:[%s4914_s24 + $0x88] sm:$0xff]  ;;  %v319_v21 = vld [vmem:[%s4914_s24 + $0x90] sm:$0xff]  ;;  %v4292_v37 = vpack.c.bf16 %v688_v33, %v688_v33  ;;  %vm2522_vm1 = vcmask 191528   ;;  %vm2779_vm2 = vcmask 347328   ;;  %s6221_s10 = smov 0  }
  0x5f   : > { %v320_v22 = vld [vmem:[%s4914_s24 + $0x98] sm:$0xff]  ;;  %v321_v23 = vld [vmem:[%s4914_s24 + $0xa0] sm:$0xff]  ;;  %v322_v24 = vld [vmem:[%s4914_s24 + $0xa8] sm:$0xff] }
  0x60   : > { %v323_v25 = vld [vmem:[%s4914_s24 + $0xb0] sm:$0xff]  ;;  %v324_v26 = vld [vmem:[%s4914_s24 + $0xb8] sm:$0xff]  ;;  %v325_v27 = vld [vmem:[%s4914_s24 + $0xc0] sm:$0xff] }
  0x61   : > { %373 = vrot.lane.b32.xlu0 %v305_v7, %s4848_s29  ;;  %375 = vrot.lane.b32.xlu1 %v306_v8, %s4848_s29  ;;  %v326_v28 = vld [vmem:[%s4914_s24 + $0xc8] sm:$0xff]  ;;  %v327_v29 = vld [vmem:[%s4914_s24 + $0xd0] sm:$0xff]  ;;  %v495_v39 = vld [vmem:[#allocation2] sm:$0xff] }
  0x62   : > { %v328_v30 = vld [vmem:[%s4914_s24 + $0xd8] sm:$0xff]  ;;  %v329_v31 = vld [vmem:[%s4914_s24 + $0xe0] sm:$0xff]  ;;  %v330_v32 = vld [vmem:[%s4914_s24 + $0xe8] sm:$0xff]  ;;  %v4260_v40 = vpack.c.bf16 %v495_v39, %v495_v39 }
  0x63   : > { %v331_v34 = vld [vmem:[%s4914_s24 + $0xf0] sm:$0xff]  ;;  %v332_v35 = vld [vmem:[%s4914_s24 + $0xf8] sm:$0xff]  ;;  %v496_v41 = vld [vmem:[#allocation2 + $0x8] sm:$0xff] }
  0x64   : > { %v689_v36 = vld [vmem:[#allocation2 + $0x9] sm:$0xff]  ;;  %656 = vst.msk [vmem:[#allocation3] sm:$0xf] %vm655_vm6, %v4260_v40  ;;  %v4261_v42 = vpack.c.bf16 %v496_v41, %v496_v41  ;;  %vm5988_vm0 = vmor %vm2264_vm14, %vm2263_vm13 }
  0x65   : > { %377 = vrot.lane.b32.xlu0 %v307_v9, %s4848_s29  ;;  %379 = vrot.lane.b32.xlu1 %v308_v10, %s4848_s29  ;;  %v4293_v38 = vpack.c.bf16 %v689_v36, %v689_v36 }
  0x66   : > { %657 = vst.msk [vmem:[#allocation3 + $0x8] sm:$0xf] %vm655_vm6, %v4261_v42 }
  0x69   : > { %381 = vrot.lane.b32.xlu0 %v309_v11, %s4848_s29  ;;  %383 = vrot.lane.b32.xlu1 %v310_v12, %s4848_s29 }
  0x6d   : > { %385 = vrot.lane.b32.xlu0 %v311_v13, %s4848_s29  ;;  %387 = vrot.lane.b32.xlu1 %v312_v14, %s4848_s29 }
  0x71   : > { %389 = vrot.lane.b32.xlu0 %v313_v15, %s4848_s29  ;;  %391 = vrot.lane.b32.xlu1 %v314_v16, %s4848_s29 }
  0x75   : > { %393 = vrot.lane.b32.xlu0 %v315_v17, %s4848_s29  ;;  %395 = vrot.lane.b32.xlu1 %v316_v18, %s4848_s29 }
  0x79   : > { %397 = vrot.lane.b32.xlu0 %v317_v19, %s4848_s29  ;;  %399 = vrot.lane.b32.xlu1 %v318_v20, %s4848_s29 }
  0x7d   : > { %401 = vrot.lane.b32.xlu0 %v319_v21, %s4848_s29  ;;  %403 = vrot.lane.b32.xlu1 %v320_v22, %s4848_s29 }
  0x81   : > { %405 = vrot.lane.b32.xlu0 %v321_v23, %s4848_s29  ;;  %407 = vrot.lane.b32.xlu1 %v322_v24, %s4848_s29 }
  0x85   : > { %409 = vrot.lane.b32.xlu0 %v323_v25, %s4848_s29  ;;  %411 = vrot.lane.b32.xlu1 %v324_v26, %s4848_s29 }
  0x89   : > { %413 = vrot.lane.b32.xlu0 %v325_v27, %s4848_s29  ;;  %415 = vrot.lane.b32.xlu1 %v326_v28, %s4848_s29 }
  0x8d   : > { %417 = vrot.lane.b32.xlu0 %v327_v29, %s4848_s29  ;;  %419 = vrot.lane.b32.xlu1 %v328_v30, %s4848_s29 }
  0x91   : > { %421 = vrot.lane.b32.xlu0 %v329_v31, %s4848_s29  ;;  %423 = vrot.lane.b32.xlu1 %v330_v32, %s4848_s29 }
  0x95   : > { %425 = vrot.lane.b32.xlu0 %v331_v34, %s4848_s29  ;;  %427 = vrot.lane.b32.xlu1 %v332_v35, %s4848_s29 }
  0x99   : > { %816 = vrot.lane.b32.xlu0 %v4292_v37, %s4849_s30  ;;  %818 = vrot.lane.b32.xlu1 %v4293_v38, %s4849_s30 }
  0xcb   : > { %v370_v43 = vpop.permute.xlu1 %369  ;;  %v366_v44 = vpop.permute.xlu0 %365 }
  0xcc   : > { %465 = vst.msk [vmem:[#allocation2 + $0x31] sm:$0xff] %vm462_vm7, %v370_v43  ;;  %463 = vst.msk [vmem:[#allocation2 + $0x19] sm:$0xff] %vm462_vm7, %v366_v44 }
  0xcf   : > { %v372_v45 = vpop.permute.xlu1 %371  ;;  %v368_v46 = vpop.permute.xlu0 %367 }
  0xd0   : > { %466 = vst.msk [vmem:[#allocation2 + $0x39] sm:$0xff] %vm462_vm7, %v372_v45  ;;  %464 = vst.msk [vmem:[#allocation2 + $0x21] sm:$0xff] %vm462_vm7, %v368_v46 }
  0xd3   : > { %v374_v47 = vpop.permute.xlu0 %373  ;;  %v690_v48 = vld [vmem:[#allocation2 + $0x19] sm:$0xff]  ;;  %v376_v49 = vpop.permute.xlu1 %375  ;;  %v692_v50 = vld [vmem:[#allocation2 + $0x31] sm:$0xff] }
  0xd4   : > { %v497_v51 = vld [vmem:[#allocation2 + $0x18] sm:$0xff]  ;;  %467 = vst.msk [vmem:[#allocation2 + $0x49] sm:$0xff] %vm462_vm7, %v374_v47  ;;  %v4294_v52 = vpack.c.bf16 %v690_v48, %v690_v48  ;;  %468 = vst.msk [vmem:[#allocation2 + $0x51] sm:$0xff] %vm462_vm7, %v376_v49  ;;  %v499_v54 = vld [vmem:[#allocation2 + $0x30] sm:$0xff]  ;;  %v4296_v56 = vpack.c.bf16 %v692_v50, %v692_v50 }
  0xd5   : > { %v5236_v53 = vpack.c.bf16 %v497_v51, %v497_v51  ;;  %v5238_v55 = vpack.c.bf16 %v499_v54, %v499_v54 }
  0xd6   : > { %820 = vrot.lane.b32.xlu0 %v4294_v52, %s4849_s30 }
  0xd7   : > { %658 = vst.msk [vmem:[#allocation3 + $0x10] sm:$0xf] %vm655_vm6, %v5236_v53  ;;  %v378_v57 = vpop.permute.xlu0 %377  ;;  %v691_v58 = vld [vmem:[#allocation2 + $0x21] sm:$0xff]  ;;  %v380_v59 = vpop.permute.xlu1 %379  ;;  %v693_v60 = vld [vmem:[#allocation2 + $0x39] sm:$0xff]  ;;  %660 = vst.msk [vmem:[#allocation3 + $0x20] sm:$0xf] %vm655_vm6, %v5238_v55 }
  0xd8   : > { %469 = vst.msk [vmem:[#allocation2 + $0x61] sm:$0xff] %vm462_vm7, %v378_v57  ;;  %v4295_v61 = vpack.c.bf16 %v691_v58, %v691_v58  ;;  %470 = vst.msk [vmem:[#allocation2 + $0x69] sm:$0xff] %vm462_vm7, %v380_v59  ;;  %v498_v62 = vld [vmem:[#allocation2 + $0x20] sm:$0xff]  ;;  %v500_v63 = vld [vmem:[#allocation2 + $0x38] sm:$0xff]  ;;  %v4297_v0 = vpack.c.bf16 %v693_v60, %v693_v60 }
  0xd9   : > { %v5249_v1 = vpack.c.bf16 %v498_v62, %v498_v62  ;;  %v5251_v2 = vpack.c.bf16 %v500_v63, %v500_v63 }
  0xda   : > { %824 = vrot.lane.b32.xlu0 %v4296_v56, %s4849_s30  ;;  %822 = vrot.lane.b32.xlu1 %v4295_v61, %s4849_s30 }
  0xdb   : > { %v382_v3 = vpop.permute.xlu0 %381  ;;  %v694_v4 = vld [vmem:[#allocation2 + $0x49] sm:$0xff]  ;;  %v384_v5 = vpop.permute.xlu1 %383  ;;  %v695_v6 = vld [vmem:[#allocation2 + $0x51] sm:$0xff]  ;;  %659 = vst.msk [vmem:[#allocation3 + $0x18] sm:$0xf] %vm655_vm6, %v5249_v1  ;;  %661 = vst.msk [vmem:[#allocation3 + $0x28] sm:$0xf] %vm655_vm6, %v5251_v2 }
  0xdc   : > { %471 = vst.msk [vmem:[#allocation2 + $0x79] sm:$0xff] %vm462_vm7, %v382_v3  ;;  %v4298_v7 = vpack.c.bf16 %v694_v4, %v694_v4  ;;  %472 = vst.msk [vmem:[#allocation2 + $0x81] sm:$0xff] %vm462_vm7, %v384_v5  ;;  %v501_v8 = vld [vmem:[#allocation2 + $0x48] sm:$0xff]  ;;  %v502_v9 = vld [vmem:[#allocation2 + $0x50] sm:$0xff]  ;;  %v4299_v12 = vpack.c.bf16 %v695_v6, %v695_v6 }
  0xdd   : > { %v5259_v10 = vpack.c.bf16 %v501_v8, %v501_v8  ;;  %v5261_v11 = vpack.c.bf16 %v502_v9, %v502_v9 }
  0xde   : > { %826 = vrot.lane.b32.xlu1 %v4297_v0, %s4849_s30  ;;  %828 = vrot.lane.b32.xlu0 %v4298_v7, %s4849_s30 }
  0xdf   : > { %v386_v13 = vpop.permute.xlu0 %385  ;;  %v696_v14 = vld [vmem:[#allocation2 + $0x61] sm:$0xff]  ;;  %v388_v15 = vpop.permute.xlu1 %387  ;;  %v697_v16 = vld [vmem:[#allocation2 + $0x69] sm:$0xff]  ;;  %662 = vst.msk [vmem:[#allocation3 + $0x30] sm:$0xf] %vm655_vm6, %v5259_v10  ;;  %663 = vst.msk [vmem:[#allocation3 + $0x38] sm:$0xf] %vm655_vm6, %v5261_v11 }
  0xe0   : > { %473 = vst.msk [vmem:[#allocation2 + $0x91] sm:$0xff] %vm462_vm7, %v386_v13  ;;  %v4300_v17 = vpack.c.bf16 %v696_v14, %v696_v14  ;;  %474 = vst.msk [vmem:[#allocation2 + $0x99] sm:$0xff] %vm462_vm7, %v388_v15  ;;  %v503_v18 = vld [vmem:[#allocation2 + $0x60] sm:$0xff]  ;;  %v504_v19 = vld [vmem:[#allocation2 + $0x68] sm:$0xff]  ;;  %v4301_v22 = vpack.c.bf16 %v697_v16, %v697_v16 }
  0xe1   : > { %v5271_v20 = vpack.c.bf16 %v503_v18, %v503_v18  ;;  %v5273_v21 = vpack.c.bf16 %v504_v19, %v504_v19 }
  0xe2   : > { %830 = vrot.lane.b32.xlu1 %v4299_v12, %s4849_s30  ;;  %832 = vrot.lane.b32.xlu0 %v4300_v17, %s4849_s30 }
  0xe3   : > { %v390_v23 = vpop.permute.xlu0 %389  ;;  %v698_v24 = vld [vmem:[#allocation2 + $0x79] sm:$0xff]  ;;  %v392_v25 = vpop.permute.xlu1 %391  ;;  %v699_v26 = vld [vmem:[#allocation2 + $0x81] sm:$0xff]  ;;  %664 = vst.msk [vmem:[#allocation3 + $0x40] sm:$0xf] %vm655_vm6, %v5271_v20  ;;  %665 = vst.msk [vmem:[#allocation3 + $0x48] sm:$0xf] %vm655_vm6, %v5273_v21 }
  0xe4   : > { %475 = vst.msk [vmem:[#allocation2 + $0xa9] sm:$0xff] %vm462_vm7, %v390_v23  ;;  %v4302_v27 = vpack.c.bf16 %v698_v24, %v698_v24  ;;  %476 = vst.msk [vmem:[#allocation2 + $0xb1] sm:$0xff] %vm462_vm7, %v392_v25  ;;  %v505_v28 = vld [vmem:[#allocation2 + $0x78] sm:$0xff]  ;;  %v506_v29 = vld [vmem:[#allocation2 + $0x80] sm:$0xff]  ;;  %v4303_v32 = vpack.c.bf16 %v699_v26, %v699_v26 }
  0xe5   : > { %v5283_v30 = vpack.c.bf16 %v505_v28, %v505_v28  ;;  %v5285_v31 = vpack.c.bf16 %v506_v29, %v506_v29 }
  0xe6   : > { %834 = vrot.lane.b32.xlu1 %v4301_v22, %s4849_s30  ;;  %836 = vrot.lane.b32.xlu0 %v4302_v27, %s4849_s30 }
  0xe7   : > { %v394_v33 = vpop.permute.xlu0 %393  ;;  %v700_v34 = vld [vmem:[#allocation2 + $0x91] sm:$0xff]  ;;  %v396_v35 = vpop.permute.xlu1 %395  ;;  %v701_v36 = vld [vmem:[#allocation2 + $0x99] sm:$0xff]  ;;  %666 = vst.msk [vmem:[#allocation3 + $0x50] sm:$0xf] %vm655_vm6, %v5283_v30  ;;  %667 = vst.msk [vmem:[#allocation3 + $0x58] sm:$0xf] %vm655_vm6, %v5285_v31 }
  0xe8   : > { %477 = vst.msk [vmem:[#allocation2 + $0xc1] sm:$0xff] %vm462_vm7, %v394_v33  ;;  %v4304_v37 = vpack.c.bf16 %v700_v34, %v700_v34  ;;  %478 = vst.msk [vmem:[#allocation2 + $0xc9] sm:$0xff] %vm462_vm7, %v396_v35  ;;  %v507_v38 = vld [vmem:[#allocation2 + $0x90] sm:$0xff]  ;;  %v508_v39 = vld [vmem:[#allocation2 + $0x98] sm:$0xff]  ;;  %v4305_v42 = vpack.c.bf16 %v701_v36, %v701_v36 }
  0xe9   : > { %v5295_v40 = vpack.c.bf16 %v507_v38, %v507_v38  ;;  %v5297_v41 = vpack.c.bf16 %v508_v39, %v508_v39 }
  0xea   : > { %838 = vrot.lane.b32.xlu1 %v4303_v32, %s4849_s30  ;;  %840 = vrot.lane.b32.xlu0 %v4304_v37, %s4849_s30 }
  0xeb   : > { %v398_v43 = vpop.permute.xlu0 %397  ;;  %v702_v44 = vld [vmem:[#allocation2 + $0xa9] sm:$0xff]  ;;  %v400_v45 = vpop.permute.xlu1 %399  ;;  %v703_v46 = vld [vmem:[#allocation2 + $0xb1] sm:$0xff]  ;;  %668 = vst.msk [vmem:[#allocation3 + $0x60] sm:$0xf] %vm655_vm6, %v5295_v40  ;;  %669 = vst.msk [vmem:[#allocation3 + $0x68] sm:$0xf] %vm655_vm6, %v5297_v41 }
  0xec   : > { %479 = vst.msk [vmem:[#allocation2 + $0xd9] sm:$0xff] %vm462_vm7, %v398_v43  ;;  %v4306_v47 = vpack.c.bf16 %v702_v44, %v702_v44  ;;  %480 = vst.msk [vmem:[#allocation2 + $0xe1] sm:$0xff] %vm462_vm7, %v400_v45  ;;  %v509_v48 = vld [vmem:[#allocation2 + $0xa8] sm:$0xff]  ;;  %v510_v49 = vld [vmem:[#allocation2 + $0xb0] sm:$0xff]  ;;  %v4307_v52 = vpack.c.bf16 %v703_v46, %v703_v46 }
  0xed   : > { %v5307_v50 = vpack.c.bf16 %v509_v48, %v509_v48  ;;  %v5309_v51 = vpack.c.bf16 %v510_v49, %v510_v49 }
  0xee   : > { %842 = vrot.lane.b32.xlu1 %v4305_v42, %s4849_s30  ;;  %844 = vrot.lane.b32.xlu0 %v4306_v47, %s4849_s30 }
  0xef   : > { %v402_v54 = vpop.permute.xlu0 %401  ;;  %v704_v56 = vld [vmem:[#allocation2 + $0xc1] sm:$0xff]  ;;  %v404_v57 = vpop.permute.xlu1 %403  ;;  %v705_v58 = vld [vmem:[#allocation2 + $0xc9] sm:$0xff]  ;;  %670 = vst.msk [vmem:[#allocation3 + $0x70] sm:$0xf] %vm655_vm6, %v5307_v50  ;;  %671 = vst.msk [vmem:[#allocation3 + $0x78] sm:$0xf] %vm655_vm6, %v5309_v51 }
  0xf0   : > { %481 = vst.msk [vmem:[#allocation2 + $0xf1] sm:$0xff] %vm462_vm7, %v402_v54  ;;  %v4308_v59 = vpack.c.bf16 %v704_v56, %v704_v56  ;;  %482 = vst.msk [vmem:[#allocation2 + $0xf9] sm:$0xff] %vm462_vm7, %v404_v57  ;;  %v511_v60 = vld [vmem:[#allocation2 + $0xc0] sm:$0xff]  ;;  %v512_v61 = vld [vmem:[#allocation2 + $0xc8] sm:$0xff]  ;;  %v4309_v0 = vpack.c.bf16 %v705_v58, %v705_v58 }
  0xf1   : > { %v5319_v62 = vpack.c.bf16 %v511_v60, %v511_v60  ;;  %v5321_v63 = vpack.c.bf16 %v512_v61, %v512_v61 }
  0xf2   : > { %846 = vrot.lane.b32.xlu1 %v4307_v52, %s4849_s30  ;;  %848 = vrot.lane.b32.xlu0 %v4308_v59, %s4849_s30 }
  0xf3   : > { %v406_v3 = vpop.permute.xlu0 %405  ;;  %v706_v4 = vld [vmem:[#allocation2 + $0xd9] sm:$0xff]  ;;  %v408_v5 = vpop.permute.xlu1 %407  ;;  %v707_v6 = vld [vmem:[#allocation2 + $0xe1] sm:$0xff]  ;;  %672 = vst.msk [vmem:[#allocation3 + $0x80] sm:$0xf] %vm655_vm6, %v5319_v62  ;;  %673 = vst.msk [vmem:[#allocation3 + $0x88] sm:$0xf] %vm655_vm6, %v5321_v63 }
  0xf4   : > { %483 = vst.msk [vmem:[#allocation2 + $0x109] sm:$0xff] %vm462_vm7, %v406_v3  ;;  %v4310_v7 = vpack.c.bf16 %v706_v4, %v706_v4  ;;  %484 = vst.msk [vmem:[#allocation2 + $0x111] sm:$0xff] %vm462_vm7, %v408_v5  ;;  %v513_v8 = vld [vmem:[#allocation2 + $0xd8] sm:$0xff]  ;;  %v514_v9 = vld [vmem:[#allocation2 + $0xe0] sm:$0xff]  ;;  %v4311_v14 = vpack.c.bf16 %v707_v6, %v707_v6 }
  0xf5   : > { %v5331_v12 = vpack.c.bf16 %v513_v8, %v513_v8  ;;  %v5333_v13 = vpack.c.bf16 %v514_v9, %v514_v9 }
  0xf6   : > { %850 = vrot.lane.b32.xlu1 %v4309_v0, %s4849_s30  ;;  %852 = vrot.lane.b32.xlu0 %v4310_v7, %s4849_s30 }
  0xf7   : > { %v410_v15 = vpop.permute.xlu0 %409  ;;  %v708_v16 = vld [vmem:[#allocation2 + $0xf1] sm:$0xff]  ;;  %v412_v17 = vpop.permute.xlu1 %411  ;;  %v709_v18 = vld [vmem:[#allocation2 + $0xf9] sm:$0xff]  ;;  %674 = vst.msk [vmem:[#allocation3 + $0x90] sm:$0xf] %vm655_vm6, %v5331_v12  ;;  %675 = vst.msk [vmem:[#allocation3 + $0x98] sm:$0xf] %vm655_vm6, %v5333_v13 }
  0xf8   : > { %485 = vst.msk [vmem:[#allocation2 + $0x121] sm:$0xff] %vm462_vm7, %v410_v15  ;;  %v4312_v19 = vpack.c.bf16 %v708_v16, %v708_v16  ;;  %486 = vst.msk [vmem:[#allocation2 + $0x129] sm:$0xff] %vm462_vm7, %v412_v17  ;;  %v515_v22 = vld [vmem:[#allocation2 + $0xf0] sm:$0xff]  ;;  %v516_v23 = vld [vmem:[#allocation2 + $0xf8] sm:$0xff]  ;;  %v4313_v26 = vpack.c.bf16 %v709_v18, %v709_v18 }
  0xf9   : > { %v5343_v24 = vpack.c.bf16 %v515_v22, %v515_v22  ;;  %v5345_v25 = vpack.c.bf16 %v516_v23, %v516_v23  ;;  %v945_v23 = vld [vmem:[#allocation2 + $0x2] sm:$0xff] }
  0xfa   : > { %854 = vrot.lane.b32.xlu1 %v4311_v14, %s4849_s30  ;;  %856 = vrot.lane.b32.xlu0 %v4312_v19, %s4849_s30 }
  0xfb   : > { %v414_v27 = vpop.permute.xlu0 %413  ;;  %v710_v28 = vld [vmem:[#allocation2 + $0x109] sm:$0xff]  ;;  %v416_v29 = vpop.permute.xlu1 %415  ;;  %v711_v32 = vld [vmem:[#allocation2 + $0x111] sm:$0xff]  ;;  %676 = vst.msk [vmem:[#allocation3 + $0xa0] sm:$0xf] %vm655_vm6, %v5343_v24  ;;  %677 = vst.msk [vmem:[#allocation3 + $0xa8] sm:$0xf] %vm655_vm6, %v5345_v25 }
  0xfc   : > { %487 = vst.msk [vmem:[#allocation2 + $0x139] sm:$0xff] %vm462_vm7, %v414_v27  ;;  %v4314_v33 = vpack.c.bf16 %v710_v28, %v710_v28  ;;  %488 = vst.msk [vmem:[#allocation2 + $0x141] sm:$0xff] %vm462_vm7, %v416_v29  ;;  %v517_v34 = vld [vmem:[#allocation2 + $0x108] sm:$0xff]  ;;  %v518_v35 = vld [vmem:[#allocation2 + $0x110] sm:$0xff]  ;;  %v4315_v38 = vpack.c.bf16 %v711_v32, %v711_v32 }
  0xfd   : > { %v5355_v36 = vpack.c.bf16 %v517_v34, %v517_v34  ;;  %v5357_v37 = vpack.c.bf16 %v518_v35, %v518_v35 }
  0xfe   : > { %858 = vrot.lane.b32.xlu1 %v4313_v26, %s4849_s30  ;;  %860 = vrot.lane.b32.xlu0 %v4314_v33, %s4849_s30 }
  0xff   : > { %v418_v39 = vpop.permute.xlu0 %417  ;;  %v712_v42 = vld [vmem:[#allocation2 + $0x121] sm:$0xff]  ;;  %v420_v43 = vpop.permute.xlu1 %419  ;;  %v713_v44 = vld [vmem:[#allocation2 + $0x129] sm:$0xff]  ;;  %678 = vst.msk [vmem:[#allocation3 + $0xb0] sm:$0xf] %vm655_vm6, %v5355_v36  ;;  %679 = vst.msk [vmem:[#allocation3 + $0xb8] sm:$0xf] %vm655_vm6, %v5357_v37 }
 0x100   : > { %489 = vst.msk [vmem:[#allocation2 + $0x151] sm:$0xff] %vm462_vm7, %v418_v39  ;;  %v4316_v45 = vpack.c.bf16 %v712_v42, %v712_v42  ;;  %490 = vst.msk [vmem:[#allocation2 + $0x159] sm:$0xff] %vm462_vm7, %v420_v43  ;;  %v519_v46 = vld [vmem:[#allocation2 + $0x120] sm:$0xff]  ;;  %v520_v47 = vld [vmem:[#allocation2 + $0x128] sm:$0xff]  ;;  %v4317_v52 = vpack.c.bf16 %v713_v44, %v713_v44 }
 0x101   : > { %v5367_v48 = vpack.c.bf16 %v519_v46, %v519_v46  ;;  %v5369_v49 = vpack.c.bf16 %v520_v47, %v520_v47  ;;  %v946_v39 = vld [vmem:[#allocation2 + $0xa] sm:$0xff]  ;;  %v947_v42 = vld [vmem:[#allocation2 + $0x1a] sm:$0xff]  ;;  %v949_v46 = vld [vmem:[#allocation2 + $0x32] sm:$0xff] }
 0x102   : > { %862 = vrot.lane.b32.xlu1 %v4315_v38, %s4849_s30  ;;  %864 = vrot.lane.b32.xlu0 %v4316_v45, %s4849_s30  ;;  %v4324_v38 = vpack.c.bf16 %v945_v23, %v945_v23  ;;  %v4325_v43 = vpack.c.bf16 %v946_v39, %v946_v39  ;;  %v4326_v44 = vpack.c.bf16 %v947_v42, %v947_v42  ;;  %v948_v45 = vld [vmem:[#allocation2 + $0x22] sm:$0xff] }
 0x103   : > { %v422_v54 = vpop.permute.xlu0 %421  ;;  %v714_v56 = vld [vmem:[#allocation2 + $0x139] sm:$0xff]  ;;  %v424_v57 = vpop.permute.xlu1 %423  ;;  %v715_v58 = vld [vmem:[#allocation2 + $0x141] sm:$0xff]  ;;  %680 = vst.msk [vmem:[#allocation3 + $0xc0] sm:$0xf] %vm655_vm6, %v5367_v48  ;;  %681 = vst.msk [vmem:[#allocation3 + $0xc8] sm:$0xf] %vm655_vm6, %v5369_v49  ;;  %v4327_v47 = vpack.c.bf16 %v948_v45, %v948_v45 }
 0x104   : > { %491 = vst.msk [vmem:[#allocation2 + $0x169] sm:$0xff] %vm462_vm7, %v422_v54  ;;  %v4318_v59 = vpack.c.bf16 %v714_v56, %v714_v56  ;;  %492 = vst.msk [vmem:[#allocation2 + $0x171] sm:$0xff] %vm462_vm7, %v424_v57  ;;  %v521_v60 = vld [vmem:[#allocation2 + $0x138] sm:$0xff]  ;;  %v522_v61 = vld [vmem:[#allocation2 + $0x140] sm:$0xff]  ;;  %v4319_v4 = vpack.c.bf16 %v715_v58, %v715_v58 }
 0x105   : > { %v5379_v0 = vpack.c.bf16 %v521_v60, %v521_v60  ;;  %v5381_v3 = vpack.c.bf16 %v522_v61, %v522_v61  ;;  %v950_v54 = vld [vmem:[#allocation2 + $0x3a] sm:$0xff]  ;;  %v951_v56 = vld [vmem:[#allocation2 + $0x4a] sm:$0xff]  ;;  %v953_v60 = vld [vmem:[#allocation2 + $0x62] sm:$0xff] }
 0x106   : > { %866 = vrot.lane.b32.xlu1 %v4317_v52, %s4849_s30  ;;  %868 = vrot.lane.b32.xlu0 %v4318_v59, %s4849_s30  ;;  %v4328_v52 = vpack.c.bf16 %v949_v46, %v949_v46  ;;  %v4329_v57 = vpack.c.bf16 %v950_v54, %v950_v54  ;;  %v4330_v58 = vpack.c.bf16 %v951_v56, %v951_v56  ;;  %v952_v59 = vld [vmem:[#allocation2 + $0x52] sm:$0xff] }
 0x107   : > { %v716_v5 = vld [vmem:[#allocation2 + $0x151] sm:$0xff]  ;;  %v717_v6 = vld [vmem:[#allocation2 + $0x159] sm:$0xff]  ;;  %v426_v7 = vpop.permute.xlu0 %425  ;;  %v428_v8 = vpop.permute.xlu1 %427  ;;  %682 = vst.msk [vmem:[#allocation3 + $0xd0] sm:$0xf] %vm655_vm6, %v5379_v0  ;;  %683 = vst.msk [vmem:[#allocation3 + $0xd8] sm:$0xf] %vm655_vm6, %v5381_v3  ;;  %v4331_v61 = vpack.c.bf16 %v952_v59, %v952_v59 }
 0x108   : > { %v4320_v9 = vpack.c.bf16 %v716_v5, %v716_v5  ;;  %493 = vst.msk [vmem:[#allocation2 + $0x181] sm:$0xff] %vm462_vm7, %v426_v7  ;;  %494 = vst.msk [vmem:[#allocation2 + $0x189] sm:$0xff] %vm462_vm7, %v428_v8  ;;  %v523_v14 = vld [vmem:[#allocation2 + $0x150] sm:$0xff]  ;;  %v524_v15 = vld [vmem:[#allocation2 + $0x158] sm:$0xff]  ;;  %v4321_v18 = vpack.c.bf16 %v717_v6, %v717_v6 }
 0x109   : > { %v5391_v16 = vpack.c.bf16 %v523_v14, %v523_v14  ;;  %v5393_v17 = vpack.c.bf16 %v524_v15, %v524_v15  ;;  %v954_v5 = vld [vmem:[#allocation2 + $0x6a] sm:$0xff]  ;;  %v955_v6 = vld [vmem:[#allocation2 + $0x7a] sm:$0xff]  ;;  %v957_v14 = vld [vmem:[#allocation2 + $0x92] sm:$0xff] }
 0x10a   : > { %870 = vrot.lane.b32.xlu1 %v4319_v4, %s4849_s30  ;;  %872 = vrot.lane.b32.xlu0 %v4320_v9, %s4849_s30  ;;  %v4332_v4 = vpack.c.bf16 %v953_v60, %v953_v60  ;;  %v4333_v7 = vpack.c.bf16 %v954_v5, %v954_v5  ;;  %v4334_v8 = vpack.c.bf16 %v955_v6, %v955_v6  ;;  %v956_v9 = vld [vmem:[#allocation2 + $0x82] sm:$0xff] }
 0x10b   : > { %v718_v19 = vld [vmem:[#allocation2 + $0x169] sm:$0xff]  ;;  %v719_v22 = vld [vmem:[#allocation2 + $0x171] sm:$0xff]  ;;  %v817_v26 = vpop.permute.xlu0 %816  ;;  %v819_v27 = vpop.permute.xlu1 %818  ;;  %684 = vst.msk [vmem:[#allocation3 + $0xe0] sm:$0xf] %vm655_vm6, %v5391_v16  ;;  %685 = vst.msk [vmem:[#allocation3 + $0xe8] sm:$0xf] %vm655_vm6, %v5393_v17  ;;  %v4335_v15 = vpack.c.bf16 %v956_v9, %v956_v9 }
 0x10c   : > { %v4322_v28 = vpack.c.bf16 %v718_v19, %v718_v19  ;;  %913 = vst.msk [vmem:[#allocation3] sm:$0xf] %vm912_vm8, %v817_v26  ;;  %914 = vst.msk [vmem:[#allocation3 + $0x8] sm:$0xf] %vm912_vm8, %v819_v27  ;;  %v525_v29 = vld [vmem:[#allocation2 + $0x168] sm:$0xff]  ;;  %v526_v32 = vld [vmem:[#allocation2 + $0x170] sm:$0xff]  ;;  %v4323_v35 = vpack.c.bf16 %v719_v22, %v719_v22 }
 0x10d   : > { %v5403_v33 = vpack.c.bf16 %v525_v29, %v525_v29  ;;  %v5405_v34 = vpack.c.bf16 %v526_v32, %v526_v32  ;;  %v958_v19 = vld [vmem:[#allocation2 + $0x9a] sm:$0xff]  ;;  %v959_v22 = vld [vmem:[#allocation2 + $0xaa] sm:$0xff]  ;;  %v960_v27 = vld [vmem:[#allocation2 + $0xb2] sm:$0xff] }
 0x10e   : > { %874 = vrot.lane.b32.xlu1 %v4321_v18, %s4849_s30  ;;  %876 = vrot.lane.b32.xlu0 %v4322_v28, %s4849_s30  ;;  %v4336_v18 = vpack.c.bf16 %v957_v14, %v957_v14  ;;  %v4337_v23 = vpack.c.bf16 %v958_v19, %v958_v19  ;;  %v4338_v26 = vpack.c.bf16 %v959_v22, %v959_v22  ;;  %v961_v28 = vld [vmem:[#allocation2 + $0xc2] sm:$0xff]  ;;  %v975_v19 = vld [vmem:[#allocation2 + $0x16a] sm:$0xff] }
 0x10f   : > { %686 = vst.msk [vmem:[#allocation3 + $0xf0] sm:$0xf] %vm655_vm6, %v5403_v33  ;;  %687 = vst.msk [vmem:[#allocation3 + $0xf8] sm:$0xf] %vm655_vm6, %v5405_v34  ;;  %v4339_v29 = vpack.c.bf16 %v960_v27, %v960_v27  ;;  %v4340_v32 = vpack.c.bf16 %v961_v28, %v961_v28  ;;  %v4354_v27 = vpack.c.bf16 %v975_v19, %v975_v19  ;;  %v976_v28 = vld [vmem:[#allocation2 + $0x172] sm:$0xff] }
 0x112   : > { %878 = vrot.lane.b32.xlu1 %v4323_v35, %s4849_s30  ;;  %1073 = vrot.lane.b32.xlu0 %v4324_v38, %s4850_s3  ;;  %v962_v35 = vld [vmem:[#allocation2 + $0xca] sm:$0xff]  ;;  %v963_v38 = vld [vmem:[#allocation2 + $0xda] sm:$0xff] }
 0x113   : > { %v4341_v39 = vpack.c.bf16 %v962_v35, %v962_v35  ;;  %v4342_v42 = vpack.c.bf16 %v963_v38, %v963_v38  ;;  %v4355_v35 = vpack.c.bf16 %v976_v28, %v976_v28  ;;  %v1467_v28 = vld [vmem:[#allocation2 + $0x79] sm:$0xff] }
 0x116   : > { %1075 = vrot.lane.b32.xlu1 %v4325_v43, %s4850_s3  ;;  %1077 = vrot.lane.b32.xlu0 %v4326_v44, %s4850_s3  ;;  %v964_v43 = vld [vmem:[#allocation2 + $0xe2] sm:$0xff]  ;;  %v965_v44 = vld [vmem:[#allocation2 + $0xf2] sm:$0xff] }
 0x117   : > { %v4343_v45 = vpack.c.bf16 %v964_v43, %v964_v43  ;;  %v4344_v46 = vpack.c.bf16 %v965_v44, %v965_v44 }
 0x11a   : > { %1079 = vrot.lane.b32.xlu1 %v4327_v47, %s4850_s3  ;;  %1081 = vrot.lane.b32.xlu0 %v4328_v52, %s4850_s3  ;;  %v966_v47 = vld [vmem:[#allocation2 + $0xfa] sm:$0xff]  ;;  %v967_v52 = vld [vmem:[#allocation2 + $0x10a] sm:$0xff] }
 0x11b   : > { %v4345_v54 = vpack.c.bf16 %v966_v47, %v966_v47  ;;  %v4346_v56 = vpack.c.bf16 %v967_v52, %v967_v52 }
 0x11e   : > { %1083 = vrot.lane.b32.xlu1 %v4329_v57, %s4850_s3  ;;  %1085 = vrot.lane.b32.xlu0 %v4330_v58, %s4850_s3  ;;  %v968_v57 = vld [vmem:[#allocation2 + $0x112] sm:$0xff]  ;;  %v969_v58 = vld [vmem:[#allocation2 + $0x122] sm:$0xff] }
 0x11f   : > { %v4347_v59 = vpack.c.bf16 %v968_v57, %v968_v57  ;;  %v4348_v60 = vpack.c.bf16 %v969_v58, %v969_v58  ;;  %v1460_v57 = vld [vmem:[#allocation2 + $0x21] sm:$0xff]  ;;  %v1461_v58 = vld [vmem:[#allocation2 + $0x31] sm:$0xff] }
 0x122   : > { %1087 = vrot.lane.b32.xlu1 %v4331_v61, %s4850_s3  ;;  %1089 = vrot.lane.b32.xlu0 %v4332_v4, %s4850_s3  ;;  %v970_v61 = vld [vmem:[#allocation2 + $0x12a] sm:$0xff]  ;;  %v971_v4 = vld [vmem:[#allocation2 + $0x13a] sm:$0xff] }
 0x123   : > { %v4349_v5 = vpack.c.bf16 %v970_v61, %v970_v61  ;;  %v4350_v6 = vpack.c.bf16 %v971_v4, %v971_v4  ;;  %v4389_v61 = vpack.c.bf16 %v1460_v57, %v1460_v57  ;;  %v5552_v4 = vpack.c.bf16 %v1461_v58, %v1461_v58  ;;  %v1480_v58 = vld [vmem:[#allocation2 + $0x111] sm:$0xff] }
 0x126   : > { %1091 = vrot.lane.b32.xlu1 %v4333_v7, %s4850_s3  ;;  %1093 = vrot.lane.b32.xlu0 %v4334_v8, %s4850_s3  ;;  %v972_v7 = vld [vmem:[#allocation2 + $0x142] sm:$0xff]  ;;  %v973_v8 = vld [vmem:[#allocation2 + $0x152] sm:$0xff] }
 0x127   : > { %v4351_v14 = vpack.c.bf16 %v972_v7, %v972_v7 }
 0x12a   : > { %1095 = vrot.lane.b32.xlu1 %v4335_v15, %s4850_s3  ;;  %1097 = vrot.lane.b32.xlu0 %v4336_v18, %s4850_s3  ;;  %v4352_v15 = vpack.c.bf16 %v973_v8, %v973_v8  ;;  %v974_v18 = vld [vmem:[#allocation2 + $0x15a] sm:$0xff] }
 0x12e   : > { %1099 = vrot.lane.b32.xlu1 %v4337_v23, %s4850_s3  ;;  %1101 = vrot.lane.b32.xlu0 %v4338_v26, %s4850_s3  ;;  %v4353_v26 = vpack.c.bf16 %v974_v18, %v974_v18  ;;  %v1465_v18 = vld [vmem:[#allocation2 + $0x61] sm:$0xff] }
 0x132   : > { %1103 = vrot.lane.b32.xlu1 %v4339_v29, %s4850_s3  ;;  %1105 = vrot.lane.b32.xlu0 %v4340_v32, %s4850_s3 }
 0x136   : > { %1107 = vrot.lane.b32.xlu1 %v4341_v39, %s4850_s3  ;;  %1109 = vrot.lane.b32.xlu0 %v4342_v42, %s4850_s3 }
 0x13a   : > { %1111 = vrot.lane.b32.xlu1 %v4343_v45, %s4850_s3  ;;  %1113 = vrot.lane.b32.xlu0 %v4344_v46, %s4850_s3 }
 0x13e   : > { %1115 = vrot.lane.b32.xlu1 %v4345_v54, %s4850_s3  ;;  %1117 = vrot.lane.b32.xlu0 %v4346_v56, %s4850_s3 }
 0x142   : > { %1119 = vrot.lane.b32.xlu1 %v4347_v59, %s4850_s3  ;;  %1121 = vrot.lane.b32.xlu0 %v4348_v60, %s4850_s3 }
 0x146   : > { %1123 = vrot.lane.b32.xlu1 %v4349_v5, %s4850_s3  ;;  %1125 = vrot.lane.b32.xlu0 %v4350_v6, %s4850_s3  ;;  %v1462_v5 = vld [vmem:[#allocation2 + $0x39] sm:$0xff]  ;;  %v1463_v6 = vld [vmem:[#allocation2 + $0x49] sm:$0xff] }
 0x148   : > { %v821_v9 = vpop.permute.xlu0 %820 }
 0x149   : > { %915 = vst.msk [vmem:[#allocation3 + $0x10] sm:$0xf] %vm912_vm8, %v821_v9  ;;  %v5559_v9 = vpack.c.bf16 %v1462_v5, %v1462_v5  ;;  %v5649_v5 = vpack.c.bf16 %v1480_v58, %v1480_v58 }
 0x14a   : > { %1127 = vrot.lane.b32.xlu1 %v4351_v14, %s4850_s3  ;;  %1129 = vrot.lane.b32.xlu0 %v4352_v15, %s4850_s3  ;;  %v5561_v14 = vpack.c.bf16 %v1463_v6, %v1463_v6  ;;  %v1464_v15 = vld [vmem:[#allocation2 + $0x51] sm:$0xff] }
 0x14c   : > { %v823_v22 = vpop.permute.xlu1 %822  ;;  %v825_v23 = vpop.permute.xlu0 %824 }
 0x14d   : > { %916 = vst.msk [vmem:[#allocation3 + $0x18] sm:$0xf] %vm912_vm8, %v823_v22  ;;  %917 = vst.msk [vmem:[#allocation3 + $0x20] sm:$0xf] %vm912_vm8, %v825_v23  ;;  %v5569_v23 = vpack.c.bf16 %v1464_v15, %v1464_v15 }
 0x14e   : > { %1131 = vrot.lane.b32.xlu1 %v4353_v26, %s4850_s3  ;;  %1133 = vrot.lane.b32.xlu0 %v4354_v27, %s4850_s3  ;;  %v5571_v26 = vpack.c.bf16 %v1465_v18, %v1465_v18  ;;  %v1466_v27 = vld [vmem:[#allocation2 + $0x69] sm:$0xff] }
 0x150   : > { %v827_v29 = vpop.permute.xlu1 %826  ;;  %v829_v32 = vpop.permute.xlu0 %828 }
 0x151   : > { %918 = vst.msk [vmem:[#allocation3 + $0x28] sm:$0xf] %vm912_vm8, %v827_v29  ;;  %919 = vst.msk [vmem:[#allocation3 + $0x30] sm:$0xf] %vm912_vm8, %v829_v32 }
 0x152   : > { %1135 = vrot.lane.b32.xlu1 %v4355_v35, %s4850_s3  ;;  %1330 = vrot.lane.b32.xlu0 %v5236_v53, %s4851_s4  ;;  %v5579_v35 = vpack.c.bf16 %v1466_v27, %v1466_v27  ;;  %v1484_v27 = vld [vmem:[#allocation2 + $0x141] sm:$0xff] }
 0x154   : > { %v831_v38 = vpop.permute.xlu1 %830  ;;  %v833_v39 = vpop.permute.xlu0 %832 }
 0x155   : > { %920 = vst.msk [vmem:[#allocation3 + $0x38] sm:$0xf] %vm912_vm8, %v831_v38  ;;  %921 = vst.msk [vmem:[#allocation3 + $0x40] sm:$0xf] %vm912_vm8, %v833_v39  ;;  %v5581_v38 = vpack.c.bf16 %v1467_v28, %v1467_v28  ;;  %v1468_v39 = vld [vmem:[#allocation2 + $0x81] sm:$0xff]  ;;  %v1485_v28 = vld [vmem:[#allocation2 + $0x151] sm:$0xff] }
 0x156   : > { %1332 = vrot.lane.b32.xlu1 %v5249_v1, %s4851_s4  ;;  %1334 = vrot.lane.b32.xlu0 %v5238_v55, %s4851_s4 }
 0x158   : > { %v835_v42 = vpop.permute.xlu1 %834  ;;  %v837_v43 = vpop.permute.xlu0 %836 }
 0x159   : > { %922 = vst.msk [vmem:[#allocation3 + $0x48] sm:$0xf] %vm912_vm8, %v835_v42  ;;  %923 = vst.msk [vmem:[#allocation3 + $0x50] sm:$0xf] %vm912_vm8, %v837_v43  ;;  %v1469_v42 = vld [vmem:[#allocation2 + $0x91] sm:$0xff] }
 0x15a   : > { %1336 = vrot.lane.b32.xlu1 %v5251_v2, %s4851_s4  ;;  %1338 = vrot.lane.b32.xlu0 %v5259_v10, %s4851_s4 }
 0x15c   : > { %v839_v53 = vpop.permute.xlu1 %838  ;;  %v841_v44 = vpop.permute.xlu0 %840 }
 0x15d   : > { %924 = vst.msk [vmem:[#allocation3 + $0x58] sm:$0xf] %vm912_vm8, %v839_v53  ;;  %925 = vst.msk [vmem:[#allocation3 + $0x60] sm:$0xf] %vm912_vm8, %v841_v44  ;;  %v5589_v44 = vpack.c.bf16 %v1468_v39, %v1468_v39  ;;  %v5669_v39 = vpack.c.bf16 %v1484_v27, %v1484_v27  ;;  %v1721_v27 = vld [vmem:[#allocation2 + $0x52] sm:$0xff] }
 0x15e   : > { %1340 = vrot.lane.b32.xlu1 %v5261_v11, %s4851_s4  ;;  %1342 = vrot.lane.b32.xlu0 %v5271_v20, %s4851_s4 }
 0x160   : > { %v843_v55 = vpop.permute.xlu1 %842  ;;  %v845_v1 = vpop.permute.xlu0 %844 }
 0x161   : > { %926 = vst.msk [vmem:[#allocation3 + $0x68] sm:$0xf] %vm912_vm8, %v843_v55  ;;  %927 = vst.msk [vmem:[#allocation3 + $0x70] sm:$0xf] %vm912_vm8, %v845_v1  ;;  %v5591_v55 = vpack.c.bf16 %v1469_v42, %v1469_v42  ;;  %v1470_v1 = vld [vmem:[#allocation2 + $0x99] sm:$0xff]  ;;  %v5671_v42 = vpack.c.bf16 %v1485_v28, %v1485_v28  ;;  %v1722_v28 = vld [vmem:[#allocation2 + $0x62] sm:$0xff] }
 0x162   : > { %1344 = vrot.lane.b32.xlu1 %v5273_v21, %s4851_s4  ;;  %1346 = vrot.lane.b32.xlu0 %v5283_v30, %s4851_s4 }
 0x164   : > { %v847_v2 = vpop.permute.xlu1 %846  ;;  %v849_v10 = vpop.permute.xlu0 %848 }
 0x165   : > { %928 = vst.msk [vmem:[#allocation3 + $0x78] sm:$0xf] %vm912_vm8, %v847_v2  ;;  %929 = vst.msk [vmem:[#allocation3 + $0x80] sm:$0xf] %vm912_vm8, %v849_v10  ;;  %v1471_v2 = vld [vmem:[#allocation2 + $0xa9] sm:$0xff] }
 0x166   : > { %1348 = vrot.lane.b32.xlu1 %v5285_v31, %s4851_s4  ;;  %1350 = vrot.lane.b32.xlu0 %v5295_v40, %s4851_s4 }
 0x168   : > { %v851_v11 = vpop.permute.xlu1 %850  ;;  %v853_v20 = vpop.permute.xlu0 %852 }
 0x169   : > { %930 = vst.msk [vmem:[#allocation3 + $0x88] sm:$0xf] %vm912_vm8, %v851_v11  ;;  %931 = vst.msk [vmem:[#allocation3 + $0x90] sm:$0xf] %vm912_vm8, %v853_v20  ;;  %v5599_v20 = vpack.c.bf16 %v1470_v1, %v1470_v1 }
 0x16a   : > { %1352 = vrot.lane.b32.xlu1 %v5297_v41, %s4851_s4  ;;  %1354 = vrot.lane.b32.xlu0 %v5307_v50, %s4851_s4 }
 0x16c   : > { %v855_v21 = vpop.permute.xlu1 %854  ;;  %v857_v30 = vpop.permute.xlu0 %856 }
 0x16d   : > { %932 = vst.msk [vmem:[#allocation3 + $0x98] sm:$0xf] %vm912_vm8, %v855_v21  ;;  %933 = vst.msk [vmem:[#allocation3 + $0xa0] sm:$0xf] %vm912_vm8, %v857_v30  ;;  %v5601_v21 = vpack.c.bf16 %v1471_v2, %v1471_v2  ;;  %v1472_v30 = vld [vmem:[#allocation2 + $0xb1] sm:$0xff] }
 0x16e   : > { %1356 = vrot.lane.b32.xlu1 %v5309_v51, %s4851_s4  ;;  %1358 = vrot.lane.b32.xlu0 %v5319_v62, %s4851_s4 }
 0x170   : > { %v859_v31 = vpop.permute.xlu1 %858  ;;  %v861_v40 = vpop.permute.xlu0 %860 }
 0x171   : > { %934 = vst.msk [vmem:[#allocation3 + $0xa8] sm:$0xf] %vm912_vm8, %v859_v31  ;;  %935 = vst.msk [vmem:[#allocation3 + $0xb0] sm:$0xf] %vm912_vm8, %v861_v40  ;;  %v1473_v31 = vld [vmem:[#allocation2 + $0xc1] sm:$0xff] }
 0x172   : > { %1360 = vrot.lane.b32.xlu1 %v5321_v63, %s4851_s4  ;;  %1362 = vrot.lane.b32.xlu0 %v5331_v12, %s4851_s4 }
 0x174   : > { %v863_v41 = vpop.permute.xlu1 %862  ;;  %v865_v50 = vpop.permute.xlu0 %864 }
 0x175   : > { %936 = vst.msk [vmem:[#allocation3 + $0xb8] sm:$0xf] %vm912_vm8, %v863_v41  ;;  %937 = vst.msk [vmem:[#allocation3 + $0xc0] sm:$0xf] %vm912_vm8, %v865_v50  ;;  %v5609_v50 = vpack.c.bf16 %v1472_v30, %v1472_v30  ;;  %v1488_v30 = vld [vmem:[#allocation2 + $0x171] sm:$0xff] }
 0x176   : > { %1364 = vrot.lane.b32.xlu1 %v5333_v13, %s4851_s4  ;;  %1366 = vrot.lane.b32.xlu0 %v5343_v24, %s4851_s4 }
 0x178   : > { %v867_v51 = vpop.permute.xlu1 %866  ;;  %v869_v62 = vpop.permute.xlu0 %868 }
 0x179   : > { %938 = vst.msk [vmem:[#allocation3 + $0xc8] sm:$0xf] %vm912_vm8, %v867_v51  ;;  %939 = vst.msk [vmem:[#allocation3 + $0xd0] sm:$0xf] %vm912_vm8, %v869_v62  ;;  %v5611_v51 = vpack.c.bf16 %v1473_v31, %v1473_v31  ;;  %v1474_v62 = vld [vmem:[#allocation2 + $0xc9] sm:$0xff]  ;;  %v1489_v31 = vld [vmem:[#allocation2 + $0x181] sm:$0xff] }
 0x17a   : > { %1368 = vrot.lane.b32.xlu1 %v5345_v25, %s4851_s4  ;;  %1370 = vrot.lane.b32.xlu0 %v5355_v36, %s4851_s4 }
 0x17c   : > { %v871_v63 = vpop.permute.xlu1 %870  ;;  %v873_v12 = vpop.permute.xlu0 %872 }
 0x17d   : > { %940 = vst.msk [vmem:[#allocation3 + $0xd8] sm:$0xf] %vm912_vm8, %v871_v63  ;;  %941 = vst.msk [vmem:[#allocation3 + $0xe0] sm:$0xf] %vm912_vm8, %v873_v12  ;;  %v1475_v63 = vld [vmem:[#allocation2 + $0xd9] sm:$0xff] }
 0x17e   : > { %1372 = vrot.lane.b32.xlu1 %v5357_v37, %s4851_s4  ;;  %1374 = vrot.lane.b32.xlu0 %v5367_v48, %s4851_s4 }
 0x180   : > { %v875_v13 = vpop.permute.xlu1 %874  ;;  %v877_v24 = vpop.permute.xlu0 %876 }
 0x181   : > { %942 = vst.msk [vmem:[#allocation3 + $0xe8] sm:$0xf] %vm912_vm8, %v875_v13  ;;  %943 = vst.msk [vmem:[#allocation3 + $0xf0] sm:$0xf] %vm912_vm8, %v877_v24  ;;  %v5619_v24 = vpack.c.bf16 %v1474_v62, %v1474_v62  ;;  %v5689_v62 = vpack.c.bf16 %v1488_v30, %v1488_v30 }
 0x182   : > { %1376 = vrot.lane.b32.xlu1 %v5369_v49, %s4851_s4  ;;  %1378 = vrot.lane.b32.xlu0 %v5379_v0, %s4851_s4  ;;  %v1232_v49 = vld [vmem:[#allocation2 + $0x180] sm:$0xff] }
 0x183   : > { %v5537_v46 = vpack.c.bf16 %v1232_v49, %v1232_v49 }
 0x184   : > { %v879_v25 = vpop.permute.xlu1 %878  ;;  %v1074_v36 = vpop.permute.xlu0 %1073 }
 0x185   : > { %944 = vst.msk [vmem:[#allocation3 + $0xf8] sm:$0xf] %vm912_vm8, %v879_v25  ;;  %v5621_v25 = vpack.c.bf16 %v1475_v63, %v1475_v63  ;;  %v5691_v63 = vpack.c.bf16 %v1489_v31, %v1489_v31 }
 0x186   : > { %1170 = vst.msk [vmem:[#allocation3] sm:$0xf] %vm1169_vm9, %v1074_v36  ;;  %1380 = vrot.lane.b32.xlu1 %v5381_v3, %s4851_s4  ;;  %1382 = vrot.lane.b32.xlu0 %v5391_v16, %s4851_s4  ;;  %v1233_v3 = vld [vmem:[#allocation2 + $0x188] sm:$0xff]  ;;  %v1459_v16 = vld [vmem:[#allocation2 + $0x19] sm:$0xff] }
 0x187   : > { %v5545_v54 = vpack.c.bf16 %v1233_v3, %v1233_v3  ;;  %v4388_v56 = vpack.c.bf16 %v1459_v16, %v1459_v16  ;;  %v1476_v36 = vld [vmem:[#allocation2 + $0xe1] sm:$0xff]  ;;  %v1478_v3 = vld [vmem:[#allocation2 + $0xf9] sm:$0xff]  ;;  %v1479_v16 = vld [vmem:[#allocation2 + $0x109] sm:$0xff] }
 0x188   : > { %v1076_v37 = vpop.permute.xlu1 %1075  ;;  %v1078_v48 = vpop.permute.xlu0 %1077  ;;  %v5641_v57 = vpack.c.bf16 %v1479_v16, %v1479_v16  ;;  %v1718_v16 = vld [vmem:[#allocation2 + $0x32] sm:$0xff] }
 0x189   : > { %1171 = vst.msk [vmem:[#allocation3 + $0x8] sm:$0xf] %vm1169_vm9, %v1076_v37  ;;  %1172 = vst.msk [vmem:[#allocation3 + $0x10] sm:$0xf] %vm1169_vm9, %v1078_v48  ;;  %v1477_v37 = vld [vmem:[#allocation2 + $0xf1] sm:$0xff] }
 0x18a   : > { %1384 = vrot.lane.b32.xlu1 %v5393_v17, %s4851_s4  ;;  %1386 = vrot.lane.b32.xlu0 %v5403_v33, %s4851_s4 }
 0x18c   : > { %v1080_v0 = vpop.permute.xlu1 %1079  ;;  %v1082_v45 = vpop.permute.xlu0 %1081 }
 0x18d   : > { %1173 = vst.msk [vmem:[#allocation3 + $0x18] sm:$0xf] %vm1169_vm9, %v1080_v0  ;;  %1174 = vst.msk [vmem:[#allocation3 + $0x20] sm:$0xf] %vm1169_vm9, %v1082_v45  ;;  %v5629_v0 = vpack.c.bf16 %v1476_v36, %v1476_v36  ;;  %v5631_v45 = vpack.c.bf16 %v1477_v37, %v1477_v37 }
 0x18e   : > { %1388 = vrot.lane.b32.xlu1 %v5405_v34, %s4851_s4  ;;  %1390 = vrot.lane.b32.xlu0 %v5537_v46, %s4851_s4 }
 0x190   : > { %v1084_v47 = vpop.permute.xlu1 %1083  ;;  %v1086_v52 = vpop.permute.xlu0 %1085 }
 0x191   : > { %1175 = vst.msk [vmem:[#allocation3 + $0x28] sm:$0xf] %vm1169_vm9, %v1084_v47  ;;  %1176 = vst.msk [vmem:[#allocation3 + $0x30] sm:$0xf] %vm1169_vm9, %v1086_v52 }
 0x192   : > { %1392 = vrot.lane.b32.xlu1 %v5545_v54, %s4851_s4  ;;  %1587 = vrot.lane.b32.xlu0 %v4388_v56, %s4852_s5  ;;  %v5639_v56 = vpack.c.bf16 %v1478_v3, %v1478_v3  ;;  %v1717_v3 = vld [vmem:[#allocation2 + $0x22] sm:$0xff] }
 0x193   : > { %v4421_v58 = vpack.c.bf16 %v1717_v3, %v1717_v3 }
 0x194   : > { %v1088_v59 = vpop.permute.xlu1 %1087  ;;  %v1090_v60 = vpop.permute.xlu0 %1089 }
 0x195   : > { %1177 = vst.msk [vmem:[#allocation3 + $0x38] sm:$0xf] %vm1169_vm9, %v1088_v59  ;;  %1178 = vst.msk [vmem:[#allocation3 + $0x40] sm:$0xf] %vm1169_vm9, %v1090_v60  ;;  %v1481_v59 = vld [vmem:[#allocation2 + $0x121] sm:$0xff] }
 0x196   : > { %1589 = vrot.lane.b32.xlu1 %v4389_v61, %s4852_s5  ;;  %1591 = vrot.lane.b32.xlu0 %v5552_v4, %s4852_s5  ;;  %v5651_v6 = vpack.c.bf16 %v1481_v59, %v1481_v59  ;;  %v5706_v59 = vpack.c.bf16 %v1718_v16, %v1718_v16  ;;  %v1727_v16 = vld [vmem:[#allocation2 + $0x9a] sm:$0xff] }
 0x198   : > { %v1092_v7 = vpop.permute.xlu1 %1091  ;;  %v1094_v8 = vpop.permute.xlu0 %1093 }
 0x199   : > { %1179 = vst.msk [vmem:[#allocation3 + $0x48] sm:$0xf] %vm1169_vm9, %v1092_v7  ;;  %1180 = vst.msk [vmem:[#allocation3 + $0x50] sm:$0xf] %vm1169_vm9, %v1094_v8  ;;  %v1482_v7 = vld [vmem:[#allocation2 + $0x129] sm:$0xff]  ;;  %v1483_v8 = vld [vmem:[#allocation2 + $0x139] sm:$0xff] }
 0x19a   : > { %1593 = vrot.lane.b32.xlu1 %v5559_v9, %s4852_s5  ;;  %1595 = vrot.lane.b32.xlu0 %v5561_v14, %s4852_s5 }
 0x19c   : > { %v1096_v19 = vpop.permute.xlu1 %1095  ;;  %v1098_v22 = vpop.permute.xlu0 %1097 }
 0x19d   : > { %1181 = vst.msk [vmem:[#allocation3 + $0x58] sm:$0xf] %vm1169_vm9, %v1096_v19  ;;  %1182 = vst.msk [vmem:[#allocation3 + $0x60] sm:$0xf] %vm1169_vm9, %v1098_v22  ;;  %v5659_v19 = vpack.c.bf16 %v1482_v7, %v1482_v7  ;;  %v5661_v22 = vpack.c.bf16 %v1483_v8, %v1483_v8 }
 0x19e   : > { %1597 = vrot.lane.b32.xlu1 %v5569_v23, %s4852_s5  ;;  %1599 = vrot.lane.b32.xlu0 %v5571_v26, %s4852_s5 }
 0x1a0   : > { %v1100_v29 = vpop.permute.xlu1 %1099  ;;  %v1102_v32 = vpop.permute.xlu0 %1101 }
 0x1a1   : > { %1183 = vst.msk [vmem:[#allocation3 + $0x68] sm:$0xf] %vm1169_vm9, %v1100_v29  ;;  %1184 = vst.msk [vmem:[#allocation3 + $0x70] sm:$0xf] %vm1169_vm9, %v1102_v32 }
 0x1a2   : > { %1601 = vrot.lane.b32.xlu1 %v5579_v35, %s4852_s5  ;;  %1603 = vrot.lane.b32.xlu0 %v5581_v38, %s4852_s5 }
 0x1a4   : > { %v1104_v43 = vpop.permute.xlu1 %1103  ;;  %v1106_v53 = vpop.permute.xlu0 %1105 }
 0x1a5   : > { %1185 = vst.msk [vmem:[#allocation3 + $0x78] sm:$0xf] %vm1169_vm9, %v1104_v43  ;;  %1186 = vst.msk [vmem:[#allocation3 + $0x80] sm:$0xf] %vm1169_vm9, %v1106_v53  ;;  %v1486_v43 = vld [vmem:[#allocation2 + $0x159] sm:$0xff]  ;;  %v1487_v53 = vld [vmem:[#allocation2 + $0x169] sm:$0xff] }
 0x1a6   : > { %1605 = vrot.lane.b32.xlu1 %v5589_v44, %s4852_s5  ;;  %1607 = vrot.lane.b32.xlu0 %v5591_v55, %s4852_s5 }
 0x1a8   : > { %v1108_v10 = vpop.permute.xlu1 %1107  ;;  %v1110_v11 = vpop.permute.xlu0 %1109 }
 0x1a9   : > { %1187 = vst.msk [vmem:[#allocation3 + $0x88] sm:$0xf] %vm1169_vm9, %v1108_v10  ;;  %1188 = vst.msk [vmem:[#allocation3 + $0x90] sm:$0xf] %vm1169_vm9, %v1110_v11  ;;  %v5679_v10 = vpack.c.bf16 %v1486_v43, %v1486_v43  ;;  %v5681_v11 = vpack.c.bf16 %v1487_v53, %v1487_v53  ;;  %v5723_v43 = vpack.c.bf16 %v1721_v27, %v1721_v27 }
 0x1aa   : > { %1609 = vrot.lane.b32.xlu1 %v5599_v20, %s4852_s5  ;;  %1611 = vrot.lane.b32.xlu0 %v5601_v21, %s4852_s5  ;;  %v5725_v53 = vpack.c.bf16 %v1722_v28, %v1722_v28 }
 0x1ac   : > { %v1112_v40 = vpop.permute.xlu1 %1111  ;;  %v1114_v41 = vpop.permute.xlu0 %1113 }
 0x1ad   : > { %1189 = vst.msk [vmem:[#allocation3 + $0x98] sm:$0xf] %vm1169_vm9, %v1112_v40  ;;  %1190 = vst.msk [vmem:[#allocation3 + $0xa0] sm:$0xf] %vm1169_vm9, %v1114_v41 }
 0x1ae   : > { %1613 = vrot.lane.b32.xlu1 %v5609_v50, %s4852_s5  ;;  %1615 = vrot.lane.b32.xlu0 %v5611_v51, %s4852_s5 }
 0x1b0   : > { %v1116_v12 = vpop.permute.xlu1 %1115  ;;  %v1118_v13 = vpop.permute.xlu0 %1117 }
 0x1b1   : > { %1191 = vst.msk [vmem:[#allocation3 + $0xa8] sm:$0xf] %vm1169_vm9, %v1116_v12  ;;  %1192 = vst.msk [vmem:[#allocation3 + $0xb0] sm:$0xf] %vm1169_vm9, %v1118_v13  ;;  %v1490_v12 = vld [vmem:[#allocation2 + $0x189] sm:$0xff]  ;;  %v1716_v13 = vld [vmem:[#allocation2 + $0x1a] sm:$0xff] }
 0x1b2   : > { %1617 = vrot.lane.b32.xlu1 %v5619_v24, %s4852_s5  ;;  %1619 = vrot.lane.b32.xlu0 %v5621_v25, %s4852_s5 }
 0x1b4   : > { %v1120_v48 = vpop.permute.xlu1 %1119  ;;  %v1122_v49 = vpop.permute.xlu0 %1121 }
 0x1b5   : > { %1193 = vst.msk [vmem:[#allocation3 + $0xb8] sm:$0xf] %vm1169_vm9, %v1120_v48  ;;  %1194 = vst.msk [vmem:[#allocation3 + $0xc0] sm:$0xf] %vm1169_vm9, %v1122_v49  ;;  %v5699_v48 = vpack.c.bf16 %v1490_v12, %v1490_v12  ;;  %v4420_v49 = vpack.c.bf16 %v1716_v13, %v1716_v13  ;;  %v1725_v12 = vld [vmem:[#allocation2 + $0x82] sm:$0xff]  ;;  %v1726_v13 = vld [vmem:[#allocation2 + $0x92] sm:$0xff] }
 0x1b6   : > { %1621 = vrot.lane.b32.xlu1 %v5629_v0, %s4852_s5  ;;  %1623 = vrot.lane.b32.xlu0 %v5631_v45, %s4852_s5  ;;  %v5745_v3 = vpack.c.bf16 %v1726_v13, %v1726_v13 }
 0x1b8   : > { %v1124_v47 = vpop.permute.xlu1 %1123  ;;  %v1126_v52 = vpop.permute.xlu0 %1125 }
 0x1b9   : > { %1195 = vst.msk [vmem:[#allocation3 + $0xc8] sm:$0xf] %vm1169_vm9, %v1124_v47  ;;  %1196 = vst.msk [vmem:[#allocation3 + $0xd0] sm:$0xf] %vm1169_vm9, %v1126_v52 }
 0x1ba   : > { %1625 = vrot.lane.b32.xlu1 %v5639_v56, %s4852_s5  ;;  %1627 = vrot.lane.b32.xlu0 %v5641_v57, %s4852_s5 }
 0x1bc   : > { %v1128_v60 = vpop.permute.xlu1 %1127  ;;  %v1130_v61 = vpop.permute.xlu0 %1129 }
 0x1bd   : > { %1197 = vst.msk [vmem:[#allocation3 + $0xd8] sm:$0xf] %vm1169_vm9, %v1128_v60  ;;  %1198 = vst.msk [vmem:[#allocation3 + $0xe0] sm:$0xf] %vm1169_vm9, %v1130_v61  ;;  %v1719_v60 = vld [vmem:[#allocation2 + $0x3a] sm:$0xff]  ;;  %v1720_v61 = vld [vmem:[#allocation2 + $0x4a] sm:$0xff] }
 0x1be   : > { %1629 = vrot.lane.b32.xlu1 %v5649_v5, %s4852_s5  ;;  %1631 = vrot.lane.b32.xlu0 %v5651_v6, %s4852_s5 }
 0x1c0   : > { %v1132_v15 = vpop.permute.xlu1 %1131  ;;  %v1134_v18 = vpop.permute.xlu0 %1133 }
 0x1c1   : > { %1199 = vst.msk [vmem:[#allocation3 + $0xe8] sm:$0xf] %vm1169_vm9, %v1132_v15  ;;  %1200 = vst.msk [vmem:[#allocation3 + $0xf0] sm:$0xf] %vm1169_vm9, %v1134_v18  ;;  %v5713_v15 = vpack.c.bf16 %v1719_v60, %v1719_v60  ;;  %v5715_v18 = vpack.c.bf16 %v1720_v61, %v1720_v61  ;;  %v5753_v60 = vpack.c.bf16 %v1727_v16, %v1727_v16 }
 0x1c2   : > { %1633 = vrot.lane.b32.xlu1 %v5659_v19, %s4852_s5  ;;  %1635 = vrot.lane.b32.xlu0 %v5661_v22, %s4852_s5 }
 0x1c4   : > { %v1136_v29 = vpop.permute.xlu1 %1135  ;;  %v1331_v32 = vpop.permute.xlu0 %1330 }
 0x1c5   : > { %1201 = vst.msk [vmem:[#allocation3 + $0xf8] sm:$0xf] %vm1169_vm9, %v1136_v29 }
 0x1c6   : > { %1427 = vst.msk [vmem:[#allocation3] sm:$0xf] %vm1426_vm10, %v1331_v32  ;;  %1637 = vrot.lane.b32.xlu1 %v5669_v39, %s4852_s5  ;;  %1639 = vrot.lane.b32.xlu0 %v5671_v42, %s4852_s5 }
 0x1c8   : > { %v1333_v1 = vpop.permute.xlu1 %1332  ;;  %v1335_v2 = vpop.permute.xlu0 %1334 }
 0x1c9   : > { %1428 = vst.msk [vmem:[#allocation3 + $0x8] sm:$0xf] %vm1426_vm10, %v1333_v1  ;;  %1429 = vst.msk [vmem:[#allocation3 + $0x10] sm:$0xf] %vm1426_vm10, %v1335_v2  ;;  %v1723_v1 = vld [vmem:[#allocation2 + $0x6a] sm:$0xff]  ;;  %v1724_v2 = vld [vmem:[#allocation2 + $0x7a] sm:$0xff] }
 0x1ca   : > { %1641 = vrot.lane.b32.xlu1 %v5679_v10, %s4852_s5  ;;  %1643 = vrot.lane.b32.xlu0 %v5681_v11, %s4852_s5 }
 0x1cc   : > { %v1337_v40 = vpop.permute.xlu1 %1336  ;;  %v1339_v41 = vpop.permute.xlu0 %1338 }
 0x1cd   : > { %1430 = vst.msk [vmem:[#allocation3 + $0x18] sm:$0xf] %vm1426_vm10, %v1337_v40  ;;  %1431 = vst.msk [vmem:[#allocation3 + $0x20] sm:$0xf] %vm1426_vm10, %v1339_v41  ;;  %v5733_v40 = vpack.c.bf16 %v1723_v1, %v1723_v1  ;;  %v5735_v41 = vpack.c.bf16 %v1724_v2, %v1724_v2  ;;  %v1731_v1 = vld [vmem:[#allocation2 + $0xca] sm:$0xff]  ;;  %v1732_v2 = vld [vmem:[#allocation2 + $0xda] sm:$0xff] }
 0x1ce   : > { %1645 = vrot.lane.b32.xlu1 %v5689_v62, %s4852_s5  ;;  %1647 = vrot.lane.b32.xlu0 %v5691_v63, %s4852_s5  ;;  %v5775_v13 = vpack.c.bf16 %v1732_v2, %v1732_v2 }
 0x1d0   : > { %v1341_v36 = vpop.permute.xlu1 %1340  ;;  %v1343_v37 = vpop.permute.xlu0 %1342 }
 0x1d1   : > { %1432 = vst.msk [vmem:[#allocation3 + $0x28] sm:$0xf] %vm1426_vm10, %v1341_v36  ;;  %1433 = vst.msk [vmem:[#allocation3 + $0x30] sm:$0xf] %vm1426_vm10, %v1343_v37 }
 0x1d2   : > { %1649 = vrot.lane.b32.xlu1 %v5699_v48, %s4852_s5  ;;  %1844 = vrot.lane.b32.xlu0 %v4420_v49, %s4853_s6  ;;  %v5743_v49 = vpack.c.bf16 %v1725_v12, %v1725_v12  ;;  %v5773_v12 = vpack.c.bf16 %v1731_v1, %v1731_v1 }
 0x1d4   : > { %v1345_v47 = vpop.permute.xlu1 %1344  ;;  %v1347_v52 = vpop.permute.xlu0 %1346 }
 0x1d5   : > { %1434 = vst.msk [vmem:[#allocation3 + $0x38] sm:$0xf] %vm1426_vm10, %v1345_v47  ;;  %1435 = vst.msk [vmem:[#allocation3 + $0x40] sm:$0xf] %vm1426_vm10, %v1347_v52  ;;  %v1728_v47 = vld [vmem:[#allocation2 + $0xaa] sm:$0xff] }
 0x1d6   : > { %1846 = vrot.lane.b32.xlu1 %v4421_v58, %s4853_s6  ;;  %1848 = vrot.lane.b32.xlu0 %v5706_v59, %s4853_s6  ;;  %v5755_v61 = vpack.c.bf16 %v1728_v47, %v1728_v47 }
 0x1d8   : > { %v1349_v7 = vpop.permute.xlu1 %1348  ;;  %v1351_v8 = vpop.permute.xlu0 %1350 }
 0x1d9   : > { %1436 = vst.msk [vmem:[#allocation3 + $0x48] sm:$0xf] %vm1426_vm10, %v1349_v7  ;;  %1437 = vst.msk [vmem:[#allocation3 + $0x50] sm:$0xf] %vm1426_vm10, %v1351_v8  ;;  %v1729_v7 = vld [vmem:[#allocation2 + $0xb2] sm:$0xff]  ;;  %v1730_v8 = vld [vmem:[#allocation2 + $0xc2] sm:$0xff] }
 0x1da   : > { %1850 = vrot.lane.b32.xlu1 %v5713_v15, %s4853_s6  ;;  %1852 = vrot.lane.b32.xlu0 %v5715_v18, %s4853_s6 }
 0x1dc   : > { %v1353_v29 = vpop.permute.xlu1 %1352  ;;  %v1355_v32 = vpop.permute.xlu0 %1354 }
 0x1dd   : > { %1438 = vst.msk [vmem:[#allocation3 + $0x58] sm:$0xf] %vm1426_vm10, %v1353_v29  ;;  %1439 = vst.msk [vmem:[#allocation3 + $0x60] sm:$0xf] %vm1426_vm10, %v1355_v32  ;;  %v5763_v29 = vpack.c.bf16 %v1729_v7, %v1729_v7  ;;  %v5765_v32 = vpack.c.bf16 %v1730_v8, %v1730_v8  ;;  %v1735_v7 = vld [vmem:[#allocation2 + $0xfa] sm:$0xff]  ;;  %v1736_v8 = vld [vmem:[#allocation2 + $0x10a] sm:$0xff] }
 0x1de   : > { %1854 = vrot.lane.b32.xlu1 %v5723_v43, %s4853_s6  ;;  %1856 = vrot.lane.b32.xlu0 %v5725_v53, %s4853_s6  ;;  %v5793_v1 = vpack.c.bf16 %v1735_v7, %v1735_v7  ;;  %v5795_v2 = vpack.c.bf16 %v1736_v8, %v1736_v8  ;;  %v1739_v7 = vld [vmem:[#allocation2 + $0x12a] sm:$0xff]  ;;  %v1740_v8 = vld [vmem:[#allocation2 + $0x13a] sm:$0xff] }
 0x1e0   : > { %v1357_v30 = vpop.permute.xlu1 %1356  ;;  %v1359_v31 = vpop.permute.xlu0 %1358  ;;  %6785 = vst [vmem:[#allocation6_spill] sm:$0xff] %v5793_v1  ;;  %6786 = vst [vmem:[#allocation7_spill] sm:$0xff] %v5795_v2 }
 0x1e1   : > { %1440 = vst.msk [vmem:[#allocation3 + $0x68] sm:$0xf] %vm1426_vm10, %v1357_v30  ;;  %1441 = vst.msk [vmem:[#allocation3 + $0x70] sm:$0xf] %vm1426_vm10, %v1359_v31 }
 0x1e2   : > { %1858 = vrot.lane.b32.xlu1 %v5733_v40, %s4853_s6  ;;  %1860 = vrot.lane.b32.xlu0 %v5735_v41, %s4853_s6 }
 0x1e4   : > { %v1361_v36 = vpop.permute.xlu1 %1360  ;;  %v1363_v37 = vpop.permute.xlu0 %1362 }
 0x1e5   : > { %1442 = vst.msk [vmem:[#allocation3 + $0x78] sm:$0xf] %vm1426_vm10, %v1361_v36  ;;  %1443 = vst.msk [vmem:[#allocation3 + $0x80] sm:$0xf] %vm1426_vm10, %v1363_v37  ;;  %v1733_v36 = vld [vmem:[#allocation2 + $0xe2] sm:$0xff]  ;;  %v1734_v37 = vld [vmem:[#allocation2 + $0xf2] sm:$0xff] }
 0x1e6   : > { %1862 = vrot.lane.b32.xlu1 %v5743_v49, %s4853_s6  ;;  %1864 = vrot.lane.b32.xlu0 %v5745_v3, %s4853_s6 }
 0x1e8   : > { %v1365_v52 = vpop.permute.xlu1 %1364  ;;  %v1367_v58 = vpop.permute.xlu0 %1366 }
 0x1e9   : > { %1444 = vst.msk [vmem:[#allocation3 + $0x88] sm:$0xf] %vm1426_vm10, %v1365_v52  ;;  %1445 = vst.msk [vmem:[#allocation3 + $0x90] sm:$0xf] %vm1426_vm10, %v1367_v58  ;;  %v5783_v52 = vpack.c.bf16 %v1733_v36, %v1733_v36  ;;  %v5785_v58 = vpack.c.bf16 %v1734_v37, %v1734_v37 }
 0x1ea   : > { %1866 = vrot.lane.b32.xlu1 %v5753_v60, %s4853_s6  ;;  %1868 = vrot.lane.b32.xlu0 %v5755_v61, %s4853_s6 }
 0x1eb   : > { %6784 = vst [vmem:[#allocation5_spill] sm:$0xff] %v5785_v58 }
 0x1ec   : > { %v1369_v27 = vpop.permute.xlu1 %1368  ;;  %v1371_v28 = vpop.permute.xlu0 %1370 }
 0x1ed   : > { %1446 = vst.msk [vmem:[#allocation3 + $0x98] sm:$0xf] %vm1426_vm10, %v1369_v27  ;;  %1447 = vst.msk [vmem:[#allocation3 + $0xa0] sm:$0xf] %vm1426_vm10, %v1371_v28 }
 0x1ee   : > { %1870 = vrot.lane.b32.xlu1 %v5763_v29, %s4853_s6  ;;  %1872 = vrot.lane.b32.xlu0 %v5765_v32, %s4853_s6 }
 0x1f0   : > { %v1373_v30 = vpop.permute.xlu1 %1372  ;;  %v1375_v31 = vpop.permute.xlu0 %1374 }
 0x1f1   : > { %1448 = vst.msk [vmem:[#allocation3 + $0xa8] sm:$0xf] %vm1426_vm10, %v1373_v30  ;;  %1449 = vst.msk [vmem:[#allocation3 + $0xb0] sm:$0xf] %vm1426_vm10, %v1375_v31  ;;  %v1737_v30 = vld [vmem:[#allocation2 + $0x112] sm:$0xff]  ;;  %v1738_v31 = vld [vmem:[#allocation2 + $0x122] sm:$0xff] }
 0x1f2   : > { %1874 = vrot.lane.b32.xlu1 %v5773_v12, %s4853_s6  ;;  %1876 = vrot.lane.b32.xlu0 %v5775_v13, %s4853_s6 }
 0x1f4   : > { %v1377_v16 = vpop.permute.xlu1 %1376  ;;  %v1379_v47 = vpop.permute.xlu0 %1378 }
 0x1f5   : > { %1450 = vst.msk [vmem:[#allocation3 + $0xb8] sm:$0xf] %vm1426_vm10, %v1377_v16  ;;  %1451 = vst.msk [vmem:[#allocation3 + $0xc0] sm:$0xf] %vm1426_vm10, %v1379_v47  ;;  %v5803_v16 = vpack.c.bf16 %v1737_v30, %v1737_v30  ;;  %v5805_v47 = vpack.c.bf16 %v1738_v31, %v1738_v31  ;;  %v5815_v30 = vpack.c.bf16 %v1740_v8, %v1740_v8  ;;  %v1741_v31 = vld [vmem:[#allocation2 + $0x142] sm:$0xff]  ;;  %v1743_v8 = vld [vmem:[#allocation2 + $0x15a] sm:$0xff] }
 0x1f6   : > { %1878 = vrot.lane.b32.xlu1 %v5783_v52, %s4853_s6  ;;  %1880 = vrot.lane.b32.xlu0 %v5785_v58, %s4853_s6 }
 0x1f7   : > { %6787 = vst [vmem:[#allocation8_spill] sm:$0xff] %v5803_v16  ;;  %6788 = vst [vmem:[#allocation9_spill] sm:$0xff] %v5805_v47 }
 0x1f8   : > { %v1381_v27 = vpop.permute.xlu1 %1380  ;;  %v1383_v28 = vpop.permute.xlu0 %1382  ;;  %6790 = vst [vmem:[#allocation11_spill] sm:$0xff] %v5815_v30 }
 0x1f9   : > { %1452 = vst.msk [vmem:[#allocation3 + $0xc8] sm:$0xf] %vm1426_vm10, %v1381_v27  ;;  %1453 = vst.msk [vmem:[#allocation3 + $0xd0] sm:$0xf] %vm1426_vm10, %v1383_v28 }
 0x1fa   : > { %1882 = vrot.lane.b32.xlu1 %v5793_v1, %s4853_s6  ;;  %1884 = vrot.lane.b32.xlu0 %v5795_v2, %s4853_s6  ;;  %v5813_v2 = vpack.c.bf16 %v1739_v7, %v1739_v7 }
 0x1fc   : > { %v1385_v36 = vpop.permute.xlu1 %1384  ;;  %v1387_v37 = vpop.permute.xlu0 %1386  ;;  %6789 = vst [vmem:[#allocation10_spill] sm:$0xff] %v5813_v2 }
 0x1fd   : > { %1454 = vst.msk [vmem:[#allocation3 + $0xd8] sm:$0xf] %vm1426_vm10, %v1385_v36  ;;  %1455 = vst.msk [vmem:[#allocation3 + $0xe0] sm:$0xf] %vm1426_vm10, %v1387_v37  ;;  %v1742_v36 = vld [vmem:[#allocation2 + $0x152] sm:$0xff] }
 0x1fe   : > { %1886 = vrot.lane.b32.xlu1 %v5803_v16, %s4853_s6  ;;  %1888 = vrot.lane.b32.xlu0 %v5805_v47, %s4853_s6  ;;  %v5823_v16 = vpack.c.bf16 %v1741_v31, %v1741_v31  ;;  %v5825_v7 = vpack.c.bf16 %v1742_v36, %v1742_v36  ;;  %v1745_v31 = vld [vmem:[#allocation2 + $0x172] sm:$0xff]  ;;  %v1746_v36 = vld [vmem:[#allocation2 + $0x182] sm:$0xff] }
 0x1ff   : > { %v4450_v58 = vpack.c.bf16 %v1746_v36, %v1746_v36 }
 0x200   : > { %v1389_v27 = vpop.permute.xlu1 %1388  ;;  %v1391_v28 = vpop.permute.xlu0 %1390  ;;  %6791 = vst [vmem:[#allocation12_spill] sm:$0xff] %v5823_v16  ;;  %6792 = vst [vmem:[#allocation13_spill] sm:$0xff] %v5825_v7 }
 0x201   : > { %1456 = vst.msk [vmem:[#allocation3 + $0xe8] sm:$0xf] %vm1426_vm10, %v1389_v27  ;;  %1457 = vst.msk [vmem:[#allocation3 + $0xf0] sm:$0xf] %vm1426_vm10, %v1391_v28  ;;  %v1744_v27 = vld [vmem:[#allocation2 + $0x16a] sm:$0xff] }
 0x202   : > { %1890 = vrot.lane.b32.xlu1 %v5813_v2, %s4853_s6  ;;  %1892 = vrot.lane.b32.xlu0 %v5815_v30, %s4853_s6  ;;  %v4447_v2 = vpack.c.bf16 %v1743_v8, %v1743_v8  ;;  %v4448_v1 = vpack.c.bf16 %v1744_v27, %v1744_v27  ;;  %v1747_v8 = vld [vmem:[#allocation2 + $0x18a] sm:$0xff] }
 0x203   : > { %v1974_v27 = vld [vmem:[#allocation2 + $0x30] sm:$0xff] }
 0x204   : > { %v1393_v37 = vpop.permute.xlu1 %1392  ;;  %v1588_v47 = vpop.permute.xlu0 %1587 }
 0x205   : > { %1458 = vst.msk [vmem:[#allocation3 + $0xf8] sm:$0xf] %vm1426_vm10, %v1393_v37 }
 0x206   : > { %1684 = vst.msk [vmem:[#allocation3] sm:$0xf] %vm1683_vm11, %v1588_v47  ;;  %1894 = vrot.lane.b32.xlu1 %v5823_v16, %s4853_s6  ;;  %1896 = vrot.lane.b32.xlu0 %v5825_v7, %s4853_s6  ;;  %v4449_v16 = vpack.c.bf16 %v1745_v31, %v1745_v31  ;;  %v4451_v7 = vpack.c.bf16 %v1747_v8, %v1747_v8  ;;  %v1976_v31 = vld [vmem:[#allocation2 + $0x48] sm:$0xff]  ;;  %v1978_v8 = vld [vmem:[#allocation2 + $0x60] sm:$0xff] }
 0x208   : > { %v1590_v28 = vpop.permute.xlu1 %1589  ;;  %v1592_v30 = vpop.permute.xlu0 %1591 }
 0x209   : > { %1685 = vst.msk [vmem:[#allocation3 + $0x8] sm:$0xf] %vm1683_vm11, %v1590_v28  ;;  %1686 = vst.msk [vmem:[#allocation3 + $0x10] sm:$0xf] %vm1683_vm11, %v1592_v30 }
 0x20a   : > { %1898 = vrot.lane.b32.xlu1 %v4447_v2, %s4853_s6  ;;  %1900 = vrot.lane.b32.xlu0 %v4448_v1, %s4853_s6  ;;  %v4452_v2 = vpack.c.bf16 %v1974_v27, %v1974_v27  ;;  %v1975_v1 = vld [vmem:[#allocation2 + $0x38] sm:$0xff] }
 0x20c   : > { %v1594_v47 = vpop.permute.xlu1 %1593  ;;  %v1596_v37 = vpop.permute.xlu0 %1595 }
 0x20d   : > { %1687 = vst.msk [vmem:[#allocation3 + $0x18] sm:$0xf] %vm1683_vm11, %v1594_v47  ;;  %1688 = vst.msk [vmem:[#allocation3 + $0x20] sm:$0xf] %vm1683_vm11, %v1596_v37  ;;  %v4454_v37 = vpack.c.bf16 %v1976_v31, %v1976_v31 }
 0x20e   : > { %1902 = vrot.lane.b32.xlu1 %v4449_v16, %s4853_s6  ;;  %1904 = vrot.lane.b32.xlu0 %v4450_v58, %s4853_s6  ;;  %v4453_v16 = vpack.c.bf16 %v1975_v1, %v1975_v1  ;;  %v1977_v58 = vld [vmem:[#allocation2 + $0x50] sm:$0xff]  ;;  %v1980_v1 = vld [vmem:[#allocation2 + $0x78] sm:$0xff] }
 0x210   : > { %v1598_v30 = vpop.permute.xlu1 %1597  ;;  %v1600_v28 = vpop.permute.xlu0 %1599 }
 0x211   : > { %1689 = vst.msk [vmem:[#allocation3 + $0x28] sm:$0xf] %vm1683_vm11, %v1598_v30  ;;  %1690 = vst.msk [vmem:[#allocation3 + $0x30] sm:$0xf] %vm1683_vm11, %v1600_v28  ;;  %v4456_v28 = vpack.c.bf16 %v1978_v8, %v1978_v8 }
 0x212   : > { %1906 = vrot.lane.b32.xlu1 %v4451_v7, %s4853_s6  ;;  %2102 = vrot.lane.b32.xlu0 %v4452_v2, %s4854_s7  ;;  %v4455_v7 = vpack.c.bf16 %v1977_v58, %v1977_v58  ;;  %v1979_v2 = vld [vmem:[#allocation2 + $0x68] sm:$0xff]  ;;  %v1982_v58 = vld [vmem:[#allocation2 + $0x90] sm:$0xff] }
 0x214   : > { %v1602_v36 = vpop.permute.xlu1 %1601  ;;  %v1604_v47 = vpop.permute.xlu0 %1603 }
 0x215   : > { %1691 = vst.msk [vmem:[#allocation3 + $0x38] sm:$0xf] %vm1683_vm11, %v1602_v36  ;;  %1692 = vst.msk [vmem:[#allocation3 + $0x40] sm:$0xf] %vm1683_vm11, %v1604_v47  ;;  %v4457_v47 = vpack.c.bf16 %v1979_v2, %v1979_v2  ;;  %v1984_v2 = vld [vmem:[#allocation2 + $0xa8] sm:$0xff] }
 0x216   : > { %2104 = vrot.lane.b32.xlu1 %v4453_v16, %s4854_s7  ;;  %2106 = vrot.lane.b32.xlu0 %v4454_v37, %s4854_s7  ;;  %v4458_v16 = vpack.c.bf16 %v1980_v1, %v1980_v1  ;;  %v1981_v37 = vld [vmem:[#allocation2 + $0x80] sm:$0xff] }
 0x218   : > { %v1606_v27 = vpop.permute.xlu1 %1605  ;;  %v1608_v30 = vpop.permute.xlu0 %1607 }
 0x219   : > { %1693 = vst.msk [vmem:[#allocation3 + $0x48] sm:$0xf] %vm1683_vm11, %v1606_v27  ;;  %1694 = vst.msk [vmem:[#allocation3 + $0x50] sm:$0xf] %vm1683_vm11, %v1608_v30  ;;  %v4459_v30 = vpack.c.bf16 %v1981_v37, %v1981_v37  ;;  %v1986_v37 = vld [vmem:[#allocation2 + $0xc0] sm:$0xff] }
 0x21a   : > { %2108 = vrot.lane.b32.xlu1 %v4455_v7, %s4854_s7  ;;  %2110 = vrot.lane.b32.xlu0 %v4456_v28, %s4854_s7  ;;  %v4460_v7 = vpack.c.bf16 %v1982_v58, %v1982_v58  ;;  %v1983_v28 = vld [vmem:[#allocation2 + $0x98] sm:$0xff] }
 0x21c   : > { %v1610_v31 = vpop.permute.xlu1 %1609  ;;  %v1612_v36 = vpop.permute.xlu0 %1611 }
 0x21d   : > { %1695 = vst.msk [vmem:[#allocation3 + $0x58] sm:$0xf] %vm1683_vm11, %v1610_v31  ;;  %1696 = vst.msk [vmem:[#allocation3 + $0x60] sm:$0xf] %vm1683_vm11, %v1612_v36  ;;  %v4461_v36 = vpack.c.bf16 %v1983_v28, %v1983_v28  ;;  %v1988_v28 = vld [vmem:[#allocation2 + $0xd8] sm:$0xff] }
 0x21e   : > { %2112 = vrot.lane.b32.xlu1 %v4457_v47, %s4854_s7  ;;  %2114 = vrot.lane.b32.xlu0 %v4458_v16, %s4854_s7  ;;  %v4462_v47 = vpack.c.bf16 %v1984_v2, %v1984_v2  ;;  %v1985_v16 = vld [vmem:[#allocation2 + $0xb0] sm:$0xff] }
 0x220   : > { %v1614_v8 = vpop.permute.xlu1 %1613  ;;  %v1616_v27 = vpop.permute.xlu0 %1615 }
 0x221   : > { %1697 = vst.msk [vmem:[#allocation3 + $0x68] sm:$0xf] %vm1683_vm11, %v1614_v8  ;;  %1698 = vst.msk [vmem:[#allocation3 + $0x70] sm:$0xf] %vm1683_vm11, %v1616_v27  ;;  %v4463_v27 = vpack.c.bf16 %v1985_v16, %v1985_v16  ;;  %v1990_v16 = vld [vmem:[#allocation2 + $0xf0] sm:$0xff] }
 0x222   : > { %2116 = vrot.lane.b32.xlu1 %v4459_v30, %s4854_s7  ;;  %2118 = vrot.lane.b32.xlu0 %v4460_v7, %s4854_s7  ;;  %v4464_v30 = vpack.c.bf16 %v1986_v37, %v1986_v37  ;;  %v1987_v7 = vld [vmem:[#allocation2 + $0xc8] sm:$0xff] }
 0x224   : > { %v1618_v1 = vpop.permute.xlu1 %1617  ;;  %v1620_v31 = vpop.permute.xlu0 %1619 }
 0x225   : > { %1699 = vst.msk [vmem:[#allocation3 + $0x78] sm:$0xf] %vm1683_vm11, %v1618_v1  ;;  %1700 = vst.msk [vmem:[#allocation3 + $0x80] sm:$0xf] %vm1683_vm11, %v1620_v31  ;;  %v4465_v31 = vpack.c.bf16 %v1987_v7, %v1987_v7  ;;  %v1992_v7 = vld [vmem:[#allocation2 + $0x108] sm:$0xff] }
 0x226   : > { %2120 = vrot.lane.b32.xlu1 %v4461_v36, %s4854_s7  ;;  %2122 = vrot.lane.b32.xlu0 %v4462_v47, %s4854_s7  ;;  %v4466_v36 = vpack.c.bf16 %v1988_v28, %v1988_v28  ;;  %v1989_v47 = vld [vmem:[#allocation2 + $0xe0] sm:$0xff] }
 0x228   : > { %v1622_v58 = vpop.permute.xlu1 %1621  ;;  %v1624_v8 = vpop.permute.xlu0 %1623 }
 0x229   : > { %1701 = vst.msk [vmem:[#allocation3 + $0x88] sm:$0xf] %vm1683_vm11, %v1622_v58  ;;  %1702 = vst.msk [vmem:[#allocation3 + $0x90] sm:$0xf] %vm1683_vm11, %v1624_v8  ;;  %v4467_v8 = vpack.c.bf16 %v1989_v47, %v1989_v47  ;;  %v1994_v47 = vld [vmem:[#allocation2 + $0x120] sm:$0xff] }
 0x22a   : > { %2124 = vrot.lane.b32.xlu1 %v4463_v27, %s4854_s7  ;;  %2126 = vrot.lane.b32.xlu0 %v4464_v30, %s4854_s7  ;;  %v4468_v27 = vpack.c.bf16 %v1990_v16, %v1990_v16  ;;  %v1991_v30 = vld [vmem:[#allocation2 + $0xf8] sm:$0xff] }
 0x22c   : > { %v1626_v2 = vpop.permute.xlu1 %1625  ;;  %v1628_v1 = vpop.permute.xlu0 %1627 }
 0x22d   : > { %1703 = vst.msk [vmem:[#allocation3 + $0x98] sm:$0xf] %vm1683_vm11, %v1626_v2  ;;  %1704 = vst.msk [vmem:[#allocation3 + $0xa0] sm:$0xf] %vm1683_vm11, %v1628_v1  ;;  %v4469_v1 = vpack.c.bf16 %v1991_v30, %v1991_v30  ;;  %v1996_v30 = vld [vmem:[#allocation2 + $0x138] sm:$0xff] }
 0x22e   : > { %2128 = vrot.lane.b32.xlu1 %v4465_v31, %s4854_s7  ;;  %2130 = vrot.lane.b32.xlu0 %v4466_v36, %s4854_s7  ;;  %v4470_v31 = vpack.c.bf16 %v1992_v7, %v1992_v7  ;;  %v1993_v36 = vld [vmem:[#allocation2 + $0x110] sm:$0xff] }
 0x230   : > { %v1630_v37 = vpop.permute.xlu1 %1629  ;;  %v1632_v58 = vpop.permute.xlu0 %1631 }
 0x231   : > { %1705 = vst.msk [vmem:[#allocation3 + $0xa8] sm:$0xf] %vm1683_vm11, %v1630_v37  ;;  %1706 = vst.msk [vmem:[#allocation3 + $0xb0] sm:$0xf] %vm1683_vm11, %v1632_v58  ;;  %v4471_v58 = vpack.c.bf16 %v1993_v36, %v1993_v36  ;;  %v1998_v36 = vld [vmem:[#allocation2 + $0x150] sm:$0xff] }
 0x232   : > { %2132 = vrot.lane.b32.xlu1 %v4467_v8, %s4854_s7  ;;  %2134 = vrot.lane.b32.xlu0 %v4468_v27, %s4854_s7  ;;  %v4472_v8 = vpack.c.bf16 %v1994_v47, %v1994_v47  ;;  %v1995_v27 = vld [vmem:[#allocation2 + $0x128] sm:$0xff] }
 0x234   : > { %v1634_v28 = vpop.permute.xlu1 %1633  ;;  %v1636_v2 = vpop.permute.xlu0 %1635 }
 0x235   : > { %1707 = vst.msk [vmem:[#allocation3 + $0xb8] sm:$0xf] %vm1683_vm11, %v1634_v28  ;;  %1708 = vst.msk [vmem:[#allocation3 + $0xc0] sm:$0xf] %vm1683_vm11, %v1636_v2  ;;  %v4473_v2 = vpack.c.bf16 %v1995_v27, %v1995_v27 }
 0x236   : > { %2136 = vrot.lane.b32.xlu1 %v4469_v1, %s4854_s7  ;;  %2138 = vrot.lane.b32.xlu0 %v4470_v31, %s4854_s7  ;;  %v4474_v1 = vpack.c.bf16 %v1996_v30, %v1996_v30  ;;  %v1997_v31 = vld [vmem:[#allocation2 + $0x140] sm:$0xff]  ;;  %v2004_v30 = vld [vmem:[#allocation2 + $0x198] sm:$0xff] }
 0x238   : > { %v1638_v16 = vpop.permute.xlu1 %1637  ;;  %v1640_v37 = vpop.permute.xlu0 %1639 }
 0x239   : > { %1709 = vst.msk [vmem:[#allocation3 + $0xc8] sm:$0xf] %vm1683_vm11, %v1638_v16  ;;  %1710 = vst.msk [vmem:[#allocation3 + $0xd0] sm:$0xf] %vm1683_vm11, %v1640_v37  ;;  %v4475_v37 = vpack.c.bf16 %v1997_v31, %v1997_v31 }
 0x23a   : > { %2140 = vrot.lane.b32.xlu1 %v4471_v58, %s4854_s7  ;;  %2142 = vrot.lane.b32.xlu0 %v4472_v8, %s4854_s7  ;;  %v4476_v58 = vpack.c.bf16 %v1998_v36, %v1998_v36 }
 0x23c   : > { %v1642_v7 = vpop.permute.xlu1 %1641  ;;  %v1644_v28 = vpop.permute.xlu0 %1643 }
 0x23d   : > { %1711 = vst.msk [vmem:[#allocation3 + $0xd8] sm:$0xf] %vm1683_vm11, %v1642_v7  ;;  %1712 = vst.msk [vmem:[#allocation3 + $0xe0] sm:$0xf] %vm1683_vm11, %v1644_v28 }
 0x23e   : > { %2144 = vrot.lane.b32.xlu1 %v4473_v2, %s4854_s7  ;;  %2146 = vrot.lane.b32.xlu0 %v4474_v1, %s4854_s7  ;;  %v4482_v2 = vpack.c.bf16 %v2004_v30, %v2004_v30  ;;  %v2005_v1 = vld [vmem:[#allocation2 + $0x1a0] sm:$0xff] }
 0x240   : > { %v1646_v47 = vpop.permute.xlu1 %1645  ;;  %v1648_v16 = vpop.permute.xlu0 %1647 }
 0x241   : > { %1713 = vst.msk [vmem:[#allocation3 + $0xe8] sm:$0xf] %vm1683_vm11, %v1646_v47  ;;  %1714 = vst.msk [vmem:[#allocation3 + $0xf0] sm:$0xf] %vm1683_vm11, %v1648_v16 }
 0x242   : > { %2148 = vrot.lane.b32.xlu1 %v4475_v37, %s4854_s7  ;;  %2150 = vrot.lane.b32.xlu0 %v4476_v58, %s4854_s7 }
 0x244   : > { %v1650_v8 = vpop.permute.xlu1 %1649  ;;  %v1845_v27 = vpop.permute.xlu0 %1844 }
 0x245   : > { %1715 = vst.msk [vmem:[#allocation3 + $0xf8] sm:$0xf] %vm1683_vm11, %v1650_v8 }
 0x246   : > { %1941 = vst.msk [vmem:[#allocation3] sm:$0xf] %vm1940_vm12, %v1845_v27  ;;  %2152 = vrot.lane.b32.xlu1 %v5393_v17, %s4854_s7  ;;  %2154 = vrot.lane.b32.xlu0 %v5403_v33, %s4854_s7  ;;  %v4483_v33 = vpack.c.bf16 %v2005_v1, %v2005_v1 }
 0x248   : > { %v1847_v7 = vpop.permute.xlu1 %1846  ;;  %v1849_v28 = vpop.permute.xlu0 %1848 }
 0x249   : > { %1942 = vst.msk [vmem:[#allocation3 + $0x8] sm:$0xf] %vm1940_vm12, %v1847_v7  ;;  %1943 = vst.msk [vmem:[#allocation3 + $0x10] sm:$0xf] %vm1940_vm12, %v1849_v28  ;;  %v2329_v28 = vld [vmem:[#allocation2 + $0x1a1] sm:$0xff] }
 0x24a   : > { %2156 = vrot.lane.b32.xlu1 %v5405_v34, %s4854_s7  ;;  %2158 = vrot.lane.b32.xlu0 %v5537_v46, %s4854_s7 }
 0x24c   : > { %v1851_v31 = vpop.permute.xlu1 %1850  ;;  %v1853_v17 = vpop.permute.xlu0 %1852 }
 0x24d   : > { %1944 = vst.msk [vmem:[#allocation3 + $0x18] sm:$0xf] %vm1940_vm12, %v1851_v31  ;;  %1945 = vst.msk [vmem:[#allocation3 + $0x20] sm:$0xf] %vm1940_vm12, %v1853_v17 }
 0x24e   : > { %2160 = vrot.lane.b32.xlu1 %v5545_v54, %s4854_s7  ;;  %2162 = vrot.lane.b32.xlu0 %v4482_v2, %s4854_s7 }
 0x250   : > { %v1855_v36 = vpop.permute.xlu1 %1854  ;;  %v1857_v47 = vpop.permute.xlu0 %1856 }
 0x251   : > { %1946 = vst.msk [vmem:[#allocation3 + $0x28] sm:$0xf] %vm1940_vm12, %v1855_v36  ;;  %1947 = vst.msk [vmem:[#allocation3 + $0x30] sm:$0xf] %vm1940_vm12, %v1857_v47 }
 0x252   : > { %2164 = vrot.lane.b32.xlu1 %v4483_v33, %s4854_s7  ;;  %2426 = vrot.lane.b32.xlu0 %v5552_v4, %s4855_s8 }
 0x254   : > { %v1859_v34 = vpop.permute.xlu1 %1858  ;;  %v1861_v46 = vpop.permute.xlu0 %1860 }
 0x255   : > { %1948 = vst.msk [vmem:[#allocation3 + $0x38] sm:$0xf] %vm1940_vm12, %v1859_v34  ;;  %1949 = vst.msk [vmem:[#allocation3 + $0x40] sm:$0xf] %vm1940_vm12, %v1861_v46 }
 0x256   : > { %2428 = vrot.lane.b32.xlu1 %v5559_v9, %s4855_s8  ;;  %2430 = vrot.lane.b32.xlu0 %v5561_v14, %s4855_s8 }
 0x258   : > { %v1863_v54 = vpop.permute.xlu1 %1862  ;;  %v1865_v16 = vpop.permute.xlu0 %1864 }
 0x259   : > { %1950 = vst.msk [vmem:[#allocation3 + $0x48] sm:$0xf] %vm1940_vm12, %v1863_v54  ;;  %1951 = vst.msk [vmem:[#allocation3 + $0x50] sm:$0xf] %vm1940_vm12, %v1865_v16 }
 0x25a   : > { %2432 = vrot.lane.b32.xlu1 %v5569_v23, %s4855_s8  ;;  %2434 = vrot.lane.b32.xlu0 %v5571_v26, %s4855_s8 }
 0x25c   : > { %v1867_v4 = vpop.permute.xlu1 %1866  ;;  %v1869_v37 = vpop.permute.xlu0 %1868 }
 0x25d   : > { %1952 = vst.msk [vmem:[#allocation3 + $0x58] sm:$0xf] %vm1940_vm12, %v1867_v4  ;;  %1953 = vst.msk [vmem:[#allocation3 + $0x60] sm:$0xf] %vm1940_vm12, %v1869_v37 }
 0x25e   : > { %2436 = vrot.lane.b32.xlu1 %v5579_v35, %s4855_s8  ;;  %2438 = vrot.lane.b32.xlu0 %v5581_v38, %s4855_s8 }
 0x260   : > { %v1871_v9 = vpop.permute.xlu1 %1870  ;;  %v1873_v14 = vpop.permute.xlu0 %1872 }
 0x261   : > { %1954 = vst.msk [vmem:[#allocation3 + $0x68] sm:$0xf] %vm1940_vm12, %v1871_v9  ;;  %1955 = vst.msk [vmem:[#allocation3 + $0x70] sm:$0xf] %vm1940_vm12, %v1873_v14 }
 0x262   : > { %2440 = vrot.lane.b32.xlu1 %v5589_v44, %s4855_s8  ;;  %2442 = vrot.lane.b32.xlu0 %v5591_v55, %s4855_s8 }
 0x264   : > { %v1875_v23 = vpop.permute.xlu1 %1874  ;;  %v1877_v26 = vpop.permute.xlu0 %1876 }
 0x265   : > { %1956 = vst.msk [vmem:[#allocation3 + $0x78] sm:$0xf] %vm1940_vm12, %v1875_v23  ;;  %1957 = vst.msk [vmem:[#allocation3 + $0x80] sm:$0xf] %vm1940_vm12, %v1877_v26 }
 0x266   : > { %2444 = vrot.lane.b32.xlu1 %v5599_v20, %s4855_s8  ;;  %2446 = vrot.lane.b32.xlu0 %v5601_v21, %s4855_s8 }
 0x268   : > { %v1879_v35 = vpop.permute.xlu1 %1878  ;;  %v1881_v38 = vpop.permute.xlu0 %1880 }
 0x269   : > { %1958 = vst.msk [vmem:[#allocation3 + $0x88] sm:$0xf] %vm1940_vm12, %v1879_v35  ;;  %1959 = vst.msk [vmem:[#allocation3 + $0x90] sm:$0xf] %vm1940_vm12, %v1881_v38 }
 0x26a   : > { %2448 = vrot.lane.b32.xlu1 %v5609_v50, %s4855_s8  ;;  %2450 = vrot.lane.b32.xlu0 %v5611_v51, %s4855_s8 }
 0x26c   : > { %v1883_v44 = vpop.permute.xlu1 %1882  ;;  %v1885_v55 = vpop.permute.xlu0 %1884 }
 0x26d   : > { %1960 = vst.msk [vmem:[#allocation3 + $0x98] sm:$0xf] %vm1940_vm12, %v1883_v44  ;;  %1961 = vst.msk [vmem:[#allocation3 + $0xa0] sm:$0xf] %vm1940_vm12, %v1885_v55 }
 0x26e   : > { %2452 = vrot.lane.b32.xlu1 %v5619_v24, %s4855_s8  ;;  %2454 = vrot.lane.b32.xlu0 %v5621_v25, %s4855_s8 }
 0x270   : > { %v1887_v20 = vpop.permute.xlu1 %1886  ;;  %v1889_v21 = vpop.permute.xlu0 %1888 }
 0x271   : > { %1962 = vst.msk [vmem:[#allocation3 + $0xa8] sm:$0xf] %vm1940_vm12, %v1887_v20  ;;  %1963 = vst.msk [vmem:[#allocation3 + $0xb0] sm:$0xf] %vm1940_vm12, %v1889_v21 }
 0x272   : > { %2456 = vrot.lane.b32.xlu1 %v5629_v0, %s4855_s8  ;;  %2458 = vrot.lane.b32.xlu0 %v5631_v45, %s4855_s8 }
 0x274   : > { %v1891_v50 = vpop.permute.xlu1 %1890  ;;  %v1893_v51 = vpop.permute.xlu0 %1892 }
 0x275   : > { %1964 = vst.msk [vmem:[#allocation3 + $0xb8] sm:$0xf] %vm1940_vm12, %v1891_v50  ;;  %1965 = vst.msk [vmem:[#allocation3 + $0xc0] sm:$0xf] %vm1940_vm12, %v1893_v51 }
 0x276   : > { %2460 = vrot.lane.b32.xlu1 %v5639_v56, %s4855_s8  ;;  %2462 = vrot.lane.b32.xlu0 %v5641_v57, %s4855_s8 }
 0x278   : > { %v1895_v24 = vpop.permute.xlu1 %1894  ;;  %v1897_v25 = vpop.permute.xlu0 %1896 }
 0x279   : > { %1966 = vst.msk [vmem:[#allocation3 + $0xc8] sm:$0xf] %vm1940_vm12, %v1895_v24  ;;  %1967 = vst.msk [vmem:[#allocation3 + $0xd0] sm:$0xf] %vm1940_vm12, %v1897_v25 }
 0x27a   : > { %2464 = vrot.lane.b32.xlu1 %v5649_v5, %s4855_s8  ;;  %2466 = vrot.lane.b32.xlu0 %v5651_v6, %s4855_s8 }
 0x27c   : > { %v1899_v0 = vpop.permute.xlu1 %1898  ;;  %v1901_v45 = vpop.permute.xlu0 %1900 }
 0x27d   : > { %1968 = vst.msk [vmem:[#allocation3 + $0xd8] sm:$0xf] %vm1940_vm12, %v1899_v0  ;;  %1969 = vst.msk [vmem:[#allocation3 + $0xe0] sm:$0xf] %vm1940_vm12, %v1901_v45 }
 0x27e   : > { %2468 = vrot.lane.b32.xlu1 %v5659_v19, %s4855_s8  ;;  %2470 = vrot.lane.b32.xlu0 %v5661_v22, %s4855_s8 }
 0x280   : > { %v1903_v56 = vpop.permute.xlu1 %1902  ;;  %v1905_v57 = vpop.permute.xlu0 %1904 }
 0x281   : > { %1970 = vst.msk [vmem:[#allocation3 + $0xe8] sm:$0xf] %vm1940_vm12, %v1903_v56  ;;  %1971 = vst.msk [vmem:[#allocation3 + $0xf0] sm:$0xf] %vm1940_vm12, %v1905_v57 }
 0x282   : > { %2472 = vrot.lane.b32.xlu1 %v5669_v39, %s4855_s8  ;;  %2474 = vrot.lane.b32.xlu0 %v5671_v42, %s4855_s8  ;;  %v2328_v42 = vld [vmem:[#allocation2 + $0x199] sm:$0xff] }
 0x284   : > { %v1907_v5 = vpop.permute.xlu1 %1906  ;;  %v2103_v6 = vpop.permute.xlu0 %2102 }
 0x285   : > { %1972 = vst.msk [vmem:[#allocation3 + $0xf8] sm:$0xf] %vm1940_vm12, %v1907_v5  ;;  %v2166_v19 = vrot.slane %v2103_v6, 4 }
 0x286   : > { %2476 = vrot.lane.b32.xlu1 %v5679_v10, %s4855_s8  ;;  %2478 = vrot.lane.b32.xlu0 %v5681_v11, %s4855_s8  ;;  %v4514_v10 = vpack.c.bf16 %v2328_v42, %v2328_v42 }
 0x287   : > { %v2199_v39 = vsel %vm2198_vm15, %v2166_v19, %v2103_v6 }
 0x288   : > { %v2105_v58 = vpop.permute.xlu1 %2104  ;;  %v2107_v8 = vpop.permute.xlu0 %2106  ;;  %2266 = vst.msk [vmem:[#allocation3] sm:$0xff] %vm5988_vm0, %v2199_v39 }
 0x289   : > { %v2167_v27 = vrot.slane %v2105_v58, 4  ;;  %v2168_v30 = vrot.slane %v2107_v8, 4 }
 0x28a   : > { %2480 = vrot.lane.b32.xlu1 %v5689_v62, %s4855_s8  ;;  %2482 = vrot.lane.b32.xlu0 %v5691_v63, %s4855_s8  ;;  %v4515_v62 = vpack.c.bf16 %v2329_v28, %v2329_v28 }
 0x28b   : > { %v2200_v7 = vsel %vm2198_vm15, %v2167_v27, %v2105_v58  ;;  %v2201_v11 = vsel %vm2198_vm15, %v2168_v30, %v2107_v8 }
 0x28c   : > { %v2109_v2 = vpop.permute.xlu1 %2108  ;;  %v2111_v1 = vpop.permute.xlu0 %2110  ;;  %2267 = vst.msk [vmem:[#allocation3 + $0x8] sm:$0xff] %vm5988_vm0, %v2200_v7  ;;  %2268 = vst.msk [vmem:[#allocation3 + $0x10] sm:$0xff] %vm5988_vm0, %v2201_v11 }
 0x28d   : > { %v2169_v31 = vrot.slane %v2109_v2, 4  ;;  %v2170_v17 = vrot.slane %v2111_v1, 4 }
 0x28e   : > { %2484 = vrot.lane.b32.xlu1 %v5699_v48, %s4855_s8  ;;  %2486 = vrot.lane.b32.xlu0 %v4514_v10, %s4855_s8 }
 0x28f   : > { %v2202_v63 = vsel %vm2198_vm15, %v2169_v31, %v2109_v2  ;;  %v2203_v33 = vsel %vm2198_vm15, %v2170_v17, %v2111_v1 }
 0x290   : > { %v2113_v36 = vpop.permute.xlu1 %2112  ;;  %v2115_v47 = vpop.permute.xlu0 %2114  ;;  %2269 = vst.msk [vmem:[#allocation3 + $0x18] sm:$0xff] %vm5988_vm0, %v2202_v63  ;;  %2270 = vst.msk [vmem:[#allocation3 + $0x20] sm:$0xff] %vm5988_vm0, %v2203_v33 }
 0x291   : > { %v2171_v34 = vrot.slane %v2113_v36, 4  ;;  %v2172_v46 = vrot.slane %v2115_v47, 4 }
 0x292   : > { %2488 = vrot.lane.b32.xlu1 %v4515_v62, %s4855_s8  ;;  %2683 = vrot.lane.b32.xlu0 %v5706_v59, %s4856_s9  ;;  %v6796_v62 = vld [vmem:[#allocation6_spill] sm:$0xff] }
 0x293   : > { %v2204_v48 = vsel %vm2198_vm15, %v2171_v34, %v2113_v36  ;;  %v2205_v54 = vsel %vm2198_vm15, %v2172_v46, %v2115_v47 }
 0x294   : > { %v2117_v16 = vpop.permute.xlu1 %2116  ;;  %v2119_v4 = vpop.permute.xlu0 %2118  ;;  %2271 = vst.msk [vmem:[#allocation3 + $0x28] sm:$0xff] %vm5988_vm0, %v2204_v48  ;;  %2272 = vst.msk [vmem:[#allocation3 + $0x30] sm:$0xff] %vm5988_vm0, %v2205_v54  ;;  %v6798_v48 = vld [vmem:[#allocation8_spill] sm:$0xff]  ;;  %v6799_v54 = vld [vmem:[#allocation9_spill] sm:$0xff] }
 0x295   : > { %v2173_v37 = vrot.slane %v2117_v16, 4  ;;  %v2174_v9 = vrot.slane %v2119_v4, 4 }
 0x296   : > { %2685 = vrot.lane.b32.xlu1 %v5713_v15, %s4856_s9  ;;  %2687 = vrot.lane.b32.xlu0 %v5715_v18, %s4856_s9 }
 0x297   : > { %v2206_v59 = vsel %vm2198_vm15, %v2173_v37, %v2117_v16  ;;  %v2207_v14 = vsel %vm2198_vm15, %v2174_v9, %v2119_v4 }
 0x298   : > { %v2121_v23 = vpop.permute.xlu1 %2120  ;;  %v2123_v26 = vpop.permute.xlu0 %2122  ;;  %2273 = vst.msk [vmem:[#allocation3 + $0x38] sm:$0xff] %vm5988_vm0, %v2206_v59  ;;  %2274 = vst.msk [vmem:[#allocation3 + $0x40] sm:$0xff] %vm5988_vm0, %v2207_v14 }
 0x299   : > { %v2175_v35 = vrot.slane %v2121_v23, 4  ;;  %v2176_v38 = vrot.slane %v2123_v26, 4 }
 0x29a   : > { %2689 = vrot.lane.b32.xlu1 %v5723_v43, %s4856_s9  ;;  %2691 = vrot.lane.b32.xlu0 %v5725_v53, %s4856_s9 }
 0x29b   : > { %v2208_v15 = vsel %vm2198_vm15, %v2175_v35, %v2121_v23  ;;  %v2209_v18 = vsel %vm2198_vm15, %v2176_v38, %v2123_v26  ;;  %v6800_v23 = vld [vmem:[#allocation10_spill] sm:$0xff]  ;;  %v6801_v26 = vld [vmem:[#allocation11_spill] sm:$0xff] }
 0x29c   : > { %v2125_v44 = vpop.permute.xlu1 %2124  ;;  %v2127_v55 = vpop.permute.xlu0 %2126  ;;  %2275 = vst.msk [vmem:[#allocation3 + $0x48] sm:$0xff] %vm5988_vm0, %v2208_v15  ;;  %2276 = vst.msk [vmem:[#allocation3 + $0x50] sm:$0xff] %vm5988_vm0, %v2209_v18 }
 0x29d   : > { %v2177_v20 = vrot.slane %v2125_v44, 4  ;;  %v2178_v21 = vrot.slane %v2127_v55, 4 }
 0x29e   : > { %2693 = vrot.lane.b32.xlu1 %v5733_v40, %s4856_s9  ;;  %2695 = vrot.lane.b32.xlu0 %v5735_v41, %s4856_s9 }
 0x29f   : > { %v2210_v43 = vsel %vm2198_vm15, %v2177_v20, %v2125_v44  ;;  %v2211_v53 = vsel %vm2198_vm15, %v2178_v21, %v2127_v55  ;;  %v2580_v20 = vld [vmem:[#allocation2 + $0x15a] sm:$0xff]  ;;  %v2581_v21 = vld [vmem:[#allocation2 + $0x16a] sm:$0xff] }
 0x2a0   : > { %v2129_v50 = vpop.permute.xlu1 %2128  ;;  %v2131_v51 = vpop.permute.xlu0 %2130  ;;  %2277 = vst.msk [vmem:[#allocation3 + $0x58] sm:$0xff] %vm5988_vm0, %v2210_v43  ;;  %2278 = vst.msk [vmem:[#allocation3 + $0x60] sm:$0xff] %vm5988_vm0, %v2211_v53  ;;  %v6802_v43 = vld [vmem:[#allocation12_spill] sm:$0xff]  ;;  %v6803_v53 = vld [vmem:[#allocation13_spill] sm:$0xff] }
 0x2a1   : > { %v2179_v24 = vrot.slane %v2129_v50, 4  ;;  %v2180_v25 = vrot.slane %v2131_v51, 4 }
 0x2a2   : > { %2697 = vrot.lane.b32.xlu1 %v5743_v49, %s4856_s9  ;;  %2699 = vrot.lane.b32.xlu0 %v5745_v3, %s4856_s9 }
 0x2a3   : > { %v2212_v40 = vsel %vm2198_vm15, %v2179_v24, %v2129_v50  ;;  %v2213_v41 = vsel %vm2198_vm15, %v2180_v25, %v2131_v51 }
 0x2a4   : > { %v2133_v0 = vpop.permute.xlu1 %2132  ;;  %v2135_v45 = vpop.permute.xlu0 %2134  ;;  %2279 = vst.msk [vmem:[#allocation3 + $0x68] sm:$0xff] %vm5988_vm0, %v2212_v40  ;;  %2280 = vst.msk [vmem:[#allocation3 + $0x70] sm:$0xff] %vm5988_vm0, %v2213_v41  ;;  %v4541_v40 = vpack.c.bf16 %v2580_v20, %v2580_v20  ;;  %v4542_v41 = vpack.c.bf16 %v2581_v21, %v2581_v21 }
 0x2a5   : > { %v2181_v56 = vrot.slane %v2133_v0, 4  ;;  %v2182_v57 = vrot.slane %v2135_v45, 4 }
 0x2a6   : > { %2701 = vrot.lane.b32.xlu1 %v5753_v60, %s4856_s9  ;;  %2703 = vrot.lane.b32.xlu0 %v5755_v61, %s4856_s9 }
 0x2a7   : > { %v2214_v49 = vsel %vm2198_vm15, %v2181_v56, %v2133_v0  ;;  %v2215_v3 = vsel %vm2198_vm15, %v2182_v57, %v2135_v45  ;;  %v2582_v45 = vld [vmem:[#allocation2 + $0x172] sm:$0xff]  ;;  %v2583_v56 = vld [vmem:[#allocation2 + $0x182] sm:$0xff] }
 0x2a8   : > { %v2137_v5 = vpop.permute.xlu1 %2136  ;;  %v2139_v6 = vpop.permute.xlu0 %2138  ;;  %2281 = vst.msk [vmem:[#allocation3 + $0x78] sm:$0xff] %vm5988_vm0, %v2214_v49  ;;  %2282 = vst.msk [vmem:[#allocation3 + $0x80] sm:$0xff] %vm5988_vm0, %v2215_v3  ;;  %v2585_v49 = vld [vmem:[#allocation2 + $0x19a] sm:$0xff] }
 0x2a9   : > { %v2183_v19 = vrot.slane %v2137_v5, 4  ;;  %v2184_v39 = vrot.slane %v2139_v6, 4 }
 0x2aa   : > { %2705 = vrot.lane.b32.xlu1 %v5763_v29, %s4856_s9  ;;  %2707 = vrot.lane.b32.xlu0 %v5765_v32, %s4856_s9 }
 0x2ab   : > { %v2216_v60 = vsel %vm2198_vm15, %v2183_v19, %v2137_v5  ;;  %v2217_v61 = vsel %vm2198_vm15, %v2184_v39, %v2139_v6  ;;  %v4543_v6 = vpack.c.bf16 %v2582_v45, %v2582_v45  ;;  %v4544_v19 = vpack.c.bf16 %v2583_v56, %v2583_v56  ;;  %v2584_v39 = vld [vmem:[#allocation2 + $0x18a] sm:$0xff] }
 0x2ac   : > { %v2141_v42 = vpop.permute.xlu1 %2140  ;;  %v2143_v58 = vpop.permute.xlu0 %2142  ;;  %2283 = vst.msk [vmem:[#allocation3 + $0x88] sm:$0xff] %vm5988_vm0, %v2216_v60  ;;  %2284 = vst.msk [vmem:[#allocation3 + $0x90] sm:$0xff] %vm5988_vm0, %v2217_v61  ;;  %v4546_v60 = vpack.c.bf16 %v2585_v49, %v2585_v49  ;;  %v2586_v61 = vld [vmem:[#allocation2 + $0x1a2] sm:$0xff] }
 0x2ad   : > { %v2185_v8 = vrot.slane %v2141_v42, 4  ;;  %v2186_v27 = vrot.slane %v2143_v58, 4  ;;  %v4547_v22 = vpack.c.bf16 %v2586_v61, %v2586_v61 }
 0x2ae   : > { %2709 = vrot.lane.b32.xlu1 %v5773_v12, %s4856_s9  ;;  %2711 = vrot.lane.b32.xlu0 %v5775_v13, %s4856_s9  ;;  %v6795_v12 = vld [vmem:[#allocation5_spill] sm:$0xff] }
 0x2af   : > { %v2218_v29 = vsel %vm2198_vm15, %v2185_v8, %v2141_v42  ;;  %v2219_v32 = vsel %vm2198_vm15, %v2186_v27, %v2143_v58  ;;  %v4545_v8 = vpack.c.bf16 %v2584_v39, %v2584_v39 }
 0x2b0   : > { %v2145_v30 = vpop.permute.xlu1 %2144  ;;  %v2147_v10 = vpop.permute.xlu0 %2146  ;;  %2285 = vst.msk [vmem:[#allocation3 + $0x98] sm:$0xff] %vm5988_vm0, %v2218_v29  ;;  %2286 = vst.msk [vmem:[#allocation3 + $0xa0] sm:$0xff] %vm5988_vm0, %v2219_v32 }
 0x2b1   : > { %v2187_v7 = vrot.slane %v2145_v30, 4  ;;  %v2188_v11 = vrot.slane %v2147_v10, 4 }
 0x2b2   : > { %2713 = vrot.lane.b32.xlu1 %v5783_v52, %s4856_s9  ;;  %2715 = vrot.lane.b32.xlu0 %v6795_v12, %s4856_s9  ;;  %v6797_v52 = vld [vmem:[#allocation7_spill] sm:$0xff] }
 0x2b3   : > { %v2220_v13 = vsel %vm2198_vm15, %v2187_v7, %v2145_v30  ;;  %v2221_v28 = vsel %vm2198_vm15, %v2188_v11, %v2147_v10 }
 0x2b4   : > { %v2149_v2 = vpop.permute.xlu1 %2148  ;;  %v2151_v1 = vpop.permute.xlu0 %2150  ;;  %2287 = vst.msk [vmem:[#allocation3 + $0xa8] sm:$0xff] %vm5988_vm0, %v2220_v13  ;;  %2288 = vst.msk [vmem:[#allocation3 + $0xb0] sm:$0xff] %vm5988_vm0, %v2221_v28 }
 0x2b5   : > { %v2189_v31 = vrot.slane %v2149_v2, 4  ;;  %v2190_v17 = vrot.slane %v2151_v1, 4 }
 0x2b6   : > { %2717 = vrot.lane.b32.xlu1 %v6796_v62, %s4856_s9  ;;  %2719 = vrot.lane.b32.xlu0 %v6797_v52, %s4856_s9 }
 0x2b7   : > { %v2222_v63 = vsel %vm2198_vm15, %v2189_v31, %v2149_v2  ;;  %v2223_v33 = vsel %vm2198_vm15, %v2190_v17, %v2151_v1 }
 0x2b8   : > { %v2153_v36 = vpop.permute.xlu1 %2152  ;;  %v2155_v47 = vpop.permute.xlu0 %2154  ;;  %2289 = vst.msk [vmem:[#allocation3 + $0xb8] sm:$0xff] %vm5988_vm0, %v2222_v63  ;;  %2290 = vst.msk [vmem:[#allocation3 + $0xc0] sm:$0xff] %vm5988_vm0, %v2223_v33 }
 0x2b9   : > { %v2191_v34 = vrot.slane %v2153_v36, 4  ;;  %v2192_v46 = vrot.slane %v2155_v47, 4 }
 0x2ba   : > { %2721 = vrot.lane.b32.xlu1 %v6798_v48, %s4856_s9  ;;  %2723 = vrot.lane.b32.xlu0 %v6799_v54, %s4856_s9 }
 0x2bb   : > { %v2224_v16 = vsel %vm2198_vm15, %v2191_v34, %v2153_v36  ;;  %v2225_v4 = vsel %vm2198_vm15, %v2192_v46, %v2155_v47 }
 0x2bc   : > { %v2157_v37 = vpop.permute.xlu1 %2156  ;;  %v2159_v9 = vpop.permute.xlu0 %2158  ;;  %2291 = vst.msk [vmem:[#allocation3 + $0xc8] sm:$0xff] %vm5988_vm0, %v2224_v16  ;;  %2292 = vst.msk [vmem:[#allocation3 + $0xd0] sm:$0xff] %vm5988_vm0, %v2225_v4 }
 0x2bd   : > { %v2193_v59 = vrot.slane %v2157_v37, 4  ;;  %v2194_v14 = vrot.slane %v2159_v9, 4 }
 0x2be   : > { %2725 = vrot.lane.b32.xlu1 %v6800_v23, %s4856_s9  ;;  %2727 = vrot.lane.b32.xlu0 %v6801_v26, %s4856_s9 }
 0x2bf   : > { %v2226_v35 = vsel %vm2198_vm15, %v2193_v59, %v2157_v37  ;;  %v2227_v38 = vsel %vm2198_vm15, %v2194_v14, %v2159_v9 }
 0x2c0   : > { %v2161_v15 = vpop.permute.xlu1 %2160  ;;  %v2163_v18 = vpop.permute.xlu0 %2162  ;;  %2293 = vst.msk [vmem:[#allocation3 + $0xd8] sm:$0xff] %vm5988_vm0, %v2226_v35  ;;  %2294 = vst.msk [vmem:[#allocation3 + $0xe0] sm:$0xff] %vm5988_vm0, %v2227_v38 }
 0x2c1   : > { %v2195_v44 = vrot.slane %v2161_v15, 4  ;;  %v2196_v55 = vrot.slane %v2163_v18, 4 }
 0x2c2   : > { %2729 = vrot.lane.b32.xlu1 %v6802_v43, %s4856_s9  ;;  %2731 = vrot.lane.b32.xlu0 %v6803_v53, %s4856_s9 }
 0x2c3   : > { %v2228_v50 = vsel %vm2198_vm15, %v2195_v44, %v2161_v15  ;;  %v2229_v51 = vsel %vm2198_vm15, %v2196_v55, %v2163_v18 }
 0x2c4   : > { %v2165_v24 = vpop.permute.xlu1 %2164  ;;  %v2427_v25 = vpop.permute.xlu0 %2426  ;;  %2295 = vst.msk [vmem:[#allocation3 + $0xe8] sm:$0xff] %vm5988_vm0, %v2228_v50  ;;  %2296 = vst.msk [vmem:[#allocation3 + $0xf0] sm:$0xff] %vm5988_vm0, %v2229_v51 }
 0x2c5   : > { %v2197_v0 = vrot.slane %v2165_v24, 4  ;;  %2523 = vst.msk [vmem:[#allocation3 + $0x4] sm:$0xf] %vm2522_vm1, %v2427_v25 }
 0x2c6   : > { %2733 = vrot.lane.b32.xlu1 %v4541_v40, %s4856_s9  ;;  %2735 = vrot.lane.b32.xlu0 %v4542_v41, %s4856_s9 }
 0x2c7   : > { %v2230_v57 = vsel %vm2198_vm15, %v2197_v0, %v2165_v24 }
 0x2c8   : > { %2297 = vst.msk [vmem:[#allocation3 + $0xf8] sm:$0xff] %vm5988_vm0, %v2230_v57  ;;  %v2429_v3 = vpop.permute.xlu1 %2428  ;;  %v2431_v5 = vpop.permute.xlu0 %2430 }
 0x2c9   : > { %2524 = vst.msk [vmem:[#allocation3 + $0xc] sm:$0xf] %vm2522_vm1, %v2429_v3  ;;  %2525 = vst.msk [vmem:[#allocation3 + $0x14] sm:$0xf] %vm2522_vm1, %v2431_v5 }
 0x2ca   : > { %2737 = vrot.lane.b32.xlu1 %v4543_v6, %s4856_s9  ;;  %2739 = vrot.lane.b32.xlu0 %v4544_v19, %s4856_s9 }
 0x2cc   : > { %v2433_v42 = vpop.permute.xlu1 %2432  ;;  %v2435_v58 = vpop.permute.xlu0 %2434 }
 0x2cd   : > { %2526 = vst.msk [vmem:[#allocation3 + $0x1c] sm:$0xf] %vm2522_vm1, %v2433_v42  ;;  %2527 = vst.msk [vmem:[#allocation3 + $0x24] sm:$0xf] %vm2522_vm1, %v2435_v58 }
 0x2ce   : > { %2741 = vrot.lane.b32.xlu1 %v4545_v8, %s4856_s9  ;;  %2743 = vrot.lane.b32.xlu0 %v4546_v60, %s4856_s9 }
 0x2d0   : > { %v2437_v27 = vpop.permute.xlu1 %2436  ;;  %v2439_v29 = vpop.permute.xlu0 %2438 }
 0x2d1   : > { %2528 = vst.msk [vmem:[#allocation3 + $0x2c] sm:$0xf] %vm2522_vm1, %v2437_v27  ;;  %2529 = vst.msk [vmem:[#allocation3 + $0x34] sm:$0xf] %vm2522_vm1, %v2439_v29 }
 0x2d2   : > { %2745 = vrot.lane.b32.xlu1 %v4547_v22, %s4856_s9 }
 0x2d4   : > { %v2441_v32 = vpop.permute.xlu1 %2440  ;;  %v2443_v30 = vpop.permute.xlu0 %2442 }
 0x2d5   : > { %2530 = vst.msk [vmem:[#allocation3 + $0x3c] sm:$0xf] %vm2522_vm1, %v2441_v32  ;;  %2531 = vst.msk [vmem:[#allocation3 + $0x44] sm:$0xf] %vm2522_vm1, %v2443_v30 }
 0x2d8   : > { %v2445_v10 = vpop.permute.xlu1 %2444  ;;  %v2447_v7 = vpop.permute.xlu0 %2446 }
 0x2d9   : > { %2532 = vst.msk [vmem:[#allocation3 + $0x4c] sm:$0xf] %vm2522_vm1, %v2445_v10  ;;  %2533 = vst.msk [vmem:[#allocation3 + $0x54] sm:$0xf] %vm2522_vm1, %v2447_v7 }
 0x2dc   : > { %v2449_v11 = vpop.permute.xlu1 %2448  ;;  %v2451_v12 = vpop.permute.xlu0 %2450 }
 0x2dd   : > { %2534 = vst.msk [vmem:[#allocation3 + $0x5c] sm:$0xf] %vm2522_vm1, %v2449_v11  ;;  %2535 = vst.msk [vmem:[#allocation3 + $0x64] sm:$0xf] %vm2522_vm1, %v2451_v12 }
 0x2e0   : > { %v2453_v13 = vpop.permute.xlu1 %2452  ;;  %v2455_v28 = vpop.permute.xlu0 %2454 }
 0x2e1   : > { %2536 = vst.msk [vmem:[#allocation3 + $0x6c] sm:$0xf] %vm2522_vm1, %v2453_v13  ;;  %2537 = vst.msk [vmem:[#allocation3 + $0x74] sm:$0xf] %vm2522_vm1, %v2455_v28 }
 0x2e4   : > { %v2457_v2 = vpop.permute.xlu1 %2456  ;;  %v2459_v1 = vpop.permute.xlu0 %2458 }
 0x2e5   : > { %2538 = vst.msk [vmem:[#allocation3 + $0x7c] sm:$0xf] %vm2522_vm1, %v2457_v2  ;;  %2539 = vst.msk [vmem:[#allocation3 + $0x84] sm:$0xf] %vm2522_vm1, %v2459_v1 }
 0x2e8   : > { %v2461_v31 = vpop.permute.xlu1 %2460  ;;  %v2463_v17 = vpop.permute.xlu0 %2462 }
 0x2e9   : > { %2540 = vst.msk [vmem:[#allocation3 + $0x8c] sm:$0xf] %vm2522_vm1, %v2461_v31  ;;  %2541 = vst.msk [vmem:[#allocation3 + $0x94] sm:$0xf] %vm2522_vm1, %v2463_v17 }
 0x2ec   : > { %v2465_v62 = vpop.permute.xlu1 %2464  ;;  %v2467_v52 = vpop.permute.xlu0 %2466 }
 0x2ed   : > { %2542 = vst.msk [vmem:[#allocation3 + $0x9c] sm:$0xf] %vm2522_vm1, %v2465_v62  ;;  %2543 = vst.msk [vmem:[#allocation3 + $0xa4] sm:$0xf] %vm2522_vm1, %v2467_v52 }
 0x2f0   : > { %v2469_v63 = vpop.permute.xlu1 %2468  ;;  %v2471_v33 = vpop.permute.xlu0 %2470 }
 0x2f1   : > { %2544 = vst.msk [vmem:[#allocation3 + $0xac] sm:$0xf] %vm2522_vm1, %v2469_v63  ;;  %2545 = vst.msk [vmem:[#allocation3 + $0xb4] sm:$0xf] %vm2522_vm1, %v2471_v33 }
 0x2f4   : > { %v2473_v36 = vpop.permute.xlu1 %2472  ;;  %v2475_v47 = vpop.permute.xlu0 %2474 }
 0x2f5   : > { %2546 = vst.msk [vmem:[#allocation3 + $0xbc] sm:$0xf] %vm2522_vm1, %v2473_v36  ;;  %2547 = vst.msk [vmem:[#allocation3 + $0xc4] sm:$0xf] %vm2522_vm1, %v2475_v47 }
 0x2f8   : > { %v2477_v34 = vpop.permute.xlu1 %2476  ;;  %v2479_v46 = vpop.permute.xlu0 %2478 }
 0x2f9   : > { %2548 = vst.msk [vmem:[#allocation3 + $0xcc] sm:$0xf] %vm2522_vm1, %v2477_v34  ;;  %2549 = vst.msk [vmem:[#allocation3 + $0xd4] sm:$0xf] %vm2522_vm1, %v2479_v46 }
 0x2fc   : > { %v2481_v48 = vpop.permute.xlu1 %2480  ;;  %v2483_v54 = vpop.permute.xlu0 %2482 }
 0x2fd   : > { %2550 = vst.msk [vmem:[#allocation3 + $0xdc] sm:$0xf] %vm2522_vm1, %v2481_v48  ;;  %2551 = vst.msk [vmem:[#allocation3 + $0xe4] sm:$0xf] %vm2522_vm1, %v2483_v54 }
 0x300   : > { %v2485_v16 = vpop.permute.xlu1 %2484  ;;  %v2487_v4 = vpop.permute.xlu0 %2486 }
 0x301   : > { %2552 = vst.msk [vmem:[#allocation3 + $0xec] sm:$0xf] %vm2522_vm1, %v2485_v16  ;;  %2553 = vst.msk [vmem:[#allocation3 + $0xf4] sm:$0xf] %vm2522_vm1, %v2487_v4 }
 0x304   : > { %v2489_v37 = vpop.permute.xlu1 %2488  ;;  %v2684_v9 = vpop.permute.xlu0 %2683 }
 0x305   : > { %2554 = vst.msk [vmem:[#allocation3 + $0xfc] sm:$0xf] %vm2522_vm1, %v2489_v37 }
 0x306   : > { %2780 = vst.msk [vmem:[#allocation3 + $0x4] sm:$0xf] %vm2779_vm2, %v2684_v9 }
 0x308   : > { %v2686_v59 = vpop.permute.xlu1 %2685  ;;  %v2688_v14 = vpop.permute.xlu0 %2687 }
 0x309   : > { %2781 = vst.msk [vmem:[#allocation3 + $0xc] sm:$0xf] %vm2779_vm2, %v2686_v59  ;;  %2782 = vst.msk [vmem:[#allocation3 + $0x14] sm:$0xf] %vm2779_vm2, %v2688_v14 }
 0x30c   : > { %v2690_v23 = vpop.permute.xlu1 %2689  ;;  %v2692_v26 = vpop.permute.xlu0 %2691 }
 0x30d   : > { %2783 = vst.msk [vmem:[#allocation3 + $0x1c] sm:$0xf] %vm2779_vm2, %v2690_v23  ;;  %2784 = vst.msk [vmem:[#allocation3 + $0x24] sm:$0xf] %vm2779_vm2, %v2692_v26 }
 0x310   : > { %v2694_v35 = vpop.permute.xlu1 %2693  ;;  %v2696_v38 = vpop.permute.xlu0 %2695 }
 0x311   : > { %2785 = vst.msk [vmem:[#allocation3 + $0x2c] sm:$0xf] %vm2779_vm2, %v2694_v35  ;;  %2786 = vst.msk [vmem:[#allocation3 + $0x34] sm:$0xf] %vm2779_vm2, %v2696_v38 }
 0x314   : > { %v2698_v15 = vpop.permute.xlu1 %2697  ;;  %v2700_v18 = vpop.permute.xlu0 %2699 }
 0x315   : > { %2787 = vst.msk [vmem:[#allocation3 + $0x3c] sm:$0xf] %vm2779_vm2, %v2698_v15  ;;  %2788 = vst.msk [vmem:[#allocation3 + $0x44] sm:$0xf] %vm2779_vm2, %v2700_v18 }
 0x318   : > { %v2702_v44 = vpop.permute.xlu1 %2701  ;;  %v2704_v55 = vpop.permute.xlu0 %2703 }
 0x319   : > { %2789 = vst.msk [vmem:[#allocation3 + $0x4c] sm:$0xf] %vm2779_vm2, %v2702_v44  ;;  %2790 = vst.msk [vmem:[#allocation3 + $0x54] sm:$0xf] %vm2779_vm2, %v2704_v55 }
 0x31c   : > { %v2706_v20 = vpop.permute.xlu1 %2705  ;;  %v2708_v21 = vpop.permute.xlu0 %2707 }
 0x31d   : > { %2791 = vst.msk [vmem:[#allocation3 + $0x5c] sm:$0xf] %vm2779_vm2, %v2706_v20  ;;  %2792 = vst.msk [vmem:[#allocation3 + $0x64] sm:$0xf] %vm2779_vm2, %v2708_v21 }
 0x320   : > { %v2710_v43 = vpop.permute.xlu1 %2709  ;;  %v2712_v53 = vpop.permute.xlu0 %2711 }
 0x321   : > { %2793 = vst.msk [vmem:[#allocation3 + $0x6c] sm:$0xf] %vm2779_vm2, %v2710_v43  ;;  %2794 = vst.msk [vmem:[#allocation3 + $0x74] sm:$0xf] %vm2779_vm2, %v2712_v53 }
 0x324   : > { %v2714_v50 = vpop.permute.xlu1 %2713  ;;  %v2716_v51 = vpop.permute.xlu0 %2715 }
 0x325   : > { %2795 = vst.msk [vmem:[#allocation3 + $0x7c] sm:$0xf] %vm2779_vm2, %v2714_v50  ;;  %2796 = vst.msk [vmem:[#allocation3 + $0x84] sm:$0xf] %vm2779_vm2, %v2716_v51 }
 0x328   : > { %v2718_v24 = vpop.permute.xlu1 %2717  ;;  %v2720_v25 = vpop.permute.xlu0 %2719 }
 0x329   : > { %2797 = vst.msk [vmem:[#allocation3 + $0x8c] sm:$0xf] %vm2779_vm2, %v2718_v24  ;;  %2798 = vst.msk [vmem:[#allocation3 + $0x94] sm:$0xf] %vm2779_vm2, %v2720_v25 }
 0x32c   : > { %v2722_v40 = vpop.permute.xlu1 %2721  ;;  %v2724_v41 = vpop.permute.xlu0 %2723 }
 0x32d   : > { %2799 = vst.msk [vmem:[#allocation3 + $0x9c] sm:$0xf] %vm2779_vm2, %v2722_v40  ;;  %2800 = vst.msk [vmem:[#allocation3 + $0xa4] sm:$0xf] %vm2779_vm2, %v2724_v41 }
 0x330   : > { %v2726_v0 = vpop.permute.xlu1 %2725  ;;  %v2728_v45 = vpop.permute.xlu0 %2727 }
 0x331   : > { %2801 = vst.msk [vmem:[#allocation3 + $0xac] sm:$0xf] %vm2779_vm2, %v2726_v0  ;;  %2802 = vst.msk [vmem:[#allocation3 + $0xb4] sm:$0xf] %vm2779_vm2, %v2728_v45 }
 0x334   : > { %v2730_v56 = vpop.permute.xlu1 %2729  ;;  %v2732_v57 = vpop.permute.xlu0 %2731 }
 0x335   : > { %2803 = vst.msk [vmem:[#allocation3 + $0xbc] sm:$0xf] %vm2779_vm2, %v2730_v56  ;;  %2804 = vst.msk [vmem:[#allocation3 + $0xc4] sm:$0xf] %vm2779_vm2, %v2732_v57 }
 0x338   : > { %v2734_v49 = vpop.permute.xlu1 %2733  ;;  %v2736_v3 = vpop.permute.xlu0 %2735 }
 0x339   : > { %2805 = vst.msk [vmem:[#allocation3 + $0xcc] sm:$0xf] %vm2779_vm2, %v2734_v49  ;;  %2806 = vst.msk [vmem:[#allocation3 + $0xd4] sm:$0xf] %vm2779_vm2, %v2736_v3 }
 0x33c   : > { %v2738_v5 = vpop.permute.xlu1 %2737  ;;  %v2740_v6 = vpop.permute.xlu0 %2739 }
 0x33d   : > { %2807 = vst.msk [vmem:[#allocation3 + $0xdc] sm:$0xf] %vm2779_vm2, %v2738_v5  ;;  %2808 = vst.msk [vmem:[#allocation3 + $0xe4] sm:$0xf] %vm2779_vm2, %v2740_v6 }
 0x340   : > { %v2742_v19 = vpop.permute.xlu1 %2741  ;;  %v2744_v39 = vpop.permute.xlu0 %2743 }
 0x341   : > { %2809 = vst.msk [vmem:[#allocation3 + $0xec] sm:$0xf] %vm2779_vm2, %v2742_v19  ;;  %2810 = vst.msk [vmem:[#allocation3 + $0xf4] sm:$0xf] %vm2779_vm2, %v2744_v39 }
 0x344   : > { %v2746_v60 = vpop.permute.xlu1 %2745 }
 0x345   : > { %2811 = vst.msk [vmem:[#allocation3 + $0xfc] sm:$0xf] %vm2779_vm2, %v2746_v60 }
 0x346 LB: >> { %v4635_v61 = vld [vmem:[%s6771_s1 + $0x38] sm:$0xff]   ;;  %v4857_v42 = vmov 0   ;;  %v4636_v58 = vld [vmem:[%s6771_s1 + $0x30] sm:$0xff]   ;;  %v4637_v8 = vld [vmem:[%s6771_s1 + $0x28] sm:$0xff]   ;;  %s6240_s22 = sshll.u32 %s4844_s10, 7  ;;  %vm2999_vm3 = vcmask 359424   ;;  %s4844_s10 = sphi %s6221_s10, %s2817_s10  }
 0x347   : >> { %3028 = vmatprep.subr.bf16.mxu0 %v4857_v42  ;;  %4549 = vmatprep.subr.bf16.mxu1 %v4857_v42  ;;  %v4638_v22 = vld [vmem:[%s6771_s1 + $0x20] sm:$0xff]   ;;  %s6250_s25 = scalar_lea.vmem [#allocation3], %s6240_s22  ;;  %v4639_v32 = vld [vmem:[%s6771_s1 + $0x18] sm:$0xff]   ;;  %v4640_v30 = vld [vmem:[%s6771_s1 + $0x10] sm:$0xff]   ;;  %s6267_s3 = scalar_lea.vmem [#allocation4], %s6240_s22  ;;  %vm3024_vm4 = vcmask 1045504  }
 0x348   : >> { %3029 = vmatpush1.bf16.msra.mxu0 %v4635_v61  ;;  %4560 = vmatpush1.bf16.msra.mxu1 %v4635_v61  ;;  %v3238_v10 = vld [vmem:[%s6267_s3] sm:$0xff]  ;;  %v4641_v7 = vld [vmem:[%s6771_s1 + $0x8] sm:$0xff]   ;;  %s4858_s6 = smov 16   ;;  %v4643_v13 = vld [vmem:[%s6771_s1 + $0x50] sm:$0x3f]   ;;  %s4859_s21 = smov 80  }
 0x349   : >> { %3030 = vmatprep.subr.bf16.mxu0 %v4857_v42  ;;  %4550 = vmatprep.subr.bf16.mxu1 %v4857_v42  ;;  %v3239_v11 = vld [vmem:[%s6267_s3 + $0x8] sm:$0xff]  ;;  %v4642_v12 = vld [vmem:[%s6771_s1] sm:$0xff]   ;;  %v3026_v28 = vsel %vm3024_vm4, %v4643_v13, 0  ;;  %s4860_s23 = smov 112   ;;  %vm3654_vm5 = vcmask 130048   ;;  %s4861_s24 = smov 96  }
 0x34a   : >> { %3270 = vrot.lane.b32.xlu0 %v3238_v10, %s4858_s6  ;;  %3272 = vrot.lane.b32.xlu1 %v3239_v11, %s4858_s6  ;;  %v4644_v2 = vld [vmem:[%s6771_s1 + $0x48] sm:$0xff]   ;;  %v4645_v1 = vld [vmem:[%s6771_s1 + $0x40] sm:$0xff]   ;;  %s2817_s10 = sadd.s32 1, %s4844_s10  }
 0x34b   : >> { %p2814_p9 = scmp.ge.s32.totalorder %s2817_s10, 2  }
 0x34c   : >> { %3031 = vmatpush1.bf16.msra.mxu0 %v4636_v58  ;;  %4561 = vmatpush1.bf16.msra.mxu1 %v4636_v58  ;;  %v4648_v27 = vld [vmem:[%s6250_s25 + $0x4] ss:$8 sps:$4 sm:$0xff]   ;;  %v4646_v31 = vld [vmem:[%s6250_s25] ss:$8 sps:$4 sm:$0xff]   ;;  %v4652_v62 = vld [vmem:[%s6250_s25 + $0x14] ss:$8 sps:$4 sm:$0xff]  }
 0x34d   : >> { %3032 = vmatprep.subr.bf16.mxu0 %v4857_v42  ;;  %4551 = vmatprep.subr.bf16.mxu1 %v4857_v42  ;;  %v4651_v29 = vld [vmem:[%s6250_s25 + $0x44] ss:$8 sps:$4 sm:$0xff]   ;;  %v4649_v17 = vld [vmem:[%s6250_s25 + $0x40] ss:$8 sps:$4 sm:$0xff]   ;;  %v4655_v52 = vld [vmem:[%s6250_s25 + $0x54] ss:$8 sps:$4 sm:$0xff]  }
 0x34e   : >> { %4234 = vmatprep.mubr.msk.bf16.mxu0 %vm2999_vm3, %v4648_v27  ;;  %4238 = vmatprep.mubr.msk.bf16.mxu1 %vm2999_vm3, %v4651_v29  ;;  %v4654_v63 = vld [vmem:[%s6250_s25 + $0x10] ss:$8 sps:$4 sm:$0xff]   ;;  %v4658_v36 = vld [vmem:[%s6250_s25 + $0x24] ss:$8 sps:$4 sm:$0xff]   ;;  %v4660_v34 = vld [vmem:[%s6250_s25 + $0x20] ss:$8 sps:$4 sm:$0xff]  }
 0x34f   : >> { %v4657_v33 = vld [vmem:[%s6250_s25 + $0x50] ss:$8 sps:$4 sm:$0xff]   ;;  %v4661_v47 = vld [vmem:[%s6250_s25 + $0x64] ss:$8 sps:$4 sm:$0xff]   ;;  %v4663_v46 = vld [vmem:[%s6250_s25 + $0x60] ss:$8 sps:$4 sm:$0xff]  }
 0x350   : >> { %3033 = vmatpush1.bf16.msra.mxu0 %v4637_v8  ;;  %4562 = vmatpush1.bf16.msra.mxu1 %v4637_v8  ;;  %v4664_v48 = vld [vmem:[%s6250_s25 + $0x34] ss:$8 sps:$4 sm:$0xff]   ;;  %v4666_v16 = vld [vmem:[%s6250_s25 + $0x30] ss:$8 sps:$4 sm:$0xff]  }
 0x351   : >> { %3034 = vmatprep.subr.bf16.mxu0 %v4857_v42  ;;  %4552 = vmatprep.subr.bf16.mxu1 %v4857_v42  ;;  %v4667_v54 = vld [vmem:[%s6250_s25 + $0x74] ss:$8 sps:$4 sm:$0xff]   ;;  %v4669_v4 = vld [vmem:[%s6250_s25 + $0x70] ss:$8 sps:$4 sm:$0xff]   ;;  %s6654_s25 = scalar_lea.vmem %s4919_s28, %s6240_s22 }
 0x354   : >> { %3035 = vmatpush1.bf16.msra.mxu0 %v4638_v22  ;;  %4563 = vmatpush1.bf16.msra.mxu1 %v4638_v22 }
 0x355   : >> { %3036 = vmatprep.subr.bf16.mxu0 %v4857_v42  ;;  %4553 = vmatprep.subr.bf16.mxu1 %v4857_v42 }
 0x358   : >> { %3037 = vmatpush1.bf16.msra.mxu0 %v4639_v32  ;;  %4564 = vmatpush1.bf16.msra.mxu1 %v4639_v32 }
 0x359   : >> { %3038 = vmatprep.subr.bf16.mxu0 %v4857_v42  ;;  %4554 = vmatprep.subr.bf16.mxu1 %v4857_v42 }
 0x35c   : >> { %3039 = vmatpush1.bf16.msra.mxu0 %v4640_v30  ;;  %4565 = vmatpush1.bf16.msra.mxu1 %v4640_v30 }
 0x35d   : >> { %3040 = vmatprep.subr.bf16.mxu0 %v4857_v42  ;;  %4555 = vmatprep.subr.bf16.mxu1 %v4857_v42 }
 0x360   : >> { %3041 = vmatpush1.bf16.msra.mxu0 %v4641_v7  ;;  %4566 = vmatpush1.bf16.msra.mxu1 %v4641_v7 }
 0x361   : >> { %3042 = vmatprep.subr.bf16.mxu0 %v4857_v42  ;;  %4556 = vmatprep.subr.bf16.mxu1 %v4857_v42 }
 0x364   : >> { %3043 = vmatpush1.bf16.msra.mxu0 %v4642_v12  ;;  %4567 = vmatpush1.bf16.msra.mxu1 %v4642_v12 }
 0x365   : >> { %3054 = vmatprep.subr.bf16.mxu0 %v4857_v42  ;;  %4557 = vmatprep.subr.bf16.mxu1 %v4857_v42 }
 0x368   : >> { %3055 = vmatpush2.bf16.msra.mxu0 %v3026_v28  ;;  %4568 = vmatpush2.bf16.msra.mxu1 %v3026_v28  ;;  %v3240_v28 = vld [vmem:[%s6267_s3 + $0x10] sm:$0xff] }
 0x369   : >> { %3056 = vmatprep.subr.bf16.mxu0 %v4857_v42  ;;  %4558 = vmatprep.subr.bf16.mxu1 %v4857_v42 }
 0x36c   : >> { %3057 = vmatpush2.bf16.msra.mxu0 %v4644_v2  ;;  %4569 = vmatpush2.bf16.msra.mxu1 %v4644_v2 }
 0x36d   : >> { %3058 = vmatprep.subr.bf16.mxu0 %v4857_v42  ;;  %4559 = vmatprep.subr.bf16.mxu1 %v4857_v42 }
 0x370   : >> { %3059 = vmatpush2.bf16.msra.mxu0 %v4645_v1  ;;  %4570 = vmatpush2.bf16.msra.mxu1 %v4645_v1  ;;  %v3242_v1 = vld [vmem:[%s6267_s3 + $0x20] sm:$0xff] }
 0x373   : >> { %3061 = vmatmul.mubr.bf16.vlgmr.msra.gmra.mxu0 %v4646_v31  ;;  %3093 = vmatmul.mubr.bf16.vlgmr.msra.gmra.mxu1 %v4649_v17  ;;  %v3241_v31 = vld [vmem:[%s6267_s3 + $0x18] sm:$0xff]  ;;  %v3244_v17 = vld [vmem:[%s6267_s3 + $0x30] sm:$0xff] }
 0x374   : >> { %4235 = vmatprep.mubr.msk.bf16.mxu0 %vm2999_vm3, %v4652_v62  ;;  %4239 = vmatprep.mubr.msk.bf16.mxu1 %vm2999_vm3, %v4655_v52  ;;  %v3243_v62 = vld [vmem:[%s6267_s3 + $0x28] sm:$0xff]  ;;  %v3246_v52 = vld [vmem:[%s6267_s3 + $0x40] sm:$0xff] }
 0x37b   : >> { %3069 = vmatmul.mubr.bf16.gmra.mxu0 %v4654_v63  ;;  %3101 = vmatmul.mubr.bf16.gmra.mxu1 %v4657_v33  ;;  %v3245_v63 = vld [vmem:[%s6267_s3 + $0x38] sm:$0xff]  ;;  %v3248_v33 = vld [vmem:[%s6267_s3 + $0x50] sm:$0xff] }
 0x37c   : >> { %4236 = vmatprep.mubr.msk.bf16.mxu0 %vm2999_vm3, %v4658_v36  ;;  %4240 = vmatprep.mubr.msk.bf16.mxu1 %vm2999_vm3, %v4661_v47  ;;  %v3247_v36 = vld [vmem:[%s6267_s3 + $0x48] sm:$0xff]  ;;  %v3250_v47 = vld [vmem:[%s6267_s3 + $0x60] sm:$0xff] }
 0x383   : >> { %3077 = vmatmul.mubr.bf16.gmra.mxu0 %v4660_v34  ;;  %3109 = vmatmul.mubr.bf16.gmra.mxu1 %v4663_v46  ;;  %v3249_v34 = vld [vmem:[%s6267_s3 + $0x58] sm:$0xff]  ;;  %v3252_v46 = vld [vmem:[%s6267_s3 + $0x70] sm:$0xff] }
 0x384   : >> { %4237 = vmatprep.mubr.msk.bf16.mxu0 %vm2999_vm3, %v4664_v48  ;;  %4241 = vmatprep.mubr.msk.bf16.mxu1 %vm2999_vm3, %v4667_v54  ;;  %v3251_v48 = vld [vmem:[%s6267_s3 + $0x68] sm:$0xff]  ;;  %v3253_v54 = vld [vmem:[%s6267_s3 + $0x78] sm:$0xff] }
 0x38b   : >> { %3085 = vmatmul.mubr.bf16.gmra.mxu0 %v4666_v16  ;;  %3117 = vmatmul.mubr.bf16.gmra.mxu1 %v4669_v4 }
 0x433   : >> { %v6318_v37 = vpop.f32.mrf.mxu0  ;;  %v6320_v9 = vpop.f32.mrf.mxu1 }
 0x434   : >> { %4670 = vtanh.f32 %v6318_v37  ;;  %v4242_v16 = vmul.f32 -1.442695, %v6318_v37  ;;  %v4250_v4 = vmul.f32 -1.442695, %v6320_v9 }
 0x435   : >> { %v3064_v59 = vpop.f32.mrf.mxu0  ;;  %v3096_v14 = vpop.f32.mrf.mxu1  ;;  %4672 = vtanh.f32 %v6320_v9 }
 0x437   : >> { %v6324_v23 = vpop.f32.mrf.mxu0  ;;  %v6326_v26 = vpop.f32.mrf.mxu1 }
 0x438   : >> { %4674 = vtanh.f32 %v6326_v26  ;;  %v4243_v59 = vmul.f32 -1.442695, %v6324_v23 }
 0x439   : >> { %v3067_v35 = vpop.f32.mrf.mxu0  ;;  %v3099_v38 = vpop.f32.mrf.mxu1  ;;  %4676 = vtanh.f32 %v6324_v23 }
 0x43a   : >> { %v4251_v35 = vmul.f32 -1.442695, %v6326_v26 }
 0x43b   : >> { %v6330_v15 = vpop.f32.mrf.mxu0  ;;  %v6332_v18 = vpop.f32.mrf.mxu1 }
 0x43c   : >> { %4678 = vtanh.f32 %v6330_v15  ;;  %v4244_v14 = vmul.f32 -1.442695, %v6330_v15  ;;  %v4252_v38 = vmul.f32 -1.442695, %v6332_v18 }
 0x43d   : >> { %v3072_v44 = vpop.f32.mrf.mxu0  ;;  %v3104_v55 = vpop.f32.mrf.mxu1  ;;  %4680 = vtanh.f32 %v6332_v18 }
 0x43f   : >> { %v6336_v20 = vpop.f32.mrf.mxu0  ;;  %v6338_v21 = vpop.f32.mrf.mxu1 }
 0x440   : >> { %4682 = vtanh.f32 %v6336_v20  ;;  %v4245_v44 = vmul.f32 -1.442695, %v6336_v20  ;;  %v4253_v9 = vmul.f32 -1.442695, %v6338_v21 }
 0x441   : >> { %v4671_v43 = vpop.eup %4670  ;;  %v3075_v53 = vpop.f32.mrf.mxu0  ;;  %4684 = vtanh.f32 %v6338_v21 }
 0x442   : >> { %v3107_v50 = vpop.f32.mrf.mxu1  ;;  %3350 = vrot.lane.b32.xlu0 %v4671_v43, %s4859_s21  ;;  %v4673_v51 = vpop.eup %4672 }
 0x443   : >> { %v6343_v24 = vpop.f32.mrf.mxu0 }
 0x444   : >> { %v6345_v25 = vpop.f32.mrf.mxu1  ;;  %4686 = vtanh.f32 %v6343_v24  ;;  %v4246_v37 = vmul.f32 -1.442695, %v6343_v24 }
 0x445   : >> { %v3080_v40 = vpop.f32.mrf.mxu0  ;;  %v4675_v0 = vpop.eup %4674  ;;  %4688 = vtanh.f32 %v6345_v25  ;;  %v4254_v23 = vmul.f32 -1.442695, %v6345_v25 }
 0x446   : >> { %v3112_v41 = vpop.f32.mrf.mxu1  ;;  %3366 = vrot.lane.b32.xlu0 %v4673_v51, %s4859_s21  ;;  %3368 = vrot.lane.b32.xlu1 %v4675_v0, %s4859_s21  ;;  %v4677_v57 = vpop.eup %4676 }
 0x447   : >> { %v6351_v45 = vpop.f32.mrf.mxu0 }
 0x448   : >> { %v6353_v56 = vpop.f32.mrf.mxu1  ;;  %4690 = vtanh.f32 %v6351_v45  ;;  %v4247_v20 = vmul.f32 -1.442695, %v6351_v45 }
 0x449   : >> { %v4679_v49 = vpop.eup %4678  ;;  %v3083_v3 = vpop.f32.mrf.mxu0  ;;  %4692 = vtanh.f32 %v6353_v56  ;;  %v4255_v21 = vmul.f32 -1.442695, %v6353_v56 }
 0x44a   : >> { %v3115_v5 = vpop.f32.mrf.mxu1  ;;  %3352 = vrot.lane.b32.xlu0 %v4677_v57, %s4859_s21  ;;  %v4681_v6 = vpop.eup %4680  ;;  %3354 = vrot.lane.b32.xlu1 %v4679_v49, %s4859_s21 }
 0x44b   : >> { %v6357_v19 = vpop.f32.mrf.mxu0  ;;  %v6423_v3 = vpop.permute.xlu0 %3270 }
 0x44c   : >> { %v6359_v39 = vpop.f32.mrf.mxu1  ;;  %4694 = vtanh.f32 %v6357_v19  ;;  %v4248_v49 = vmul.f32 -1.442695, %v6357_v19 }
 0x44d   : >> { %v4683_v60 = vpop.eup %4682  ;;  %v3088_v61 = vpop.f32.mrf.mxu0  ;;  %4696 = vtanh.f32 %v6359_v39  ;;  %v4256_v56 = vmul.f32 -1.442695, %v6359_v39 }
 0x44e   : >> { %v3120_v42 = vpop.f32.mrf.mxu1  ;;  %3370 = vrot.lane.b32.xlu0 %v4681_v6, %s4859_s21  ;;  %3356 = vrot.lane.b32.xlu1 %v4683_v60, %s4859_s21  ;;  %v4685_v22 = vpop.eup %4684 }
 0x44f   : >> { %v6364_v58 = vpop.f32.mrf.mxu0 }
 0x450   : >> { %v6366_v8 = vpop.f32.mrf.mxu1  ;;  %4698 = vtanh.f32 %v6364_v58  ;;  %v4249_v19 = vmul.f32 -1.442695, %v6364_v58 }
 0x451   : >> { %v4687_v27 = vpop.eup %4686  ;;  %v3091_v29 = vpop.f32.mrf.mxu0  ;;  %4700 = vtanh.f32 %v6366_v8 }
 0x452   : >> { %v3123_v32 = vpop.f32.mrf.mxu1  ;;  %3358 = vrot.lane.b32.xlu0 %v4687_v27, %s4859_s21  ;;  %v4689_v30 = vpop.eup %4688  ;;  %3372 = vrot.lane.b32.xlu1 %v4685_v22, %s4859_s21  ;;  %4702 = vpow2.f32 %v4242_v16 }
 0x453   : >> { %4704 = vpow2.f32 %v4250_v4  ;;  %v6428_v27 = vpop.permute.xlu1 %3272 }
 0x454   : >> { %4706 = vpow2.f32 %v4243_v59 }
 0x455   : >> { %v4691_v10 = vpop.eup %4690  ;;  %4708 = vpow2.f32 %v4244_v14 }
 0x456   : >> { %3374 = vrot.lane.b32.xlu0 %v4689_v30, %s4859_s21  ;;  %3360 = vrot.lane.b32.xlu1 %v4691_v10, %s4859_s21  ;;  %v4693_v7 = vpop.eup %4692  ;;  %4710 = vpow2.f32 %v4251_v35 }
 0x457   : >> { %4712 = vpow2.f32 %v4252_v38 }
 0x458   : >> { %4714 = vpow2.f32 %v4245_v44 }
 0x459   : >> { %v4695_v11 = vpop.eup %4694  ;;  %4716 = vpow2.f32 %v4246_v37 }
 0x45a   : >> { %3376 = vrot.lane.b32.xlu1 %v4693_v7, %s4859_s21  ;;  %3362 = vrot.lane.b32.xlu0 %v4695_v11, %s4859_s21  ;;  %v4697_v12 = vpop.eup %4696  ;;  %4718 = vpow2.f32 %v4253_v9 }
 0x45d   : >> { %v4699_v13 = vpop.eup %4698 }
 0x45e   : >> { %3378 = vrot.lane.b32.xlu0 %v4697_v12, %s4859_s21  ;;  %3364 = vrot.lane.b32.xlu1 %v4699_v13, %s4859_s21  ;;  %v4701_v2 = vpop.eup %4700  ;;  %v4257_v12 = vmul.f32 -1.442695, %v6366_v8 }
 0x45f   : >> { %v4703_v55 = vpop.eup %4702 }
 0x460   : >> { %v3173_v43 = vadd.f32 1.0, %v4703_v55  ;;  %v4705_v15 = vpop.eup %4704 }
 0x461   : >> { %v4707_v26 = vpop.eup %4706  ;;  %v3181_v53 = vadd.f32 1.0, %v4705_v15 }
 0x462   : >> { %3274 = vrot.lane.b32.xlu0 %v3240_v28, %s4858_s6  ;;  %3380 = vrot.lane.b32.xlu1 %v4701_v2, %s4859_s21  ;;  %4720 = vrcp.f32 %v3173_v43  ;;  %v4709_v18 = vpop.eup %4708  ;;  %v3174_v50 = vadd.f32 1.0, %v4707_v26 }
 0x463   : >> { %4722 = vpow2.f32 %v4254_v23  ;;  %v4711_v51 = vpop.eup %4710  ;;  %v3175_v24 = vadd.f32 1.0, %v4709_v18 }
 0x464   : >> { %4724 = vrcp.f32 %v3181_v53  ;;  %v4713_v40 = vpop.eup %4712  ;;  %v3182_v41 = vadd.f32 1.0, %v4711_v51 }
 0x465   : >> { %4726 = vpow2.f32 %v4247_v20  ;;  %v4715_v25 = vpop.eup %4714  ;;  %v3183_v0 = vadd.f32 1.0, %v4713_v40 }
 0x466   : >> { %3278 = vrot.lane.b32.xlu0 %v3242_v1, %s4858_s6  ;;  %3276 = vrot.lane.b32.xlu1 %v3241_v31, %s4858_s6  ;;  %4728 = vrcp.f32 %v3174_v50  ;;  %v4717_v57 = vpop.eup %4716  ;;  %v3176_v5 = vadd.f32 1.0, %v4715_v25 }
 0x467   : >> { %4730 = vrcp.f32 %v3175_v24  ;;  %v4719_v45 = vpop.eup %4718  ;;  %v3177_v60 = vadd.f32 1.0, %v4717_v57 }
 0x468   : >> { %4732 = vpow2.f32 %v4255_v21  ;;  %v3184_v22 = vadd.f32 1.0, %v4719_v45 }
 0x469   : >> { %4734 = vrcp.f32 %v3182_v41 }
 0x46a   : >> { %3282 = vrot.lane.b32.xlu0 %v3244_v17, %s4858_s6  ;;  %3280 = vrot.lane.b32.xlu1 %v3243_v62, %s4858_s6  ;;  %4736 = vrcp.f32 %v3183_v0 }
 0x46b   : >> { %4738 = vpow2.f32 %v4248_v49 }
 0x46c   : >> { %4740 = vrcp.f32 %v3176_v5 }
 0x46d   : >> { %4742 = vrcp.f32 %v3177_v60 }
 0x46e   : >> { %3286 = vrot.lane.b32.xlu0 %v3246_v52, %s4858_s6  ;;  %3284 = vrot.lane.b32.xlu1 %v3245_v63, %s4858_s6  ;;  %4744 = vpow2.f32 %v4256_v56 }
 0x46f   : >> { %v6425_v6 = vpop.eup %4720  ;;  %4746 = vrcp.f32 %v3184_v22 }
 0x470   : >> { %v4723_v61 = vpop.eup %4722  ;;  %4748 = vpow2.f32 %v4249_v19 }
 0x471   : >> { %v3185_v32 = vadd.f32 1.0, %v4723_v61  ;;  %v6433_v30 = vpop.eup %4724 }
 0x472   : >> { %3290 = vrot.lane.b32.xlu0 %v3248_v33, %s4858_s6  ;;  %3288 = vrot.lane.b32.xlu1 %v3247_v36, %s4858_s6  ;;  %v4727_v7 = vpop.eup %4726 }
 0x473   : >> { %v6437_v13 = vpop.eup %4728  ;;  %4750 = vrcp.f32 %v3185_v32  ;;  %v3178_v28 = vadd.f32 1.0, %v4727_v7 }
 0x474   : >> { %v6440_v58 = vpop.eup %4730  ;;  %4752 = vpow2.f32 %v4257_v12 }
 0x475   : >> { %v4733_v1 = vpop.eup %4732  ;;  %4754 = vrcp.f32 %v3178_v28 }
 0x476   : >> { %3294 = vrot.lane.b32.xlu0 %v3250_v47, %s4858_s6  ;;  %3292 = vrot.lane.b32.xlu1 %v3249_v34, %s4858_s6  ;;  %v6444_v52 = vpop.eup %4734  ;;  %v3186_v63 = vadd.f32 1.0, %v4733_v1 }
 0x477   : >> { %v6447_v8 = vpop.eup %4736 }
 0x478   : >> { %v4739_v36 = vpop.eup %4738  ;;  %4756 = vrcp.f32 %v3186_v63 }
 0x479   : >> { %v3179_v16 = vadd.f32 1.0, %v4739_v36 }
 0x47a   : >> { %3298 = vrot.lane.b32.xlu0 %v3252_v46, %s4858_s6  ;;  %3296 = vrot.lane.b32.xlu1 %v3251_v48, %s4858_s6  ;;  %v6452_v48 = vpop.eup %4740 }
 0x47b   : >> { %4758 = vrcp.f32 %v3179_v16  ;;  %v3319_v16 = vmul.f32 %v6437_v13, %v6428_v27 }
 0x47e   : >> { %3300 = vrot.lane.b32.xlu1 %v3253_v54, %s4858_s6  ;;  %v6455_v54 = vpop.eup %4742 }
 0x47f   : >> { %v4745_v59 = vpop.eup %4744 }
 0x480   : >> { %v6460_v38 = vpop.eup %4746  ;;  %v3187_v9 = vadd.f32 1.0, %v4745_v59 }
 0x481   : >> { %v4749_v55 = vpop.eup %4748 }
 0x482   : >> { %v6463_v37 = vpop.eup %4750  ;;  %v3180_v26 = vadd.f32 1.0, %v4749_v55  ;;  %4760 = vrcp.f32 %v3187_v9 }
 0x483   : >> { %v4753_v53 = vpop.eup %4752 }
 0x484   : >> { %v6470_v18 = vpop.eup %4754  ;;  %4762 = vrcp.f32 %v3180_v26  ;;  %v3188_v50 = vadd.f32 1.0, %v4753_v53 }
 0x485   : >> { %v6474_v24 = vpop.eup %4756 }
 0x486   : >> { %4764 = vrcp.f32 %v3188_v50 }
 0x488   : >> { %v6478_v41 = vpop.eup %4758 }
 0x48f   : >> { %v6482_v57 = vpop.eup %4760 }
 0x491   : >> { %v6485_v5 = vpop.eup %4762 }
 0x493   : >> { %v6490_v56 = vpop.eup %4764 }
 0x4b4   : >> { %v3351_v42 = vpop.permute.xlu0 %3350 }
 0x4b5   : >> { %v3398_v29 = vmul.f32 %v6425_v6, %v3351_v42 }
 0x4b7   : >> { %3430 = vrot.lane.b32.xlu0 %v3398_v29, %s4858_s6 }
 0x4b8   : >> { %v3367_v10 = vpop.permute.xlu0 %3366  ;;  %v3369_v39 = vpop.permute.xlu1 %3368 }
 0x4b9   : >> { %v3406_v11 = vmul.f32 %v6433_v30, %v3367_v10  ;;  %v3407_v47 = vmul.f32 %v6444_v52, %v3369_v39 }
 0x4bb   : >> { %3446 = vrot.lane.b32.xlu0 %v3406_v11, %s4858_s6 }
 0x4bc   : >> { %v3353_v2 = vpop.permute.xlu0 %3352  ;;  %v3355_v17 = vpop.permute.xlu1 %3354 }
 0x4bd   : >> { %v3399_v31 = vmul.f32 %v6437_v13, %v3353_v2  ;;  %v3400_v62 = vmul.f32 %v6440_v58, %v3355_v17 }
 0x4bf   : >> { %3432 = vrot.lane.b32.xlu1 %v3399_v31, %s4858_s6  ;;  %3434 = vrot.lane.b32.xlu0 %v3400_v62, %s4858_s6  ;;  %v3318_v62 = vmul.f32 %v6425_v6, %v6423_v3 }
 0x4c0   : >> { %v3371_v33 = vpop.permute.xlu0 %3370  ;;  %v3357_v46 = vpop.permute.xlu1 %3356 }
 0x4c1   : >> { %v3408_v34 = vmul.f32 %v6447_v8, %v3371_v33  ;;  %v3401_v14 = vmul.f32 %v6452_v48, %v3357_v46 }
 0x4c3   : >> { %3448 = vrot.lane.b32.xlu1 %v3407_v47, %s4858_s6  ;;  %3450 = vrot.lane.b32.xlu0 %v3408_v34, %s4858_s6 }
 0x4c4   : >> { %v3359_v4 = vpop.permute.xlu0 %3358  ;;  %v3373_v44 = vpop.permute.xlu1 %3372 }
 0x4c5   : >> { %v3402_v35 = vmul.f32 %v6455_v54, %v3359_v4  ;;  %v3409_v23 = vmul.f32 %v6460_v38, %v3373_v44 }
 0x4c7   : >> { %3436 = vrot.lane.b32.xlu1 %v3401_v14, %s4858_s6  ;;  %3438 = vrot.lane.b32.xlu0 %v3402_v35, %s4858_s6 }
 0x4c8   : >> { %v3375_v43 = vpop.permute.xlu0 %3374  ;;  %v3361_v20 = vpop.permute.xlu1 %3360 }
 0x4c9   : >> { %v3410_v15 = vmul.f32 %v6463_v37, %v3375_v43  ;;  %v3403_v51 = vmul.f32 %v6470_v18, %v3361_v20 }
 0x4cb   : >> { %3452 = vrot.lane.b32.xlu1 %v3409_v23, %s4858_s6  ;;  %3454 = vrot.lane.b32.xlu0 %v3410_v15, %s4858_s6 }
 0x4cc   : >> { %v3377_v40 = vpop.permute.xlu1 %3376  ;;  %v3363_v25 = vpop.permute.xlu0 %3362 }
 0x4cd   : >> { %v3411_v21 = vmul.f32 %v6474_v24, %v3377_v40  ;;  %v3404_v0 = vmul.f32 %v6478_v41, %v3363_v25 }
 0x4cf   : >> { %3440 = vrot.lane.b32.xlu1 %v3403_v51, %s4858_s6  ;;  %3442 = vrot.lane.b32.xlu0 %v3404_v0, %s4858_s6 }
 0x4d0   : >> { %v3379_v49 = vpop.permute.xlu0 %3378  ;;  %v3365_v60 = vpop.permute.xlu1 %3364 }
 0x4d1   : >> { %v3412_v45 = vmul.f32 %v6482_v57, %v3379_v49  ;;  %v3405_v61 = vmul.f32 %v6485_v5, %v3365_v60 }
 0x4d3   : >> { %3456 = vrot.lane.b32.xlu1 %v3411_v21, %s4858_s6  ;;  %3458 = vrot.lane.b32.xlu0 %v3412_v45, %s4858_s6 }
 0x4d4   : >> { %v3381_v42 = vpop.permute.xlu1 %3380  ;;  %v3275_v29 = vpop.permute.xlu0 %3274 }
 0x4d5   : >> { %v3413_v22 = vmul.f32 %v6490_v56, %v3381_v42  ;;  %v3320_v3 = vmul.f32 %v6440_v58, %v3275_v29 }
 0x4d7   : >> { %3444 = vrot.lane.b32.xlu1 %v3405_v61, %s4858_s6 }
 0x4d8   : >> { %v3279_v19 = vpop.permute.xlu0 %3278  ;;  %v3277_v32 = vpop.permute.xlu1 %3276 }
 0x4d9   : >> { %v3321_v15 = vmul.f32 %v6452_v48, %v3277_v32  ;;  %v3322_v53 = vmul.f32 %v6455_v54, %v3279_v19 }
 0x4db   : >> { %3460 = vrot.lane.b32.xlu1 %v3413_v22, %s4858_s6 }
 0x4dc   : >> { %v6494_v10 = vpop.permute.xlu0 %3282  ;;  %v3281_v7 = vpop.permute.xlu1 %3280 }
 0x4dd   : >> { %v3323_v22 = vmul.f32 %v6470_v18, %v3281_v7 }
 0x4e0   : >> { %v3287_v39 = vpop.permute.xlu0 %3286  ;;  %v6496_v11 = vpop.permute.xlu1 %3284 }
 0x4e1   : >> { %v3326_v36 = vmul.f32 %v6433_v30, %v3287_v39 }
 0x4e4   : >> { %v3291_v12 = vpop.permute.xlu0 %3290  ;;  %v3289_v28 = vpop.permute.xlu1 %3288 }
 0x4e5   : >> { %v3327_v44 = vmul.f32 %v6444_v52, %v3289_v28  ;;  %v3328_v55 = vmul.f32 %v6447_v8, %v3291_v12 }
 0x4e8   : >> { %v3295_v2 = vpop.permute.xlu0 %3294  ;;  %v3293_v1 = vpop.permute.xlu1 %3292 }
 0x4e9   : >> { %v3329_v21 = vmul.f32 %v6460_v38, %v3293_v1  ;;  %v3330_v0 = vmul.f32 %v6463_v37, %v3295_v2 }
 0x4ec   : >> { %v6498_v31 = vpop.permute.xlu0 %3298  ;;  %v3297_v17 = vpop.permute.xlu1 %3296 }
 0x4ed   : >> { %v3331_v12 = vmul.f32 %v6474_v24, %v3297_v17 }
 0x4f0   : >> { %v6504_v47 = vpop.permute.xlu1 %3300 }
 0x529   : >> { %v3431_v63 = vpop.permute.xlu0 %3430 }
 0x52a   : >> { %v3478_v33 = vadd.f32 %v3431_v63, %v3318_v62  ;;  %v3324_v62 = vmul.f32 %v6478_v41, %v6494_v10  ;;  %v3325_v10 = vmul.f32 %v6485_v5, %v6496_v11 }
 0x52c   : >> { %4766 = vtanh.f32 %v3478_v33  ;;  %3606 = vrot.lane.b32.xlu0 %v3478_v33, %s4860_s23 }
 0x52d   : >> { %v3447_v34 = vpop.permute.xlu0 %3446 }
 0x52e   : >> { %v6506_v46 = vadd.f32 %v3447_v34, %v3326_v36  ;;  %v3332_v34 = vmul.f32 %v6482_v57, %v6498_v31 }
 0x530   : >> { %4768 = vtanh.f32 %v6506_v46 }
 0x531   : >> { %v3433_v4 = vpop.permute.xlu1 %3432  ;;  %v3435_v59 = vpop.permute.xlu0 %3434 }
 0x532   : >> { %v3479_v14 = vadd.f32 %v3433_v4, %v3319_v16  ;;  %v6512_v35 = vadd.f32 %v3435_v59, %v3320_v3 }
 0x534   : >> { %4770 = vtanh.f32 %v3479_v14  ;;  %3608 = vrot.lane.b32.xlu1 %v3479_v14, %s4860_s23 }
 0x535   : >> { %4772 = vtanh.f32 %v6512_v35  ;;  %v3449_v9 = vpop.permute.xlu1 %3448  ;;  %v3451_v27 = vpop.permute.xlu0 %3450 }
 0x536   : >> { %v6518_v43 = vadd.f32 %v3449_v9, %v3327_v44  ;;  %v6520_v23 = vadd.f32 %v3451_v27, %v3328_v55  ;;  %v3333_v55 = vmul.f32 %v6490_v56, %v6504_v47 }
 0x538   : >> { %4774 = vtanh.f32 %v6518_v43 }
 0x539   : >> { %v4767_v26 = vpop.eup %4766  ;;  %4776 = vtanh.f32 %v6520_v23  ;;  %v3437_v20 = vpop.permute.xlu1 %3436 }
 0x53a   : >> { %v3439_v50 = vpop.permute.xlu0 %3438  ;;  %v6526_v51 = vadd.f32 %v3437_v20, %v3321_v15  ;;  %3526 = vrot.lane.b32.xlu0 %v4767_v26, %s4858_s6 }
 0x53b   : >> { %v6529_v40 = vadd.f32 %v3439_v50, %v3322_v53 }
 0x53c   : >> { %4778 = vtanh.f32 %v6526_v51 }
 0x53d   : >> { %v4769_v25 = vpop.eup %4768  ;;  %4780 = vtanh.f32 %v6529_v40  ;;  %v3453_v49 = vpop.permute.xlu1 %3452 }
 0x53e   : >> { %v3455_v45 = vpop.permute.xlu0 %3454  ;;  %v6535_v60 = vadd.f32 %v3453_v49, %v3329_v21  ;;  %3542 = vrot.lane.b32.xlu0 %v4769_v25, %s4858_s6 }
 0x53f   : >> { %v6538_v61 = vadd.f32 %v3455_v45, %v3330_v0 }
 0x540   : >> { %4782 = vtanh.f32 %v6535_v60 }
 0x541   : >> { %v4771_v42 = vpop.eup %4770  ;;  %4784 = vtanh.f32 %v6538_v61  ;;  %v3441_v19 = vpop.permute.xlu1 %3440 }
 0x542   : >> { %v4773_v29 = vpop.eup %4772  ;;  %3528 = vrot.lane.b32.xlu1 %v4771_v42, %s4858_s6  ;;  %v3483_v32 = vadd.f32 %v3441_v19, %v3323_v22  ;;  %v3443_v33 = vpop.permute.xlu0 %3442 }
 0x543   : >> { %3530 = vrot.lane.b32.xlu0 %v4773_v29, %s4858_s6  ;;  %v3484_v36 = vadd.f32 %v3443_v33, %v3324_v62 }
 0x544   : >> { %4786 = vtanh.f32 %v3483_v32 }
 0x545   : >> { %v4775_v39 = vpop.eup %4774  ;;  %v3457_v2 = vpop.permute.xlu1 %3456 }
 0x546   : >> { %v4777_v28 = vpop.eup %4776  ;;  %3544 = vrot.lane.b32.xlu1 %v4775_v39, %s4858_s6  ;;  %v3491_v1 = vadd.f32 %v3457_v2, %v3331_v12  ;;  %v3459_v3 = vpop.permute.xlu0 %3458 }
 0x547   : >> { %3546 = vrot.lane.b32.xlu0 %v4777_v28, %s4858_s6  ;;  %v3492_v4 = vadd.f32 %v3459_v3, %v3332_v34 }
 0x548   : >> { %4788 = vtanh.f32 %v3491_v1 }
 0x549   : >> { %v4779_v7 = vpop.eup %4778  ;;  %4790 = vtanh.f32 %v3484_v36  ;;  %v3445_v59 = vpop.permute.xlu1 %3444 }
 0x54a   : >> { %v4781_v63 = vpop.eup %4780  ;;  %3532 = vrot.lane.b32.xlu1 %v4779_v7, %s4858_s6  ;;  %4792 = vtanh.f32 %v3492_v4  ;;  %v3485_v14 = vadd.f32 %v3445_v59, %v3325_v10 }
 0x54b   : >> { %3534 = vrot.lane.b32.xlu0 %v4781_v63, %s4858_s6 }
 0x54c   : >> { %4794 = vtanh.f32 %v3485_v14 }
 0x54d   : >> { %v4783_v17 = vpop.eup %4782  ;;  %v3461_v31 = vpop.permute.xlu1 %3460 }
 0x54e   : >> { %v4785_v16 = vpop.eup %4784  ;;  %3548 = vrot.lane.b32.xlu1 %v4783_v17, %s4858_s6  ;;  %v3493_v9 = vadd.f32 %v3461_v31, %v3333_v55 }
 0x54f   : >> { %3550 = vrot.lane.b32.xlu0 %v4785_v16, %s4858_s6 }
 0x550   : >> { %4796 = vtanh.f32 %v3493_v9 }
 0x551   : >> { %v4787_v44 = vpop.eup %4786 }
 0x552   : >> { %3536 = vrot.lane.b32.xlu1 %v4787_v44, %s4858_s6 }
 0x555   : >> { %v4789_v27 = vpop.eup %4788 }
 0x556   : >> { %3552 = vrot.lane.b32.xlu1 %v4789_v27, %s4858_s6  ;;  %v4791_v11 = vpop.eup %4790 }
 0x557   : >> { %3538 = vrot.lane.b32.xlu0 %v4791_v11, %s4858_s6  ;;  %v4793_v15 = vpop.eup %4792 }
 0x559   : >> { %v4795_v26 = vpop.eup %4794 }
 0x55a   : >> { %3540 = vrot.lane.b32.xlu1 %v4795_v26, %s4858_s6 }
 0x55b   : >> { %3554 = vrot.lane.b32.xlu0 %v4793_v15, %s4858_s6 }
 0x55d   : >> { %v4797_v47 = vpop.eup %4796 }
 0x55e   : >> { %3556 = vrot.lane.b32.xlu1 %v4797_v47, %s4858_s6 }
 0x55f   : >> { %3610 = vrot.lane.b32.xlu0 %v6512_v35, %s4860_s23 }
 0x562   : >> { %3612 = vrot.lane.b32.xlu1 %v6526_v51, %s4860_s23 }
 0x563   : >> { %3614 = vrot.lane.b32.xlu0 %v6529_v40, %s4860_s23 }
 0x566   : >> { %3616 = vrot.lane.b32.xlu1 %v3483_v32, %s4860_s23 }
 0x567   : >> { %3618 = vrot.lane.b32.xlu0 %v3484_v36, %s4860_s23 }
 0x56a   : >> { %3620 = vrot.lane.b32.xlu1 %v3485_v14, %s4860_s23 }
 0x56b   : >> { %3622 = vrot.lane.b32.xlu0 %v6506_v46, %s4860_s23 }
 0x56e   : >> { %3624 = vrot.lane.b32.xlu1 %v6518_v43, %s4860_s23 }
 0x56f   : >> { %3626 = vrot.lane.b32.xlu0 %v6520_v23, %s4860_s23 }
 0x572   : >> { %3628 = vrot.lane.b32.xlu1 %v6535_v60, %s4860_s23 }
 0x573   : >> { %3630 = vrot.lane.b32.xlu0 %v6538_v61, %s4860_s23 }
 0x576   : >> { %3632 = vrot.lane.b32.xlu1 %v3491_v1, %s4860_s23 }
 0x577   : >> { %3634 = vrot.lane.b32.xlu0 %v3492_v4, %s4860_s23 }
 0x57a   : >> { %3636 = vrot.lane.b32.xlu1 %v3493_v9, %s4860_s23 }
 0x59e   : >> { %v3607_v46 = vpop.permute.xlu0 %3606 }
 0x59f   : >> { %3655 = vst.msk [vmem:[%s6267_s3] sm:$0xff] %vm3654_vm5, %v3607_v46 }
 0x5a6   : >> { %v3609_v35 = vpop.permute.xlu1 %3608 }
 0x5a7   : >> { %3656 = vst.msk [vmem:[%s6267_s3 + $0x8] sm:$0xff] %vm3654_vm5, %v3609_v35 }
 0x5ac   : >> { %v3527_v43 = vpop.permute.xlu0 %3526 }
 0x5ad   : >> { %v3574_v23 = vmul.f32 %v6425_v6, %v3527_v43 }
 0x5af   : >> { %3687 = vrot.lane.b32.xlu0 %v3574_v23, %s4861_s24 }
 0x5b0   : >> { %v3543_v53 = vpop.permute.xlu0 %3542 }
 0x5b1   : >> { %v3582_v20 = vmul.f32 %v6433_v30, %v3543_v53 }
 0x5b3   : >> { %3703 = vrot.lane.b32.xlu0 %v3582_v20, %s4861_s24 }
 0x5b4   : >> { %v3529_v50 = vpop.permute.xlu1 %3528 }
 0x5b5   : >> { %v3531_v51 = vpop.permute.xlu0 %3530  ;;  %v3575_v40 = vmul.f32 %v6437_v13, %v3529_v50 }
 0x5b6   : >> { %v3576_v21 = vmul.f32 %v6440_v58, %v3531_v51 }
 0x5b7   : >> { %3689 = vrot.lane.b32.xlu1 %v3575_v40, %s4861_s24 }
 0x5b8   : >> { %3691 = vrot.lane.b32.xlu0 %v3576_v21, %s4861_s24  ;;  %v3545_v25 = vpop.permute.xlu1 %3544 }
 0x5b9   : >> { %v3547_v6 = vpop.permute.xlu0 %3546  ;;  %v3583_v0 = vmul.f32 %v6444_v52, %v3545_v25 }
 0x5ba   : >> { %v3584_v49 = vmul.f32 %v6447_v8, %v3547_v6 }
 0x5bb   : >> { %3705 = vrot.lane.b32.xlu1 %v3583_v0, %s4861_s24 }
 0x5bc   : >> { %3707 = vrot.lane.b32.xlu0 %v3584_v49, %s4861_s24  ;;  %v3533_v30 = vpop.permute.xlu1 %3532 }
 0x5bd   : >> { %v3535_v45 = vpop.permute.xlu0 %3534  ;;  %v3577_v13 = vmul.f32 %v6452_v48, %v3533_v30 }
 0x5be   : >> { %v3578_v58 = vmul.f32 %v6455_v54, %v3535_v45 }
 0x5bf   : >> { %3693 = vrot.lane.b32.xlu1 %v3577_v13, %s4861_s24 }
 0x5c0   : >> { %3695 = vrot.lane.b32.xlu0 %v3578_v58, %s4861_s24  ;;  %v3549_v60 = vpop.permute.xlu1 %3548 }
 0x5c1   : >> { %v3551_v61 = vpop.permute.xlu0 %3550  ;;  %v3585_v52 = vmul.f32 %v6460_v38, %v3549_v60 }
 0x5c2   : >> { %v3586_v8 = vmul.f32 %v6463_v37, %v3551_v61 }
 0x5c3   : >> { %3709 = vrot.lane.b32.xlu1 %v3585_v52, %s4861_s24 }
 0x5c4   : >> { %3711 = vrot.lane.b32.xlu0 %v3586_v8, %s4861_s24  ;;  %v3537_v42 = vpop.permute.xlu1 %3536 }
 0x5c5   : >> { %v3579_v48 = vmul.f32 %v6470_v18, %v3537_v42 }
 0x5c7   : >> { %3697 = vrot.lane.b32.xlu1 %v3579_v48, %s4861_s24 }
 0x5c8   : >> { %v3553_v54 = vpop.permute.xlu1 %3552 }
 0x5c9   : >> { %v3587_v22 = vmul.f32 %v6474_v24, %v3553_v54  ;;  %v3539_v29 = vpop.permute.xlu0 %3538 }
 0x5ca   : >> { %v3580_v38 = vmul.f32 %v6478_v41, %v3539_v29 }
 0x5cb   : >> { %3713 = vrot.lane.b32.xlu1 %v3587_v22, %s4861_s24 }
 0x5cc   : >> { %3699 = vrot.lane.b32.xlu0 %v3580_v38, %s4861_s24  ;;  %v3541_v32 = vpop.permute.xlu1 %3540 }
 0x5cd   : >> { %v3555_v37 = vpop.permute.xlu0 %3554  ;;  %v3581_v18 = vmul.f32 %v6485_v5, %v3541_v32 }
 0x5ce   : >> { %v3588_v19 = vmul.f32 %v6482_v57, %v3555_v37 }
 0x5cf   : >> { %3701 = vrot.lane.b32.xlu1 %v3581_v18, %s4861_s24 }
 0x5d0   : >> { %3715 = vrot.lane.b32.xlu0 %v3588_v19, %s4861_s24  ;;  %v3557_v41 = vpop.permute.xlu1 %3556 }
 0x5d1   : >> { %v3611_v24 = vpop.permute.xlu0 %3610  ;;  %v3589_v39 = vmul.f32 %v6490_v56, %v3557_v41 }
 0x5d2   : >> { %3657 = vst.msk [vmem:[%s6267_s3 + $0x10] sm:$0xff] %vm3654_vm5, %v3611_v24 }
 0x5d3   : >> { %3717 = vrot.lane.b32.xlu1 %v3589_v39, %s4861_s24 }
 0x5d4   : >> { %v3613_v57 = vpop.permute.xlu1 %3612 }
 0x5d5   : >> { %v3615_v12 = vpop.permute.xlu0 %3614  ;;  %3658 = vst.msk [vmem:[%s6267_s3 + $0x18] sm:$0xff] %vm3654_vm5, %v3613_v57 }
 0x5d6   : >> { %3659 = vst.msk [vmem:[%s6267_s3 + $0x20] sm:$0xff] %vm3654_vm5, %v3615_v12 }
 0x5d8   : >> { %v3617_v28 = vpop.permute.xlu1 %3616 }
 0x5d9   : >> { %v3619_v5 = vpop.permute.xlu0 %3618  ;;  %3660 = vst.msk [vmem:[%s6267_s3 + $0x28] sm:$0xff] %vm3654_vm5, %v3617_v28 }
 0x5da   : >> { %3661 = vst.msk [vmem:[%s6267_s3 + $0x30] sm:$0xff] %vm3654_vm5, %v3619_v5 }
 0x5dc   : >> { %v3621_v2 = vpop.permute.xlu1 %3620 }
 0x5dd   : >> { %v3623_v56 = vpop.permute.xlu0 %3622  ;;  %3662 = vst.msk [vmem:[%s6267_s3 + $0x38] sm:$0xff] %vm3654_vm5, %v3621_v2 }
 0x5de   : >> { %3663 = vst.msk [vmem:[%s6267_s3 + $0x40] sm:$0xff] %vm3654_vm5, %v3623_v56 }
 0x5e0   : >> { %v3625_v7 = vpop.permute.xlu1 %3624 }
 0x5e1   : >> { %v3627_v1 = vpop.permute.xlu0 %3626  ;;  %3664 = vst.msk [vmem:[%s6267_s3 + $0x48] sm:$0xff] %vm3654_vm5, %v3625_v7 }
 0x5e2   : >> { %3665 = vst.msk [vmem:[%s6267_s3 + $0x50] sm:$0xff] %vm3654_vm5, %v3627_v1 }
 0x5e4   : >> { %v3629_v63 = vpop.permute.xlu1 %3628 }
 0x5e5   : >> { %v3631_v62 = vpop.permute.xlu0 %3630  ;;  %3666 = vst.msk [vmem:[%s6267_s3 + $0x58] sm:$0xff] %vm3654_vm5, %v3629_v63 }
 0x5e6   : >> { %3667 = vst.msk [vmem:[%s6267_s3 + $0x60] sm:$0xff] %vm3654_vm5, %v3631_v62 }
 0x5e8   : >> { %v3633_v36 = vpop.permute.xlu1 %3632 }
 0x5e9   : >> { %v3635_v33 = vpop.permute.xlu0 %3634  ;;  %3668 = vst.msk [vmem:[%s6267_s3 + $0x68] sm:$0xff] %vm3654_vm5, %v3633_v36 }
 0x5ea   : >> { %3669 = vst.msk [vmem:[%s6267_s3 + $0x70] sm:$0xff] %vm3654_vm5, %v3635_v33 }
 0x5ec   : >> { %v3637_v17 = vpop.permute.xlu1 %3636 }
 0x5ed   : >> { %3670 = vst.msk [vmem:[%s6267_s3 + $0x78] sm:$0xff] %vm3654_vm5, %v3637_v17 }
 0x621   : >> { %v3688_v34 = vpop.permute.xlu0 %3687 }
 0x622   : >> { %3736 = vst.msk [vmem:[%s6654_s25] sm:$0xff] %vm3654_vm5, %v3688_v34 }
 0x625   : >> { %v3704_v16 = vpop.permute.xlu0 %3703 }
 0x626   : >> { %3744 = vst.msk [vmem:[%s6654_s25 + $0x40] sm:$0xff] %vm3654_vm5, %v3704_v16 }
 0x629   : >> { %v3690_v3 = vpop.permute.xlu1 %3689 }
 0x62a   : >> { %v3692_v10 = vpop.permute.xlu0 %3691  ;;  %3737 = vst.msk [vmem:[%s6654_s25 + $0x8] sm:$0xff] %vm3654_vm5, %v3690_v3 }
 0x62b   : >> { %3738 = vst.msk [vmem:[%s6654_s25 + $0x10] sm:$0xff] %vm3654_vm5, %v3692_v10 }
 0x62d   : >> { %v3706_v4 = vpop.permute.xlu1 %3705 }
 0x62e   : >> { %v3708_v59 = vpop.permute.xlu0 %3707  ;;  %3745 = vst.msk [vmem:[%s6654_s25 + $0x48] sm:$0xff] %vm3654_vm5, %v3706_v4 }
 0x62f   : >> { %3746 = vst.msk [vmem:[%s6654_s25 + $0x50] sm:$0xff] %vm3654_vm5, %v3708_v59 }
 0x631   : >> { %v3694_v14 = vpop.permute.xlu1 %3693 }
 0x632   : >> { %v3696_v44 = vpop.permute.xlu0 %3695  ;;  %3739 = vst.msk [vmem:[%s6654_s25 + $0x18] sm:$0xff] %vm3654_vm5, %v3694_v14 }
 0x633   : >> { %3740 = vst.msk [vmem:[%s6654_s25 + $0x20] sm:$0xff] %vm3654_vm5, %v3696_v44 }
 0x635   : >> { %v3710_v55 = vpop.permute.xlu1 %3709 }
 0x636   : >> { %v3712_v31 = vpop.permute.xlu0 %3711  ;;  %3747 = vst.msk [vmem:[%s6654_s25 + $0x58] sm:$0xff] %vm3654_vm5, %v3710_v55 }
 0x637   : >> { %3748 = vst.msk [vmem:[%s6654_s25 + $0x60] sm:$0xff] %vm3654_vm5, %v3712_v31 }
 0x639   : >> { %v3698_v9 = vpop.permute.xlu1 %3697 }
 0x63a   : >> { %3741 = vst.msk [vmem:[%s6654_s25 + $0x28] sm:$0xff] %vm3654_vm5, %v3698_v9 }
 0x63d   : >> { %v3714_v27 = vpop.permute.xlu1 %3713 }
 0x63e   : >> { %3749 = vst.msk [vmem:[%s6654_s25 + $0x68] sm:$0xff] %vm3654_vm5, %v3714_v27  ;;  %v3700_v11 = vpop.permute.xlu0 %3699 }
 0x63f   : >> { %3742 = vst.msk [vmem:[%s6654_s25 + $0x30] sm:$0xff] %vm3654_vm5, %v3700_v11 }
 0x641   : >> { %v3702_v26 = vpop.permute.xlu1 %3701 }
 0x642   : >> { %v3716_v15 = vpop.permute.xlu0 %3715  ;;  %3743 = vst.msk [vmem:[%s6654_s25 + $0x38] sm:$0xff] %vm3654_vm5, %v3702_v26  ;;  %2816 = sbr.rel (!%p2814_p9) target bundleno = 838 (0x346), region = 74 }
 0x643   : >> { %3750 = vst.msk [vmem:[%s6654_s25 + $0x70] sm:$0xff] %vm3654_vm5, %v3716_v15 }
 0x645   : >> { %v3718_v47 = vpop.permute.xlu1 %3717 }
 0x646   : >> { %3751 = vst.msk [vmem:[%s6654_s25 + $0x78] sm:$0xff] %vm3654_vm5, %v3718_v47 }
 0x64d   : > { %v3752_v46 = vld [vmem:[%s4919_s28] sm:$0xff]  ;;  %v3753_v35 = vld [vmem:[%s4919_s28 + $0x8] sm:$0xff]  ;;  %v3754_v43 = vld [vmem:[%s4919_s28 + $0x10] sm:$0xff] }
 0x64e   : > { %3785 = vst.msk [vmem:[#allocation2 + $0x19] sm:$0xff] %vm3654_vm5, %v3752_v46  ;;  %3786 = vst.msk [vmem:[#allocation2 + $0x21] sm:$0xff] %vm3654_vm5, %v3753_v35  ;;  %v3755_v23 = vld [vmem:[%s4919_s28 + $0x18] sm:$0xff]  ;;  %v3756_v53 = vld [vmem:[%s4919_s28 + $0x20] sm:$0xff] }
 0x64f   : > { %3787 = vst.msk [vmem:[#allocation2 + $0x31] sm:$0xff] %vm3654_vm5, %v3754_v43  ;;  %v3757_v20 = vld [vmem:[%s4919_s28 + $0x28] sm:$0xff]  ;;  %3788 = vst.msk [vmem:[#allocation2 + $0x39] sm:$0xff] %vm3654_vm5, %v3755_v23  ;;  %v3758_v50 = vld [vmem:[%s4919_s28 + $0x30] sm:$0xff] }
 0x650   : > { %3789 = vst.msk [vmem:[#allocation2 + $0x49] sm:$0xff] %vm3654_vm5, %v3756_v53  ;;  %3790 = vst.msk [vmem:[#allocation2 + $0x51] sm:$0xff] %vm3654_vm5, %v3757_v20  ;;  %v3759_v51 = vld [vmem:[%s4919_s28 + $0x38] sm:$0xff]  ;;  %v3760_v40 = vld [vmem:[%s4919_s28 + $0x40] sm:$0xff] }
 0x651   : > { %3791 = vst.msk [vmem:[#allocation2 + $0x61] sm:$0xff] %vm3654_vm5, %v3758_v50  ;;  %3792 = vst.msk [vmem:[#allocation2 + $0x69] sm:$0xff] %vm3654_vm5, %v3759_v51  ;;  %v3761_v21 = vld [vmem:[%s4919_s28 + $0x48] sm:$0xff]  ;;  %v3762_v25 = vld [vmem:[%s4919_s28 + $0x50] sm:$0xff] }
 0x652   : > { %3793 = vst.msk [vmem:[#allocation2 + $0x79] sm:$0xff] %vm3654_vm5, %v3760_v40  ;;  %v3763_v6 = vld [vmem:[%s4919_s28 + $0x58] sm:$0xff]  ;;  %3794 = vst.msk [vmem:[#allocation2 + $0x81] sm:$0xff] %vm3654_vm5, %v3761_v21  ;;  %v3764_v0 = vld [vmem:[%s4919_s28 + $0x60] sm:$0xff] }
 0x653   : > { %3795 = vst.msk [vmem:[#allocation2 + $0x91] sm:$0xff] %vm3654_vm5, %v3762_v25  ;;  %3796 = vst.msk [vmem:[#allocation2 + $0x99] sm:$0xff] %vm3654_vm5, %v3763_v6  ;;  %v3765_v49 = vld [vmem:[%s4919_s28 + $0x68] sm:$0xff]  ;;  %v3766_v30 = vld [vmem:[%s4919_s28 + $0x70] sm:$0xff] }
 0x654   : > { %3797 = vst.msk [vmem:[#allocation2 + $0xa9] sm:$0xff] %vm3654_vm5, %v3764_v0  ;;  %3798 = vst.msk [vmem:[#allocation2 + $0xb1] sm:$0xff] %vm3654_vm5, %v3765_v49  ;;  %v3767_v45 = vld [vmem:[%s4919_s28 + $0x78] sm:$0xff]  ;;  %v3768_v13 = vld [vmem:[%s4919_s28 + $0x80] sm:$0xff] }
 0x655   : > { %3799 = vst.msk [vmem:[#allocation2 + $0xc1] sm:$0xff] %vm3654_vm5, %v3766_v30  ;;  %v3769_v58 = vld [vmem:[%s4919_s28 + $0x88] sm:$0xff]  ;;  %3800 = vst.msk [vmem:[#allocation2 + $0xc9] sm:$0xff] %vm3654_vm5, %v3767_v45  ;;  %v3770_v60 = vld [vmem:[%s4919_s28 + $0x90] sm:$0xff] }
 0x656   : > { %3801 = vst.msk [vmem:[#allocation2 + $0xd9] sm:$0xff] %vm3654_vm5, %v3768_v13  ;;  %3802 = vst.msk [vmem:[#allocation2 + $0xe1] sm:$0xff] %vm3654_vm5, %v3769_v58  ;;  %v3771_v61 = vld [vmem:[%s4919_s28 + $0x98] sm:$0xff]  ;;  %v3772_v52 = vld [vmem:[%s4919_s28 + $0xa0] sm:$0xff] }
 0x657   : > { %3803 = vst.msk [vmem:[#allocation2 + $0xf1] sm:$0xff] %vm3654_vm5, %v3770_v60  ;;  %3804 = vst.msk [vmem:[#allocation2 + $0xf9] sm:$0xff] %vm3654_vm5, %v3771_v61  ;;  %v3773_v8 = vld [vmem:[%s4919_s28 + $0xa8] sm:$0xff]  ;;  %v3774_v42 = vld [vmem:[%s4919_s28 + $0xb0] sm:$0xff] }
 0x658   : > { %3805 = vst.msk [vmem:[#allocation2 + $0x109] sm:$0xff] %vm3654_vm5, %v3772_v52  ;;  %v3775_v48 = vld [vmem:[%s4919_s28 + $0xb8] sm:$0xff]  ;;  %3806 = vst.msk [vmem:[#allocation2 + $0x111] sm:$0xff] %vm3654_vm5, %v3773_v8  ;;  %v3776_v54 = vld [vmem:[%s4919_s28 + $0xc0] sm:$0xff] }
 0x659   : > { %3807 = vst.msk [vmem:[#allocation2 + $0x121] sm:$0xff] %vm3654_vm5, %v3774_v42  ;;  %3808 = vst.msk [vmem:[#allocation2 + $0x129] sm:$0xff] %vm3654_vm5, %v3775_v48  ;;  %v3777_v22 = vld [vmem:[%s4919_s28 + $0xc8] sm:$0xff]  ;;  %v3778_v29 = vld [vmem:[%s4919_s28 + $0xd0] sm:$0xff] }
 0x65a   : > { %3809 = vst.msk [vmem:[#allocation2 + $0x139] sm:$0xff] %vm3654_vm5, %v3776_v54  ;;  %3810 = vst.msk [vmem:[#allocation2 + $0x141] sm:$0xff] %vm3654_vm5, %v3777_v22  ;;  %v3779_v38 = vld [vmem:[%s4919_s28 + $0xd8] sm:$0xff]  ;;  %v3780_v37 = vld [vmem:[%s4919_s28 + $0xe0] sm:$0xff] }
 0x65b   : > { %3811 = vst.msk [vmem:[#allocation2 + $0x151] sm:$0xff] %vm3654_vm5, %v3778_v29  ;;  %v3781_v19 = vld [vmem:[%s4919_s28 + $0xe8] sm:$0xff]  ;;  %3812 = vst.msk [vmem:[#allocation2 + $0x159] sm:$0xff] %vm3654_vm5, %v3779_v38  ;;  %v3782_v32 = vld [vmem:[%s4919_s28 + $0xf0] sm:$0xff] }
 0x65c   : > { %3813 = vst.msk [vmem:[#allocation2 + $0x169] sm:$0xff] %vm3654_vm5, %v3780_v37  ;;  %3814 = vst.msk [vmem:[#allocation2 + $0x171] sm:$0xff] %vm3654_vm5, %v3781_v19  ;;  %v3783_v18 = vld [vmem:[%s4919_s28 + $0xf8] sm:$0xff] }
 0x65d   : > { %3815 = vst.msk [vmem:[#allocation2 + $0x181] sm:$0xff] %vm3654_vm5, %v3782_v32  ;;  %3816 = vst.msk [vmem:[#allocation2 + $0x189] sm:$0xff] %vm3654_vm5, %v3783_v18 }
 0x65e PF: > { %s12_s13 = sadd.s32 1, %s4840_s13   ;;  %s6804_s9 = smov %s4832_s11 }
 0x65f   : > { %p9_p10 = scmp.ge.s32.totalorder %s12_s13, 10   ;;  %s6805_s10 = smov %s4836_s12 }
 0x660   : > { %s6806_s11 = smov %s6809_s14  ;;  %s6807_s12 = smov %s6813_s15 }
 0x661   :  { %11 = sbr.rel (!%p9_p10) target bundleno = 3 (0x3), region = 85 }

</bundles_post_ra>
